<compile_context>
chip_gen: v7x
topology: tpu7x:2x2x1
jax: 0.10.0
libtpu: 0.0.40
codegen_flags: <defaults>
</compile_context>

<pallas_src>
import functools

import numpy as np
import jax
import jax.numpy as jnp
from jax import lax
from jax.experimental import pallas as pl
from jax.experimental.pallas import tpu as pltpu

LANES = 128   # lane-dense channel width used everywhere inside the kernel


# ----------------------------- host-side packing ----------------------------

def _pad_lanes(v):
    """Pad a per-channel (C,) f32 vector to (LANES,) with zeros."""
    return jnp.zeros((LANES,), jnp.float32).at[: v.shape[0]].set(v)


def _pack_conv_taps(w):
    """(cout, cin, kh, kw) f32 -> (kh*kw, LANES, LANES) bf16 per-tap matrices."""
    cout, cin, kh, kw = w.shape
    wt = jnp.transpose(w, (2, 3, 1, 0)).reshape(kh * kw, cin, cout)
    full = jnp.zeros((kh * kw, LANES, LANES), jnp.float32).at[:, :cin, :cout].set(wt)
    return full.astype(jnp.bfloat16)


def _make_conv(key, cin, cout, k, bn):
    """Random conv weights + folded inference-BN (or bias) affine, like the ref."""
    ks = jax.random.split(key, 6)
    w = 0.05 * jax.random.normal(ks[0], (cout, cin, k, k), jnp.float32)
    if bn:
        gamma = 1.0 + 0.1 * jax.random.normal(ks[1], (cout,), jnp.float32)
        beta = 0.1 * jax.random.normal(ks[2], (cout,), jnp.float32)
        mean = 0.1 * jax.random.normal(ks[3], (cout,), jnp.float32)
        var = 1.0 + 0.1 * jnp.abs(jax.random.normal(ks[4], (cout,), jnp.float32))
        scale = gamma / jnp.sqrt(var + 1e-5)        # BN folded (inference mode)
        shift = beta - mean * scale
    else:
        scale = jnp.ones((cout,), jnp.float32)
        shift = 0.1 * jax.random.normal(ks[5], (cout,), jnp.float32)   # conv bias
    return {'w': w, 'scale': scale, 'shift': shift}


def _pool_s2_mats(H, W):
    """nn.MaxPool2d(2,2): 4 one-hot gather matrices (4, Ho*Wo, H*W)."""
    Ho, Wo = H // 2, W // 2
    mats = np.zeros((4, Ho * Wo, H * W), np.float32)
    for i in range(2):
        for j in range(2):
            t = i * 2 + j
            for hh in range(Ho):
                for ww in range(Wo):
                    mats[t, hh * Wo + ww, (2 * hh + i) * W + (2 * ww + j)] = 1.0
    return jnp.asarray(mats)


def _pool_s1_mats(H, W):
    """MaxPoolStride1 (2x2, stride 1, replicate pad): 4 gather matrices (4, H*W, H*W)."""
    mats = np.zeros((4, H * W, H * W), np.float32)
    for i in range(2):
        for j in range(2):
            t = i * 2 + j
            for h in range(H):
                for w in range(W):
                    hi, wi = min(h + i, H - 1), min(w + j, W - 1)
                    mats[t, h * W + w, hi * W + wi] = 1.0
    return jnp.asarray(mats)


def _reorg_mats(H, W, s):
    """Reorg gather: block q=i*s+j, out (hh,ww) <- in (hh*s+i, ww*s+j)."""
    Ho, Wo = H // s, W // s
    mats = np.zeros((s * s, Ho * Wo, H * W), np.float32)
    for i in range(s):
        for j in range(s):
            q = i * s + j
            for hh in range(Ho):
                for ww in range(Wo):
                    mats[q, hh * Wo + ww, (hh * s + i) * W + (ww * s + j)] = 1.0
    return jnp.asarray(mats)


def build_params(key):
    kc1, kc2, kc3, kc4, kc5, kl1, kl2 = jax.random.split(key, 7)
    c1 = _make_conv(kc1, 3, 8, 3, bn=True)      # conv1  3x3 leaky
    c2 = _make_conv(kc2, 8, 16, 3, bn=True)     # conv2  3x3 leaky
    c3 = _make_conv(kc3, 16, 16, 1, bn=True)    # conv3  1x1 leaky
    c4 = _make_conv(kc4, 16, 32, 3, bn=True)    # conv4  3x3 leaky
    c5 = _make_conv(kc5, 96, 30, 1, bn=False)   # conv5  1x1 linear + bias
    l1 = _make_conv(kl1, 16, 32, 3, bn=True)    # learnet conv1 (meta path)
    l2 = _make_conv(kl2, 32, 16, 1, bn=True)    # learnet conv2 (meta path)

    # conv5 packed with the route([reorg(shortcut), conv4]) concat + reorg folded in:
    # input channel q*16+c (q = i*2+j, reorg block) and 64+c (conv4 channels).
    w5m = c5['w'][:, :, 0, 0]                   # (30, 96) = (cout, cin)
    w5_blocks = []
    for q in range(4):
        blk = jnp.zeros((LANES, LANES), jnp.float32)
        blk = blk.at[:16, :30].set(w5m[:, q * 16:(q + 1) * 16].T)
        w5_blocks.append(blk)
    blk = jnp.zeros((LANES, LANES), jnp.float32).at[:32, :30].set(w5m[:, 64:96].T)
    w5_blocks.append(blk)
    w5 = jnp.stack(w5_blocks).astype(jnp.bfloat16)          # (5, 128, 128)

    scales = jnp.stack([_pad_lanes(c['scale']) for c in (c1, c2, c3, c4, c5)])
    shifts = jnp.stack([_pad_lanes(c['shift']) for c in (c1, c2, c3, c4, c5)])

    return {
        'w1': _pack_conv_taps(c1['w']),         # (9, 128, 128) bf16
        'w2': _pack_conv_taps(c2['w']),
        'w3': _pack_conv_taps(c3['w'])[0],      # (128, 128) bf16 (1x1)
        'w4': _pack_conv_taps(c4['w']),
        'w5': w5,
        'scales': scales,                       # (5, 128) f32
        'shifts': shifts,                       # (5, 128) f32
        'p_pool1': _pool_s2_mats(16, 16),       # (4, 64, 256)
        'p_mps1': _pool_s1_mats(8, 8),          # (4, 64, 64)
        'p_pool6': _pool_s2_mats(8, 8),         # (4, 16, 64)
        'p_reorg': _reorg_mats(8, 8, 2),        # (4, 16, 64)
        'raw': {'conv1': c1, 'lconv1': l1, 'lconv2': l2},   # meta path (plain XLA)
    }


# ------------------------------ fused Pallas kernel --------------------------

def _darknet_fused_kernel(x_ref, w1_ref, w2_ref, w3_ref, w4_ref, w5_ref,
                          scale_ref, shift_ref, p1_ref, pm_ref, p6_ref, g_ref,
                          o_ref, slab_ref):
    """Whole detect_forward for one batch element, activations VMEM-resident.

    x_ref:      (1, 256, 128) f32   lane-padded 16x16x3 image (row-major h*16+w)
    w*_ref:     per-tap (128, 128) bf16 conv matrices
    scale/shift:(5, 128) f32        folded BN / bias per conv layer
    p*_ref:     0/1 selection matrices for pooling / MaxPoolStride1 / reorg
    o_ref:      (1, 16, 128) f32    conv5 output (4x4x30 lane-padded)
    slab_ref:   (296, 128) f32      scratch: zero-padded row slab for 3x3 convs
    """
    f32 = jnp.float32

    def affine_act(acc, idx, leaky):
        s = scale_ref[idx:idx + 1, :]
        b = shift_ref[idx:idx + 1, :]
        y = acc * s + b
        if leaky:
            y = jnp.maximum(y, 0.1 * y)
        return y

    def conv3x3(x, H, W, w_ref, idx):
        """3x3 / stride 1 / zero-pad 1 conv via 9 shifted-slab matmuls."""
        HW = H * W
        pad = W + 1                       # slab prefix of zero rows
        total = HW + 2 * W + 2            # slab extent used by this conv
        slab_ref[0:pad, :] = jnp.zeros((pad, LANES), f32)
        slab_ref[pad + HW:total, :] = jnp.zeros((total - pad - HW, LANES), f32)
        slab_ref[pad:pad + HW, :] = x.astype(f32)
        # column index of each output row (W is a power of two here)
        col = lax.broadcasted_iota(jnp.int32, (HW, LANES), 0) & (W - 1)
        acc = None
        for di in range(3):
            for dj in range(3):
                t = di * 3 + dj
                tap = slab_ref[pl.ds(di * W + dj, HW), :]
                if dj == 0:               # input column w-1 invalid when w == 0
                    tap = jnp.where(col > 0, tap, 0.0)
                elif dj == 2:             # input column w+1 invalid when w == W-1
                    tap = jnp.where(col < W - 1, tap, 0.0)
                part = jnp.dot(tap.astype(jnp.bfloat16), w_ref[t],
                               preferred_element_type=f32)
                acc = part if acc is None else acc + part
        return affine_act(acc, idx, leaky=True)

    def conv1x1(x, w, idx, leaky):
        acc = jnp.dot(x.astype(jnp.bfloat16), w, preferred_element_type=f32)
        return affine_act(acc, idx, leaky)

    def pool_max(x, p_ref):
        """max over 4 exact one-hot gathers (f32 selection matmuls)."""
        r = None
        for t in range(4):
            g = jnp.dot(p_ref[t], x, preferred_element_type=f32)
            r = g if r is None else jnp.maximum(r, g)
        return r

    x_in = x_ref[0]                                   # (256, 128) f32
    o0 = conv3x3(x_in, 16, 16, w1_ref, 0)             # conv1           16x16x8
    o1 = pool_max(o0, p1_ref)                         # maxpool 2,2      8x8x8
    o2 = conv3x3(o1, 8, 8, w2_ref, 1)                 # conv2            8x8x16
    o3 = pool_max(o2, pm_ref)                         # MaxPoolStride1   8x8x16
    o4 = conv1x1(o3, w3_ref[...], 2, leaky=True)      # conv3 (1x1)      8x8x16
    s = o3 + o4                                       # shortcut from -2
    o5 = jnp.maximum(s, 0.1 * s)                      # leaky            8x8x16
    o6 = pool_max(o5, p6_ref)                         # maxpool 2,2      4x4x16
    o7 = conv3x3(o6, 4, 4, w4_ref, 3)                 # conv4            4x4x32
    # conv5 on route([reorg(o5), o7]) with reorg + concat folded into weights.
    acc = jnp.dot(o7.astype(jnp.bfloat16), w5_ref[4], preferred_element_type=f32)
    for q in range(4):
        gq = jnp.dot(g_ref[q], o5, preferred_element_type=f32)     # reorg gather
        acc = acc + jnp.dot(gq.astype(jnp.bfloat16), w5_ref[q],
                            preferred_element_type=f32)
    o11 = affine_act(acc, 4, leaky=False)             # conv5 (linear)   4x4x30
    o_ref[0] = o11


# ------------------------- meta_forward (plain XLA) --------------------------

def _conv_nhwc_xla(x, p, pad):
    w = jnp.transpose(p['w'], (2, 3, 1, 0))           # OIHW -> HWIO
    y = lax.conv_general_dilated(x, w, (1, 1), ((pad, pad), (pad, pad)),
                                 dimension_numbers=('NHWC', 'HWIO', 'NHWC'))
    y = y * p['scale'] + p['shift']
    return jnp.maximum(y, 0.1 * y)


def meta_forward_xla(params, metax_nchw, mask=None):
    """Reference meta path (learnet).  Its dynamic_weights are never consumed by
    detect_forward for this cfg (no 'dynamic' conv blocks), so it is only run
    when explicitly requested."""
    m = jnp.transpose(metax_nchw, (0, 2, 3, 1))        # NCHW -> NHWC
    done_split = m.shape[-1] == 6
    if done_split:
        m = jnp.concatenate(jnp.split(m, 2, axis=-1), axis=0)
    m = _conv_nhwc_xla(m, params['raw']['conv1'], pad=1)
    m = jnp.maximum(jnp.maximum(m[:, 0::2, 0::2, :], m[:, 0::2, 1::2, :]),
                    jnp.maximum(m[:, 1::2, 0::2, :], m[:, 1::2, 1::2, :]))
    if done_split:
        m = jnp.concatenate(jnp.split(m, 2, axis=0), axis=-1)
    # cfg.metain_type == 1 -> no mask concat.
    # TODO(synk): metain_type in [2, 3] mask-concat path is not exercised by this cfg.
    m = _conv_nhwc_xla(m, params['raw']['lconv1'], pad=1)
    m = _conv_nhwc_xla(m, params['raw']['lconv2'], pad=0)
    return [m]


# ------------------------------ Darknet forward ------------------------------

def darknet_forward(params, x_nchw, metax_nchw, mask, compute_meta=False):
    B = x_nchw.shape[0]
    if compute_meta:
        # dynamic_weights are computed but never consumed (no dynamic conv blocks);
        # skipped by default — the returned output is identical to the reference.
        meta_forward_xla(params, metax_nchw, mask)

    x = jnp.transpose(x_nchw, (0, 2, 3, 1))                         # NCHW -> NHWC
    x = jnp.pad(x, ((0, 0), (0, 0), (0, 0), (0, LANES - x.shape[-1])))
    x = x.reshape(B, 16 * 16, LANES).astype(jnp.float32)

    out = pl.pallas_call(
        _darknet_fused_kernel,
        out_shape=jax.ShapeDtypeStruct((B, 16, LANES), jnp.float32),
        grid=(B,),
        in_specs=[
            pl.BlockSpec((1, 256, LANES), lambda b: (b, 0, 0)),      # image
            pl.BlockSpec((9, LANES, LANES), lambda b: (0, 0, 0)),    # conv1 taps
            pl.BlockSpec((9, LANES, LANES), lambda b: (0, 0, 0)),    # conv2 taps
            pl.BlockSpec((LANES, LANES), lambda b: (0, 0)),          # conv3 (1x1)
            pl.BlockSpec((9, LANES, LANES), lambda b: (0, 0, 0)),    # conv4 taps
            pl.BlockSpec((5, LANES, LANES), lambda b: (0, 0, 0)),    # conv5 blocks
            pl.BlockSpec((5, LANES), lambda b: (0, 0)),              # scales
            pl.BlockSpec((5, LANES), lambda b: (0, 0)),              # shifts
            pl.BlockSpec((4, 64, 256), lambda b: (0, 0, 0)),         # maxpool 16->8
            pl.BlockSpec((4, 64, 64), lambda b: (0, 0, 0)),          # MaxPoolStride1
            pl.BlockSpec((4, 16, 64), lambda b: (0, 0, 0)),          # maxpool 8->4
            pl.BlockSpec((4, 16, 64), lambda b: (0, 0, 0)),          # reorg gather
        ],
        out_specs=pl.BlockSpec((1, 16, LANES), lambda b: (b, 0, 0)),
        scratch_shapes=[pltpu.VMEM((296, LANES), jnp.float32)],
        compiler_params=pltpu.CompilerParams(
            dimension_semantics=("parallel",)),   # batch across cores (v7x megacore)
    )(x, params['w1'], params['w2'], params['w3'], params['w4'], params['w5'],
      params['scales'], params['shifts'],
      params['p_pool1'], params['p_mps1'], params['p_pool6'], params['p_reorg'])

    y = out[:, :, :30].reshape(B, 4, 4, 30)            # drop lane padding
    return jnp.transpose(y, (0, 3, 1, 2))              # back to NCHW, like PyTorch


# ----------------------------------- main ------------------------------------

if __name__ == "__main__":
    key = jax.random.PRNGKey(0)
    kparams, kx, kmeta, kmask = jax.random.split(key, 4)

    params = build_params(kparams)

    x = jax.random.normal(kx, (2, 3, 16, 16), jnp.float32)          # NCHW detect input
    metax = jax.random.normal(kmeta, (2, 6, 16, 16), jnp.float32)   # NCHW meta input
    mask = jax.random.normal(kmask, (2, 1, 8, 8), jnp.float32)      # unused (metain_type==1)

    # Entire forward = one fused Pallas kernel + a tiny amount of jit'ed glue.
    fwd = jax.jit(functools.partial(darknet_forward, params))

    y = jax.block_until_ready(fwd(x, metax, mask))
    assert y.shape == (2, 30, 4, 4), y.shape
    assert bool(jnp.all(jnp.isfinite(y)))
    print("KERNEL_OK")
</pallas_src>

<mosaic_0001>
module attributes {stable_mosaic.version = 11 : i64} {
  func.func @_darknet_fused_kernel(%arg0: i32, %arg1: memref<1x256x128xf32, #tpu.memory_space<vmem>>, %arg2: memref<9x128x128xbf16, #tpu.memory_space<vmem>>, %arg3: memref<9x128x128xbf16, #tpu.memory_space<vmem>>, %arg4: memref<128x128xbf16, #tpu.memory_space<vmem>>, %arg5: memref<9x128x128xbf16, #tpu.memory_space<vmem>>, %arg6: memref<5x128x128xbf16, #tpu.memory_space<vmem>>, %arg7: memref<5x128xf32, #tpu.memory_space<vmem>>, %arg8: memref<5x128xf32, #tpu.memory_space<vmem>>, %arg9: memref<4x64x256xf32, #tpu.memory_space<vmem>>, %arg10: memref<4x64x64xf32, #tpu.memory_space<vmem>>, %arg11: memref<4x16x64xf32, #tpu.memory_space<vmem>>, %arg12: memref<4x16x64xf32, #tpu.memory_space<vmem>>, %arg13: memref<1x16x128xf32, #tpu.memory_space<vmem>>, %arg14: memref<296x128xf32, #tpu.memory_space<vmem>>) attributes {dimension_semantics = [#tpu.dimension_semantics<parallel>], iteration_bounds = array<i64: 2>, scalar_prefetch = 0 : i64, scratch_operands = 1 : i64, tpu.core_type = #tpu.core_type<tc>, window_params = [{transform_indices = @transform_0, window_bounds = array<i64: 1, 256, 128>}, {pipeline_mode = #tpu.pipeline_mode<synchronous>, transform_indices = @transform_1, window_bounds = array<i64: 9, 128, 128>}, {pipeline_mode = #tpu.pipeline_mode<synchronous>, transform_indices = @transform_2, window_bounds = array<i64: 9, 128, 128>}, {pipeline_mode = #tpu.pipeline_mode<synchronous>, transform_indices = @transform_3, window_bounds = array<i64: 128, 128>}, {pipeline_mode = #tpu.pipeline_mode<synchronous>, transform_indices = @transform_4, window_bounds = array<i64: 9, 128, 128>}, {pipeline_mode = #tpu.pipeline_mode<synchronous>, transform_indices = @transform_5, window_bounds = array<i64: 5, 128, 128>}, {pipeline_mode = #tpu.pipeline_mode<synchronous>, transform_indices = @transform_6, window_bounds = array<i64: 5, 128>}, {pipeline_mode = #tpu.pipeline_mode<synchronous>, transform_indices = @transform_7, window_bounds = array<i64: 5, 128>}, {pipeline_mode = #tpu.pipeline_mode<synchronous>, transform_indices = @transform_8, window_bounds = array<i64: 4, 64, 256>}, {pipeline_mode = #tpu.pipeline_mode<synchronous>, transform_indices = @transform_9, window_bounds = array<i64: 4, 64, 64>}, {pipeline_mode = #tpu.pipeline_mode<synchronous>, transform_indices = @transform_10, window_bounds = array<i64: 4, 16, 64>}, {pipeline_mode = #tpu.pipeline_mode<synchronous>, transform_indices = @transform_11, window_bounds = array<i64: 4, 16, 64>}, {transform_indices = @transform_12, window_bounds = array<i64: 1, 16, 128>}]} {
    %c0 = arith.constant 0 : index
    %c0_0 = arith.constant 0 : index
    %c0_1 = arith.constant 0 : index
    %0 = vector.load %arg1[%c0, %c0_0, %c0_1] : memref<1x256x128xf32, #tpu.memory_space<vmem>>, vector<1x256x128xf32>
    %1 = vector.shape_cast %0 : vector<1x256x128xf32> to vector<256x128xf32>
    %cst = arith.constant 0.000000e+00 : f32
    %2 = vector.broadcast %cst : f32 to vector<17x128xf32>
    %c0_2 = arith.constant 0 : index
    %c0_3 = arith.constant 0 : index
    %3 = vector.load %arg14[%c0_2, %c0_3] : memref<296x128xf32, #tpu.memory_space<vmem>>, vector<17x128xf32>
    tpu.vector_store %arg14[%c0_2, %c0_3], %2 {strides = array<i32>} : memref<296x128xf32, #tpu.memory_space<vmem>>, vector<17x128xf32>,
    %cst_4 = arith.constant 0.000000e+00 : f32
    %4 = vector.broadcast %cst_4 : f32 to vector<17x128xf32>
    %c273 = arith.constant 273 : index
    %c0_5 = arith.constant 0 : index
    %5 = vector.load %arg14[%c273, %c0_5] : memref<296x128xf32, #tpu.memory_space<vmem>>, vector<17x128xf32>
    tpu.vector_store %arg14[%c273, %c0_5], %4 {strides = array<i32>} : memref<296x128xf32, #tpu.memory_space<vmem>>, vector<17x128xf32>,
    %c17 = arith.constant 17 : index
    %c0_6 = arith.constant 0 : index
    %6 = vector.load %arg14[%c17, %c0_6] : memref<296x128xf32, #tpu.memory_space<vmem>>, vector<256x128xf32>
    tpu.vector_store %arg14[%c17, %c0_6], %1 {strides = array<i32>} : memref<296x128xf32, #tpu.memory_space<vmem>>, vector<256x128xf32>,
    %7 = tpu.iota {dimensions = array<i32: 0>} : vector<256x128xi32>
    %c15_i32 = arith.constant 15 : i32
    %8 = vector.broadcast %c15_i32 : i32 to vector<256x128xi32>
    %9 = arith.andi %7, %8 : vector<256x128xi32>
    %c0_7 = arith.constant 0 : index
    %c0_8 = arith.constant 0 : index
    %10 = vector.load %arg14[%c0_7, %c0_8] : memref<296x128xf32, #tpu.memory_space<vmem>>, vector<256x128xf32>
    %c0_i32 = arith.constant 0 : i32
    %11 = vector.broadcast %c0_i32 : i32 to vector<256x128xi32>
    %12 = arith.cmpi sgt, %9, %11 : vector<256x128xi32>
    %cst_9 = arith.constant 0.000000e+00 : f32
    %13 = vector.broadcast %cst_9 : f32 to vector<256x128xf32>
    %14 = arith.select %12, %10, %13 : vector<256x128xi1>, vector<256x128xf32>
    %15 = arith.truncf %14 : vector<256x128xf32> to vector<256x128xbf16>
    %c0_10 = arith.constant 0 : index
    %c0_11 = arith.constant 0 : index
    %c0_12 = arith.constant 0 : index
    %16 = vector.load %arg2[%c0_10, %c0_11, %c0_12] : memref<9x128x128xbf16, #tpu.memory_space<vmem>>, vector<1x128x128xbf16>
    %17 = vector.shape_cast %16 : vector<1x128x128xbf16> to vector<128x128xbf16>
    %cst_13 = arith.constant dense<0.000000e+00> : vector<256x128xf32>
    %18 = tpu.matmul %15, %17, %cst_13 {dimension_numbers = #tpu.dot_dimension_numbers<[1], [0], [0], [1], [0, 0, 1, 1], [], []>} : vector<256x128xbf16>, vector<128x128xbf16>, vector<256x128xf32> -> vector<256x128xf32>
    %c1 = arith.constant 1 : index
    %c0_14 = arith.constant 0 : index
    %19 = vector.load %arg14[%c1, %c0_14] : memref<296x128xf32, #tpu.memory_space<vmem>>, vector<256x128xf32>
    %20 = arith.truncf %19 : vector<256x128xf32> to vector<256x128xbf16>
    %c1_15 = arith.constant 1 : index
    %c0_16 = arith.constant 0 : index
    %c0_17 = arith.constant 0 : index
    %21 = vector.load %arg2[%c1_15, %c0_16, %c0_17] : memref<9x128x128xbf16, #tpu.memory_space<vmem>>, vector<1x128x128xbf16>
    %22 = vector.shape_cast %21 : vector<1x128x128xbf16> to vector<128x128xbf16>
    %cst_18 = arith.constant dense<0.000000e+00> : vector<256x128xf32>
    %23 = tpu.matmul %20, %22, %cst_18 {dimension_numbers = #tpu.dot_dimension_numbers<[1], [0], [0], [1], [0, 0, 1, 1], [], []>} : vector<256x128xbf16>, vector<128x128xbf16>, vector<256x128xf32> -> vector<256x128xf32>
    %24 = arith.addf %18, %23 : vector<256x128xf32>
    %c2 = arith.constant 2 : index
    %c0_19 = arith.constant 0 : index
    %25 = vector.load %arg14[%c2, %c0_19] : memref<296x128xf32, #tpu.memory_space<vmem>>, vector<256x128xf32>
    %c15_i32_20 = arith.constant 15 : i32
    %26 = vector.broadcast %c15_i32_20 : i32 to vector<256x128xi32>
    %27 = arith.cmpi slt, %9, %26 : vector<256x128xi32>
    %cst_21 = arith.constant 0.000000e+00 : f32
    %28 = vector.broadcast %cst_21 : f32 to vector<256x128xf32>
    %29 = arith.select %27, %25, %28 : vector<256x128xi1>, vector<256x128xf32>
    %30 = arith.truncf %29 : vector<256x128xf32> to vector<256x128xbf16>
    %c2_22 = arith.constant 2 : index
    %c0_23 = arith.constant 0 : index
    %c0_24 = arith.constant 0 : index
    %31 = vector.load %arg2[%c2_22, %c0_23, %c0_24] : memref<9x128x128xbf16, #tpu.memory_space<vmem>>, vector<1x128x128xbf16>
    %32 = vector.shape_cast %31 : vector<1x128x128xbf16> to vector<128x128xbf16>
    %cst_25 = arith.constant dense<0.000000e+00> : vector<256x128xf32>
    %33 = tpu.matmul %30, %32, %cst_25 {dimension_numbers = #tpu.dot_dimension_numbers<[1], [0], [0], [1], [0, 0, 1, 1], [], []>} : vector<256x128xbf16>, vector<128x128xbf16>, vector<256x128xf32> -> vector<256x128xf32>
    %34 = arith.addf %24, %33 : vector<256x128xf32>
    %c16 = arith.constant 16 : index
    %c0_26 = arith.constant 0 : index
    %35 = vector.load %arg14[%c16, %c0_26] : memref<296x128xf32, #tpu.memory_space<vmem>>, vector<256x128xf32>
    %c0_i32_27 = arith.constant 0 : i32
    %36 = vector.broadcast %c0_i32_27 : i32 to vector<256x128xi32>
    %37 = arith.cmpi sgt, %9, %36 : vector<256x128xi32>
    %cst_28 = arith.constant 0.000000e+00 : f32
    %38 = vector.broadcast %cst_28 : f32 to vector<256x128xf32>
    %39 = arith.select %37, %35, %38 : vector<256x128xi1>, vector<256x128xf32>
    %40 = arith.truncf %39 : vector<256x128xf32> to vector<256x128xbf16>
    %c3 = arith.constant 3 : index
    %c0_29 = arith.constant 0 : index
    %c0_30 = arith.constant 0 : index
    %41 = vector.load %arg2[%c3, %c0_29, %c0_30] : memref<9x128x128xbf16, #tpu.memory_space<vmem>>, vector<1x128x128xbf16>
    %42 = vector.shape_cast %41 : vector<1x128x128xbf16> to vector<128x128xbf16>
    %cst_31 = arith.constant dense<0.000000e+00> : vector<256x128xf32>
    %43 = tpu.matmul %40, %42, %cst_31 {dimension_numbers = #tpu.dot_dimension_numbers<[1], [0], [0], [1], [0, 0, 1, 1], [], []>} : vector<256x128xbf16>, vector<128x128xbf16>, vector<256x128xf32> -> vector<256x128xf32>
    %44 = arith.addf %34, %43 : vector<256x128xf32>
    %c17_32 = arith.constant 17 : index
    %c0_33 = arith.constant 0 : index
    %45 = vector.load %arg14[%c17_32, %c0_33] : memref<296x128xf32, #tpu.memory_space<vmem>>, vector<256x128xf32>
    %46 = arith.truncf %45 : vector<256x128xf32> to vector<256x128xbf16>
    %c4 = arith.constant 4 : index
    %c0_34 = arith.constant 0 : index
    %c0_35 = arith.constant 0 : index
    %47 = vector.load %arg2[%c4, %c0_34, %c0_35] : memref<9x128x128xbf16, #tpu.memory_space<vmem>>, vector<1x128x128xbf16>
    %48 = vector.shape_cast %47 : vector<1x128x128xbf16> to vector<128x128xbf16>
    %cst_36 = arith.constant dense<0.000000e+00> : vector<256x128xf32>
    %49 = tpu.matmul %46, %48, %cst_36 {dimension_numbers = #tpu.dot_dimension_numbers<[1], [0], [0], [1], [0, 0, 1, 1], [], []>} : vector<256x128xbf16>, vector<128x128xbf16>, vector<256x128xf32> -> vector<256x128xf32>
    %50 = arith.addf %44, %49 : vector<256x128xf32>
    %c18 = arith.constant 18 : index
    %c0_37 = arith.constant 0 : index
    %51 = vector.load %arg14[%c18, %c0_37] : memref<296x128xf32, #tpu.memory_space<vmem>>, vector<256x128xf32>
    %c15_i32_38 = arith.constant 15 : i32
    %52 = vector.broadcast %c15_i32_38 : i32 to vector<256x128xi32>
    %53 = arith.cmpi slt, %9, %52 : vector<256x128xi32>
    %cst_39 = arith.constant 0.000000e+00 : f32
    %54 = vector.broadcast %cst_39 : f32 to vector<256x128xf32>
    %55 = arith.select %53, %51, %54 : vector<256x128xi1>, vector<256x128xf32>
    %56 = arith.truncf %55 : vector<256x128xf32> to vector<256x128xbf16>
    %c5 = arith.constant 5 : index
    %c0_40 = arith.constant 0 : index
    %c0_41 = arith.constant 0 : index
    %57 = vector.load %arg2[%c5, %c0_40, %c0_41] : memref<9x128x128xbf16, #tpu.memory_space<vmem>>, vector<1x128x128xbf16>
    %58 = vector.shape_cast %57 : vector<1x128x128xbf16> to vector<128x128xbf16>
    %cst_42 = arith.constant dense<0.000000e+00> : vector<256x128xf32>
    %59 = tpu.matmul %56, %58, %cst_42 {dimension_numbers = #tpu.dot_dimension_numbers<[1], [0], [0], [1], [0, 0, 1, 1], [], []>} : vector<256x128xbf16>, vector<128x128xbf16>, vector<256x128xf32> -> vector<256x128xf32>
    %60 = arith.addf %50, %59 : vector<256x128xf32>
    %c32 = arith.constant 32 : index
    %c0_43 = arith.constant 0 : index
    %61 = vector.load %arg14[%c32, %c0_43] : memref<296x128xf32, #tpu.memory_space<vmem>>, vector<256x128xf32>
    %c0_i32_44 = arith.constant 0 : i32
    %62 = vector.broadcast %c0_i32_44 : i32 to vector<256x128xi32>
    %63 = arith.cmpi sgt, %9, %62 : vector<256x128xi32>
    %cst_45 = arith.constant 0.000000e+00 : f32
    %64 = vector.broadcast %cst_45 : f32 to vector<256x128xf32>
    %65 = arith.select %63, %61, %64 : vector<256x128xi1>, vector<256x128xf32>
    %66 = arith.truncf %65 : vector<256x128xf32> to vector<256x128xbf16>
    %c6 = arith.constant 6 : index
    %c0_46 = arith.constant 0 : index
    %c0_47 = arith.constant 0 : index
    %67 = vector.load %arg2[%c6, %c0_46, %c0_47] : memref<9x128x128xbf16, #tpu.memory_space<vmem>>, vector<1x128x128xbf16>
    %68 = vector.shape_cast %67 : vector<1x128x128xbf16> to vector<128x128xbf16>
    %cst_48 = arith.constant dense<0.000000e+00> : vector<256x128xf32>
    %69 = tpu.matmul %66, %68, %cst_48 {dimension_numbers = #tpu.dot_dimension_numbers<[1], [0], [0], [1], [0, 0, 1, 1], [], []>} : vector<256x128xbf16>, vector<128x128xbf16>, vector<256x128xf32> -> vector<256x128xf32>
    %70 = arith.addf %60, %69 : vector<256x128xf32>
    %c33 = arith.constant 33 : index
    %c0_49 = arith.constant 0 : index
    %71 = vector.load %arg14[%c33, %c0_49] : memref<296x128xf32, #tpu.memory_space<vmem>>, vector<256x128xf32>
    %72 = arith.truncf %71 : vector<256x128xf32> to vector<256x128xbf16>
    %c7 = arith.constant 7 : index
    %c0_50 = arith.constant 0 : index
    %c0_51 = arith.constant 0 : index
    %73 = vector.load %arg2[%c7, %c0_50, %c0_51] : memref<9x128x128xbf16, #tpu.memory_space<vmem>>, vector<1x128x128xbf16>
    %74 = vector.shape_cast %73 : vector<1x128x128xbf16> to vector<128x128xbf16>
    %cst_52 = arith.constant dense<0.000000e+00> : vector<256x128xf32>
    %75 = tpu.matmul %72, %74, %cst_52 {dimension_numbers = #tpu.dot_dimension_numbers<[1], [0], [0], [1], [0, 0, 1, 1], [], []>} : vector<256x128xbf16>, vector<128x128xbf16>, vector<256x128xf32> -> vector<256x128xf32>
    %76 = arith.addf %70, %75 : vector<256x128xf32>
    %c34 = arith.constant 34 : index
    %c0_53 = arith.constant 0 : index
    %77 = vector.load %arg14[%c34, %c0_53] : memref<296x128xf32, #tpu.memory_space<vmem>>, vector<256x128xf32>
    %c15_i32_54 = arith.constant 15 : i32
    %78 = vector.broadcast %c15_i32_54 : i32 to vector<256x128xi32>
    %79 = arith.cmpi slt, %9, %78 : vector<256x128xi32>
    %cst_55 = arith.constant 0.000000e+00 : f32
    %80 = vector.broadcast %cst_55 : f32 to vector<256x128xf32>
    %81 = arith.select %79, %77, %80 : vector<256x128xi1>, vector<256x128xf32>
    %82 = arith.truncf %81 : vector<256x128xf32> to vector<256x128xbf16>
    %c8 = arith.constant 8 : index
    %c0_56 = arith.constant 0 : index
    %c0_57 = arith.constant 0 : index
    %83 = vector.load %arg2[%c8, %c0_56, %c0_57] : memref<9x128x128xbf16, #tpu.memory_space<vmem>>, vector<1x128x128xbf16>
    %84 = vector.shape_cast %83 : vector<1x128x128xbf16> to vector<128x128xbf16>
    %cst_58 = arith.constant dense<0.000000e+00> : vector<256x128xf32>
    %85 = tpu.matmul %82, %84, %cst_58 {dimension_numbers = #tpu.dot_dimension_numbers<[1], [0], [0], [1], [0, 0, 1, 1], [], []>} : vector<256x128xbf16>, vector<128x128xbf16>, vector<256x128xf32> -> vector<256x128xf32>
    %86 = arith.addf %76, %85 : vector<256x128xf32>
    %c0_59 = arith.constant 0 : index
    %c0_60 = arith.constant 0 : index
    %87 = vector.load %arg7[%c0_59, %c0_60] : memref<5x128xf32, #tpu.memory_space<vmem>>, vector<1x128xf32>
    %c0_61 = arith.constant 0 : index
    %c0_62 = arith.constant 0 : index
    %88 = vector.load %arg8[%c0_61, %c0_62] : memref<5x128xf32, #tpu.memory_space<vmem>>, vector<1x128xf32>
    %89 = vector.broadcast %87 : vector<1x128xf32> to vector<256x128xf32>
    %90 = arith.mulf %86, %89 : vector<256x128xf32>
    %91 = vector.broadcast %88 : vector<1x128xf32> to vector<256x128xf32>
    %92 = arith.addf %90, %91 : vector<256x128xf32>
    %cst_63 = arith.constant 1.000000e-01 : f32
    %93 = vector.broadcast %cst_63 : f32 to vector<256x128xf32>
    %94 = arith.mulf %93, %92 : vector<256x128xf32>
    %95 = arith.maximumf %92, %94 : vector<256x128xf32>
    %c0_64 = arith.constant 0 : index
    %c0_65 = arith.constant 0 : index
    %c0_66 = arith.constant 0 : index
    %96 = vector.load %arg9[%c0_64, %c0_65, %c0_66] : memref<4x64x256xf32, #tpu.memory_space<vmem>>, vector<1x64x256xf32>
    %97 = vector.shape_cast %96 : vector<1x64x256xf32> to vector<64x256xf32>
    %cst_67 = arith.constant dense<0.000000e+00> : vector<64x128xf32>
    %98 = tpu.matmul %97, %95, %cst_67 {dimension_numbers = #tpu.dot_dimension_numbers<[1], [0], [0], [1], [0, 0, 1, 1], [], []>} : vector<64x256xf32>, vector<256x128xf32>, vector<64x128xf32> -> vector<64x128xf32>
    %c1_68 = arith.constant 1 : index
    %c0_69 = arith.constant 0 : index
    %c0_70 = arith.constant 0 : index
    %99 = vector.load %arg9[%c1_68, %c0_69, %c0_70] : memref<4x64x256xf32, #tpu.memory_space<vmem>>, vector<1x64x256xf32>
    %100 = vector.shape_cast %99 : vector<1x64x256xf32> to vector<64x256xf32>
    %cst_71 = arith.constant dense<0.000000e+00> : vector<64x128xf32>
    %101 = tpu.matmul %100, %95, %cst_71 {dimension_numbers = #tpu.dot_dimension_numbers<[1], [0], [0], [1], [0, 0, 1, 1], [], []>} : vector<64x256xf32>, vector<256x128xf32>, vector<64x128xf32> -> vector<64x128xf32>
    %102 = arith.maximumf %98, %101 : vector<64x128xf32>
    %c2_72 = arith.constant 2 : index
    %c0_73 = arith.constant 0 : index
    %c0_74 = arith.constant 0 : index
    %103 = vector.load %arg9[%c2_72, %c0_73, %c0_74] : memref<4x64x256xf32, #tpu.memory_space<vmem>>, vector<1x64x256xf32>
    %104 = vector.shape_cast %103 : vector<1x64x256xf32> to vector<64x256xf32>
    %cst_75 = arith.constant dense<0.000000e+00> : vector<64x128xf32>
    %105 = tpu.matmul %104, %95, %cst_75 {dimension_numbers = #tpu.dot_dimension_numbers<[1], [0], [0], [1], [0, 0, 1, 1], [], []>} : vector<64x256xf32>, vector<256x128xf32>, vector<64x128xf32> -> vector<64x128xf32>
    %106 = arith.maximumf %102, %105 : vector<64x128xf32>
    %c3_76 = arith.constant 3 : index
    %c0_77 = arith.constant 0 : index
    %c0_78 = arith.constant 0 : index
    %107 = vector.load %arg9[%c3_76, %c0_77, %c0_78] : memref<4x64x256xf32, #tpu.memory_space<vmem>>, vector<1x64x256xf32>
    %108 = vector.shape_cast %107 : vector<1x64x256xf32> to vector<64x256xf32>
    %cst_79 = arith.constant dense<0.000000e+00> : vector<64x128xf32>
    %109 = tpu.matmul %108, %95, %cst_79 {dimension_numbers = #tpu.dot_dimension_numbers<[1], [0], [0], [1], [0, 0, 1, 1], [], []>} : vector<64x256xf32>, vector<256x128xf32>, vector<64x128xf32> -> vector<64x128xf32>
    %110 = arith.maximumf %106, %109 : vector<64x128xf32>
    %cst_80 = arith.constant 0.000000e+00 : f32
    %111 = vector.broadcast %cst_80 : f32 to vector<9x128xf32>
    %c0_81 = arith.constant 0 : index
    %c0_82 = arith.constant 0 : index
    %112 = vector.load %arg14[%c0_81, %c0_82] : memref<296x128xf32, #tpu.memory_space<vmem>>, vector<9x128xf32>
    tpu.vector_store %arg14[%c0_81, %c0_82], %111 {strides = array<i32>} : memref<296x128xf32, #tpu.memory_space<vmem>>, vector<9x128xf32>,
    %cst_83 = arith.constant 0.000000e+00 : f32
    %113 = vector.broadcast %cst_83 : f32 to vector<9x128xf32>
    %c73 = arith.constant 73 : index
    %c0_84 = arith.constant 0 : index
    %114 = vector.load %arg14[%c73, %c0_84] : memref<296x128xf32, #tpu.memory_space<vmem>>, vector<9x128xf32>
    tpu.vector_store %arg14[%c73, %c0_84], %113 {strides = array<i32>} : memref<296x128xf32, #tpu.memory_space<vmem>>, vector<9x128xf32>,
    %c9 = arith.constant 9 : index
    %c0_85 = arith.constant 0 : index
    %115 = vector.load %arg14[%c9, %c0_85] : memref<296x128xf32, #tpu.memory_space<vmem>>, vector<64x128xf32>
    tpu.vector_store %arg14[%c9, %c0_85], %110 {strides = array<i32>} : memref<296x128xf32, #tpu.memory_space<vmem>>, vector<64x128xf32>,
    %116 = tpu.iota {dimensions = array<i32: 0>} : vector<64x128xi32>
    %c7_i32 = arith.constant 7 : i32
    %117 = vector.broadcast %c7_i32 : i32 to vector<64x128xi32>
    %118 = arith.andi %116, %117 : vector<64x128xi32>
    %c0_86 = arith.constant 0 : index
    %c0_87 = arith.constant 0 : index
    %119 = vector.load %arg14[%c0_86, %c0_87] : memref<296x128xf32, #tpu.memory_space<vmem>>, vector<64x128xf32>
    %c0_i32_88 = arith.constant 0 : i32
    %120 = vector.broadcast %c0_i32_88 : i32 to vector<64x128xi32>
    %121 = arith.cmpi sgt, %118, %120 : vector<64x128xi32>
    %cst_89 = arith.constant 0.000000e+00 : f32
    %122 = vector.broadcast %cst_89 : f32 to vector<64x128xf32>
    %123 = arith.select %121, %119, %122 : vector<64x128xi1>, vector<64x128xf32>
    %124 = arith.truncf %123 : vector<64x128xf32> to vector<64x128xbf16>
    %c0_90 = arith.constant 0 : index
    %c0_91 = arith.constant 0 : index
    %c0_92 = arith.constant 0 : index
    %125 = vector.load %arg3[%c0_90, %c0_91, %c0_92] : memref<9x128x128xbf16, #tpu.memory_space<vmem>>, vector<1x128x128xbf16>
    %126 = vector.shape_cast %125 : vector<1x128x128xbf16> to vector<128x128xbf16>
    %cst_93 = arith.constant dense<0.000000e+00> : vector<64x128xf32>
    %127 = tpu.matmul %124, %126, %cst_93 {dimension_numbers = #tpu.dot_dimension_numbers<[1], [0], [0], [1], [0, 0, 1, 1], [], []>} : vector<64x128xbf16>, vector<128x128xbf16>, vector<64x128xf32> -> vector<64x128xf32>
    %c1_94 = arith.constant 1 : index
    %c0_95 = arith.constant 0 : index
    %128 = vector.load %arg14[%c1_94, %c0_95] : memref<296x128xf32, #tpu.memory_space<vmem>>, vector<64x128xf32>
    %129 = arith.truncf %128 : vector<64x128xf32> to vector<64x128xbf16>
    %c1_96 = arith.constant 1 : index
    %c0_97 = arith.constant 0 : index
    %c0_98 = arith.constant 0 : index
    %130 = vector.load %arg3[%c1_96, %c0_97, %c0_98] : memref<9x128x128xbf16, #tpu.memory_space<vmem>>, vector<1x128x128xbf16>
    %131 = vector.shape_cast %130 : vector<1x128x128xbf16> to vector<128x128xbf16>
    %cst_99 = arith.constant dense<0.000000e+00> : vector<64x128xf32>
    %132 = tpu.matmul %129, %131, %cst_99 {dimension_numbers = #tpu.dot_dimension_numbers<[1], [0], [0], [1], [0, 0, 1, 1], [], []>} : vector<64x128xbf16>, vector<128x128xbf16>, vector<64x128xf32> -> vector<64x128xf32>
    %133 = arith.addf %127, %132 : vector<64x128xf32>
    %c2_100 = arith.constant 2 : index
    %c0_101 = arith.constant 0 : index
    %134 = vector.load %arg14[%c2_100, %c0_101] : memref<296x128xf32, #tpu.memory_space<vmem>>, vector<64x128xf32>
    %c7_i32_102 = arith.constant 7 : i32
    %135 = vector.broadcast %c7_i32_102 : i32 to vector<64x128xi32>
    %136 = arith.cmpi slt, %118, %135 : vector<64x128xi32>
    %cst_103 = arith.constant 0.000000e+00 : f32
    %137 = vector.broadcast %cst_103 : f32 to vector<64x128xf32>
    %138 = arith.select %136, %134, %137 : vector<64x128xi1>, vector<64x128xf32>
    %139 = arith.truncf %138 : vector<64x128xf32> to vector<64x128xbf16>
    %c2_104 = arith.constant 2 : index
    %c0_105 = arith.constant 0 : index
    %c0_106 = arith.constant 0 : index
    %140 = vector.load %arg3[%c2_104, %c0_105, %c0_106] : memref<9x128x128xbf16, #tpu.memory_space<vmem>>, vector<1x128x128xbf16>
    %141 = vector.shape_cast %140 : vector<1x128x128xbf16> to vector<128x128xbf16>
    %cst_107 = arith.constant dense<0.000000e+00> : vector<64x128xf32>
    %142 = tpu.matmul %139, %141, %cst_107 {dimension_numbers = #tpu.dot_dimension_numbers<[1], [0], [0], [1], [0, 0, 1, 1], [], []>} : vector<64x128xbf16>, vector<128x128xbf16>, vector<64x128xf32> -> vector<64x128xf32>
    %143 = arith.addf %133, %142 : vector<64x128xf32>
    %c8_108 = arith.constant 8 : index
    %c0_109 = arith.constant 0 : index
    %144 = vector.load %arg14[%c8_108, %c0_109] : memref<296x128xf32, #tpu.memory_space<vmem>>, vector<64x128xf32>
    %c0_i32_110 = arith.constant 0 : i32
    %145 = vector.broadcast %c0_i32_110 : i32 to vector<64x128xi32>
    %146 = arith.cmpi sgt, %118, %145 : vector<64x128xi32>
    %cst_111 = arith.constant 0.000000e+00 : f32
    %147 = vector.broadcast %cst_111 : f32 to vector<64x128xf32>
    %148 = arith.select %146, %144, %147 : vector<64x128xi1>, vector<64x128xf32>
    %149 = arith.truncf %148 : vector<64x128xf32> to vector<64x128xbf16>
    %c3_112 = arith.constant 3 : index
    %c0_113 = arith.constant 0 : index
    %c0_114 = arith.constant 0 : index
    %150 = vector.load %arg3[%c3_112, %c0_113, %c0_114] : memref<9x128x128xbf16, #tpu.memory_space<vmem>>, vector<1x128x128xbf16>
    %151 = vector.shape_cast %150 : vector<1x128x128xbf16> to vector<128x128xbf16>
    %cst_115 = arith.constant dense<0.000000e+00> : vector<64x128xf32>
    %152 = tpu.matmul %149, %151, %cst_115 {dimension_numbers = #tpu.dot_dimension_numbers<[1], [0], [0], [1], [0, 0, 1, 1], [], []>} : vector<64x128xbf16>, vector<128x128xbf16>, vector<64x128xf32> -> vector<64x128xf32>
    %153 = arith.addf %143, %152 : vector<64x128xf32>
    %c9_116 = arith.constant 9 : index
    %c0_117 = arith.constant 0 : index
    %154 = vector.load %arg14[%c9_116, %c0_117] : memref<296x128xf32, #tpu.memory_space<vmem>>, vector<64x128xf32>
    %155 = arith.truncf %154 : vector<64x128xf32> to vector<64x128xbf16>
    %c4_118 = arith.constant 4 : index
    %c0_119 = arith.constant 0 : index
    %c0_120 = arith.constant 0 : index
    %156 = vector.load %arg3[%c4_118, %c0_119, %c0_120] : memref<9x128x128xbf16, #tpu.memory_space<vmem>>, vector<1x128x128xbf16>
    %157 = vector.shape_cast %156 : vector<1x128x128xbf16> to vector<128x128xbf16>
    %cst_121 = arith.constant dense<0.000000e+00> : vector<64x128xf32>
    %158 = tpu.matmul %155, %157, %cst_121 {dimension_numbers = #tpu.dot_dimension_numbers<[1], [0], [0], [1], [0, 0, 1, 1], [], []>} : vector<64x128xbf16>, vector<128x128xbf16>, vector<64x128xf32> -> vector<64x128xf32>
    %159 = arith.addf %153, %158 : vector<64x128xf32>
    %c10 = arith.constant 10 : index
    %c0_122 = arith.constant 0 : index
    %160 = vector.load %arg14[%c10, %c0_122] : memref<296x128xf32, #tpu.memory_space<vmem>>, vector<64x128xf32>
    %c7_i32_123 = arith.constant 7 : i32
    %161 = vector.broadcast %c7_i32_123 : i32 to vector<64x128xi32>
    %162 = arith.cmpi slt, %118, %161 : vector<64x128xi32>
    %cst_124 = arith.constant 0.000000e+00 : f32
    %163 = vector.broadcast %cst_124 : f32 to vector<64x128xf32>
    %164 = arith.select %162, %160, %163 : vector<64x128xi1>, vector<64x128xf32>
    %165 = arith.truncf %164 : vector<64x128xf32> to vector<64x128xbf16>
    %c5_125 = arith.constant 5 : index
    %c0_126 = arith.constant 0 : index
    %c0_127 = arith.constant 0 : index
    %166 = vector.load %arg3[%c5_125, %c0_126, %c0_127] : memref<9x128x128xbf16, #tpu.memory_space<vmem>>, vector<1x128x128xbf16>
    %167 = vector.shape_cast %166 : vector<1x128x128xbf16> to vector<128x128xbf16>
    %cst_128 = arith.constant dense<0.000000e+00> : vector<64x128xf32>
    %168 = tpu.matmul %165, %167, %cst_128 {dimension_numbers = #tpu.dot_dimension_numbers<[1], [0], [0], [1], [0, 0, 1, 1], [], []>} : vector<64x128xbf16>, vector<128x128xbf16>, vector<64x128xf32> -> vector<64x128xf32>
    %169 = arith.addf %159, %168 : vector<64x128xf32>
    %c16_129 = arith.constant 16 : index
    %c0_130 = arith.constant 0 : index
    %170 = vector.load %arg14[%c16_129, %c0_130] : memref<296x128xf32, #tpu.memory_space<vmem>>, vector<64x128xf32>
    %c0_i32_131 = arith.constant 0 : i32
    %171 = vector.broadcast %c0_i32_131 : i32 to vector<64x128xi32>
    %172 = arith.cmpi sgt, %118, %171 : vector<64x128xi32>
    %cst_132 = arith.constant 0.000000e+00 : f32
    %173 = vector.broadcast %cst_132 : f32 to vector<64x128xf32>
    %174 = arith.select %172, %170, %173 : vector<64x128xi1>, vector<64x128xf32>
    %175 = arith.truncf %174 : vector<64x128xf32> to vector<64x128xbf16>
    %c6_133 = arith.constant 6 : index
    %c0_134 = arith.constant 0 : index
    %c0_135 = arith.constant 0 : index
    %176 = vector.load %arg3[%c6_133, %c0_134, %c0_135] : memref<9x128x128xbf16, #tpu.memory_space<vmem>>, vector<1x128x128xbf16>
    %177 = vector.shape_cast %176 : vector<1x128x128xbf16> to vector<128x128xbf16>
    %cst_136 = arith.constant dense<0.000000e+00> : vector<64x128xf32>
    %178 = tpu.matmul %175, %177, %cst_136 {dimension_numbers = #tpu.dot_dimension_numbers<[1], [0], [0], [1], [0, 0, 1, 1], [], []>} : vector<64x128xbf16>, vector<128x128xbf16>, vector<64x128xf32> -> vector<64x128xf32>
    %179 = arith.addf %169, %178 : vector<64x128xf32>
    %c17_137 = arith.constant 17 : index
    %c0_138 = arith.constant 0 : index
    %180 = vector.load %arg14[%c17_137, %c0_138] : memref<296x128xf32, #tpu.memory_space<vmem>>, vector<64x128xf32>
    %181 = arith.truncf %180 : vector<64x128xf32> to vector<64x128xbf16>
    %c7_139 = arith.constant 7 : index
    %c0_140 = arith.constant 0 : index
    %c0_141 = arith.constant 0 : index
    %182 = vector.load %arg3[%c7_139, %c0_140, %c0_141] : memref<9x128x128xbf16, #tpu.memory_space<vmem>>, vector<1x128x128xbf16>
    %183 = vector.shape_cast %182 : vector<1x128x128xbf16> to vector<128x128xbf16>
    %cst_142 = arith.constant dense<0.000000e+00> : vector<64x128xf32>
    %184 = tpu.matmul %181, %183, %cst_142 {dimension_numbers = #tpu.dot_dimension_numbers<[1], [0], [0], [1], [0, 0, 1, 1], [], []>} : vector<64x128xbf16>, vector<128x128xbf16>, vector<64x128xf32> -> vector<64x128xf32>
    %185 = arith.addf %179, %184 : vector<64x128xf32>
    %c18_143 = arith.constant 18 : index
    %c0_144 = arith.constant 0 : index
    %186 = vector.load %arg14[%c18_143, %c0_144] : memref<296x128xf32, #tpu.memory_space<vmem>>, vector<64x128xf32>
    %c7_i32_145 = arith.constant 7 : i32
    %187 = vector.broadcast %c7_i32_145 : i32 to vector<64x128xi32>
    %188 = arith.cmpi slt, %118, %187 : vector<64x128xi32>
    %cst_146 = arith.constant 0.000000e+00 : f32
    %189 = vector.broadcast %cst_146 : f32 to vector<64x128xf32>
    %190 = arith.select %188, %186, %189 : vector<64x128xi1>, vector<64x128xf32>
    %191 = arith.truncf %190 : vector<64x128xf32> to vector<64x128xbf16>
    %c8_147 = arith.constant 8 : index
    %c0_148 = arith.constant 0 : index
    %c0_149 = arith.constant 0 : index
    %192 = vector.load %arg3[%c8_147, %c0_148, %c0_149] : memref<9x128x128xbf16, #tpu.memory_space<vmem>>, vector<1x128x128xbf16>
    %193 = vector.shape_cast %192 : vector<1x128x128xbf16> to vector<128x128xbf16>
    %cst_150 = arith.constant dense<0.000000e+00> : vector<64x128xf32>
    %194 = tpu.matmul %191, %193, %cst_150 {dimension_numbers = #tpu.dot_dimension_numbers<[1], [0], [0], [1], [0, 0, 1, 1], [], []>} : vector<64x128xbf16>, vector<128x128xbf16>, vector<64x128xf32> -> vector<64x128xf32>
    %195 = arith.addf %185, %194 : vector<64x128xf32>
    %c1_151 = arith.constant 1 : index
    %c0_152 = arith.constant 0 : index
    %196 = vector.load %arg7[%c1_151, %c0_152] : memref<5x128xf32, #tpu.memory_space<vmem>>, vector<1x128xf32>
    %c1_153 = arith.constant 1 : index
    %c0_154 = arith.constant 0 : index
    %197 = vector.load %arg8[%c1_153, %c0_154] : memref<5x128xf32, #tpu.memory_space<vmem>>, vector<1x128xf32>
    %198 = vector.broadcast %196 : vector<1x128xf32> to vector<64x128xf32>
    %199 = arith.mulf %195, %198 : vector<64x128xf32>
    %200 = vector.broadcast %197 : vector<1x128xf32> to vector<64x128xf32>
    %201 = arith.addf %199, %200 : vector<64x128xf32>
    %cst_155 = arith.constant 1.000000e-01 : f32
    %202 = vector.broadcast %cst_155 : f32 to vector<64x128xf32>
    %203 = arith.mulf %202, %201 : vector<64x128xf32>
    %204 = arith.maximumf %201, %203 : vector<64x128xf32>
    %c0_156 = arith.constant 0 : index
    %c0_157 = arith.constant 0 : index
    %c0_158 = arith.constant 0 : index
    %205 = vector.load %arg10[%c0_156, %c0_157, %c0_158] : memref<4x64x64xf32, #tpu.memory_space<vmem>>, vector<1x64x64xf32>
    %206 = vector.shape_cast %205 : vector<1x64x64xf32> to vector<64x64xf32>
    %cst_159 = arith.constant dense<0.000000e+00> : vector<64x128xf32>
    %207 = tpu.matmul %206, %204, %cst_159 {dimension_numbers = #tpu.dot_dimension_numbers<[1], [0], [0], [1], [0, 0, 1, 1], [], []>} : vector<64x64xf32>, vector<64x128xf32>, vector<64x128xf32> -> vector<64x128xf32>
    %c1_160 = arith.constant 1 : index
    %c0_161 = arith.constant 0 : index
    %c0_162 = arith.constant 0 : index
    %208 = vector.load %arg10[%c1_160, %c0_161, %c0_162] : memref<4x64x64xf32, #tpu.memory_space<vmem>>, vector<1x64x64xf32>
    %209 = vector.shape_cast %208 : vector<1x64x64xf32> to vector<64x64xf32>
    %cst_163 = arith.constant dense<0.000000e+00> : vector<64x128xf32>
    %210 = tpu.matmul %209, %204, %cst_163 {dimension_numbers = #tpu.dot_dimension_numbers<[1], [0], [0], [1], [0, 0, 1, 1], [], []>} : vector<64x64xf32>, vector<64x128xf32>, vector<64x128xf32> -> vector<64x128xf32>
    %211 = arith.maximumf %207, %210 : vector<64x128xf32>
    %c2_164 = arith.constant 2 : index
    %c0_165 = arith.constant 0 : index
    %c0_166 = arith.constant 0 : index
    %212 = vector.load %arg10[%c2_164, %c0_165, %c0_166] : memref<4x64x64xf32, #tpu.memory_space<vmem>>, vector<1x64x64xf32>
    %213 = vector.shape_cast %212 : vector<1x64x64xf32> to vector<64x64xf32>
    %cst_167 = arith.constant dense<0.000000e+00> : vector<64x128xf32>
    %214 = tpu.matmul %213, %204, %cst_167 {dimension_numbers = #tpu.dot_dimension_numbers<[1], [0], [0], [1], [0, 0, 1, 1], [], []>} : vector<64x64xf32>, vector<64x128xf32>, vector<64x128xf32> -> vector<64x128xf32>
    %215 = arith.maximumf %211, %214 : vector<64x128xf32>
    %c3_168 = arith.constant 3 : index
    %c0_169 = arith.constant 0 : index
    %c0_170 = arith.constant 0 : index
    %216 = vector.load %arg10[%c3_168, %c0_169, %c0_170] : memref<4x64x64xf32, #tpu.memory_space<vmem>>, vector<1x64x64xf32>
    %217 = vector.shape_cast %216 : vector<1x64x64xf32> to vector<64x64xf32>
    %cst_171 = arith.constant dense<0.000000e+00> : vector<64x128xf32>
    %218 = tpu.matmul %217, %204, %cst_171 {dimension_numbers = #tpu.dot_dimension_numbers<[1], [0], [0], [1], [0, 0, 1, 1], [], []>} : vector<64x64xf32>, vector<64x128xf32>, vector<64x128xf32> -> vector<64x128xf32>
    %219 = arith.maximumf %215, %218 : vector<64x128xf32>
    %c0_172 = arith.constant 0 : index
    %c0_173 = arith.constant 0 : index
    %220 = vector.load %arg4[%c0_172, %c0_173] : memref<128x128xbf16, #tpu.memory_space<vmem>>, vector<128x128xbf16>
    %221 = arith.truncf %219 : vector<64x128xf32> to vector<64x128xbf16>
    %cst_174 = arith.constant dense<0.000000e+00> : vector<64x128xf32>
    %222 = tpu.matmul %221, %220, %cst_174 {dimension_numbers = #tpu.dot_dimension_numbers<[1], [0], [0], [1], [0, 0, 1, 1], [], []>} : vector<64x128xbf16>, vector<128x128xbf16>, vector<64x128xf32> -> vector<64x128xf32>
    %c2_175 = arith.constant 2 : index
    %c0_176 = arith.constant 0 : index
    %223 = vector.load %arg7[%c2_175, %c0_176] : memref<5x128xf32, #tpu.memory_space<vmem>>, vector<1x128xf32>
    %c2_177 = arith.constant 2 : index
    %c0_178 = arith.constant 0 : index
    %224 = vector.load %arg8[%c2_177, %c0_178] : memref<5x128xf32, #tpu.memory_space<vmem>>, vector<1x128xf32>
    %225 = vector.broadcast %223 : vector<1x128xf32> to vector<64x128xf32>
    %226 = arith.mulf %222, %225 : vector<64x128xf32>
    %227 = vector.broadcast %224 : vector<1x128xf32> to vector<64x128xf32>
    %228 = arith.addf %226, %227 : vector<64x128xf32>
    %cst_179 = arith.constant 1.000000e-01 : f32
    %229 = vector.broadcast %cst_179 : f32 to vector<64x128xf32>
    %230 = arith.mulf %229, %228 : vector<64x128xf32>
    %231 = arith.maximumf %228, %230 : vector<64x128xf32>
    %232 = arith.addf %219, %231 : vector<64x128xf32>
    %cst_180 = arith.constant 1.000000e-01 : f32
    %233 = vector.broadcast %cst_180 : f32 to vector<64x128xf32>
    %234 = arith.mulf %233, %232 : vector<64x128xf32>
    %235 = arith.maximumf %232, %234 : vector<64x128xf32>
    %c0_181 = arith.constant 0 : index
    %c0_182 = arith.constant 0 : index
    %c0_183 = arith.constant 0 : index
    %236 = vector.load %arg11[%c0_181, %c0_182, %c0_183] : memref<4x16x64xf32, #tpu.memory_space<vmem>>, vector<1x16x64xf32>
    %237 = vector.shape_cast %236 : vector<1x16x64xf32> to vector<16x64xf32>
    %cst_184 = arith.constant dense<0.000000e+00> : vector<16x128xf32>
    %238 = tpu.matmul %237, %235, %cst_184 {dimension_numbers = #tpu.dot_dimension_numbers<[1], [0], [0], [1], [0, 0, 1, 1], [], []>} : vector<16x64xf32>, vector<64x128xf32>, vector<16x128xf32> -> vector<16x128xf32>
    %c1_185 = arith.constant 1 : index
    %c0_186 = arith.constant 0 : index
    %c0_187 = arith.constant 0 : index
    %239 = vector.load %arg11[%c1_185, %c0_186, %c0_187] : memref<4x16x64xf32, #tpu.memory_space<vmem>>, vector<1x16x64xf32>
    %240 = vector.shape_cast %239 : vector<1x16x64xf32> to vector<16x64xf32>
    %cst_188 = arith.constant dense<0.000000e+00> : vector<16x128xf32>
    %241 = tpu.matmul %240, %235, %cst_188 {dimension_numbers = #tpu.dot_dimension_numbers<[1], [0], [0], [1], [0, 0, 1, 1], [], []>} : vector<16x64xf32>, vector<64x128xf32>, vector<16x128xf32> -> vector<16x128xf32>
    %242 = arith.maximumf %238, %241 : vector<16x128xf32>
    %c2_189 = arith.constant 2 : index
    %c0_190 = arith.constant 0 : index
    %c0_191 = arith.constant 0 : index
    %243 = vector.load %arg11[%c2_189, %c0_190, %c0_191] : memref<4x16x64xf32, #tpu.memory_space<vmem>>, vector<1x16x64xf32>
    %244 = vector.shape_cast %243 : vector<1x16x64xf32> to vector<16x64xf32>
    %cst_192 = arith.constant dense<0.000000e+00> : vector<16x128xf32>
    %245 = tpu.matmul %244, %235, %cst_192 {dimension_numbers = #tpu.dot_dimension_numbers<[1], [0], [0], [1], [0, 0, 1, 1], [], []>} : vector<16x64xf32>, vector<64x128xf32>, vector<16x128xf32> -> vector<16x128xf32>
    %246 = arith.maximumf %242, %245 : vector<16x128xf32>
    %c3_193 = arith.constant 3 : index
    %c0_194 = arith.constant 0 : index
    %c0_195 = arith.constant 0 : index
    %247 = vector.load %arg11[%c3_193, %c0_194, %c0_195] : memref<4x16x64xf32, #tpu.memory_space<vmem>>, vector<1x16x64xf32>
    %248 = vector.shape_cast %247 : vector<1x16x64xf32> to vector<16x64xf32>
    %cst_196 = arith.constant dense<0.000000e+00> : vector<16x128xf32>
    %249 = tpu.matmul %248, %235, %cst_196 {dimension_numbers = #tpu.dot_dimension_numbers<[1], [0], [0], [1], [0, 0, 1, 1], [], []>} : vector<16x64xf32>, vector<64x128xf32>, vector<16x128xf32> -> vector<16x128xf32>
    %250 = arith.maximumf %246, %249 : vector<16x128xf32>
    %cst_197 = arith.constant 0.000000e+00 : f32
    %251 = vector.broadcast %cst_197 : f32 to vector<5x128xf32>
    %c0_198 = arith.constant 0 : index
    %c0_199 = arith.constant 0 : index
    %252 = vector.load %arg14[%c0_198, %c0_199] : memref<296x128xf32, #tpu.memory_space<vmem>>, vector<5x128xf32>
    tpu.vector_store %arg14[%c0_198, %c0_199], %251 {strides = array<i32>} : memref<296x128xf32, #tpu.memory_space<vmem>>, vector<5x128xf32>,
    %cst_200 = arith.constant 0.000000e+00 : f32
    %253 = vector.broadcast %cst_200 : f32 to vector<5x128xf32>
    %c21 = arith.constant 21 : index
    %c0_201 = arith.constant 0 : index
    %254 = vector.load %arg14[%c21, %c0_201] : memref<296x128xf32, #tpu.memory_space<vmem>>, vector<5x128xf32>
    tpu.vector_store %arg14[%c21, %c0_201], %253 {strides = array<i32>} : memref<296x128xf32, #tpu.memory_space<vmem>>, vector<5x128xf32>,
    %c5_202 = arith.constant 5 : index
    %c0_203 = arith.constant 0 : index
    %255 = vector.load %arg14[%c5_202, %c0_203] : memref<296x128xf32, #tpu.memory_space<vmem>>, vector<16x128xf32>
    tpu.vector_store %arg14[%c5_202, %c0_203], %250 {strides = array<i32>} : memref<296x128xf32, #tpu.memory_space<vmem>>, vector<16x128xf32>,
    %256 = tpu.iota {dimensions = array<i32: 0>} : vector<16x128xi32>
    %c3_i32 = arith.constant 3 : i32
    %257 = vector.broadcast %c3_i32 : i32 to vector<16x128xi32>
    %258 = arith.andi %256, %257 : vector<16x128xi32>
    %c0_204 = arith.constant 0 : index
    %c0_205 = arith.constant 0 : index
    %259 = vector.load %arg14[%c0_204, %c0_205] : memref<296x128xf32, #tpu.memory_space<vmem>>, vector<16x128xf32>
    %c0_i32_206 = arith.constant 0 : i32
    %260 = vector.broadcast %c0_i32_206 : i32 to vector<16x128xi32>
    %261 = arith.cmpi sgt, %258, %260 : vector<16x128xi32>
    %cst_207 = arith.constant 0.000000e+00 : f32
    %262 = vector.broadcast %cst_207 : f32 to vector<16x128xf32>
    %263 = arith.select %261, %259, %262 : vector<16x128xi1>, vector<16x128xf32>
    %264 = arith.truncf %263 : vector<16x128xf32> to vector<16x128xbf16>
    %c0_208 = arith.constant 0 : index
    %c0_209 = arith.constant 0 : index
    %c0_210 = arith.constant 0 : index
    %265 = vector.load %arg5[%c0_208, %c0_209, %c0_210] : memref<9x128x128xbf16, #tpu.memory_space<vmem>>, vector<1x128x128xbf16>
    %266 = vector.shape_cast %265 : vector<1x128x128xbf16> to vector<128x128xbf16>
    %cst_211 = arith.constant dense<0.000000e+00> : vector<16x128xf32>
    %267 = tpu.matmul %264, %266, %cst_211 {dimension_numbers = #tpu.dot_dimension_numbers<[1], [0], [0], [1], [0, 0, 1, 1], [], []>} : vector<16x128xbf16>, vector<128x128xbf16>, vector<16x128xf32> -> vector<16x128xf32>
    %c1_212 = arith.constant 1 : index
    %c0_213 = arith.constant 0 : index
    %268 = vector.load %arg14[%c1_212, %c0_213] : memref<296x128xf32, #tpu.memory_space<vmem>>, vector<16x128xf32>
    %269 = arith.truncf %268 : vector<16x128xf32> to vector<16x128xbf16>
    %c1_214 = arith.constant 1 : index
    %c0_215 = arith.constant 0 : index
    %c0_216 = arith.constant 0 : index
    %270 = vector.load %arg5[%c1_214, %c0_215, %c0_216] : memref<9x128x128xbf16, #tpu.memory_space<vmem>>, vector<1x128x128xbf16>
    %271 = vector.shape_cast %270 : vector<1x128x128xbf16> to vector<128x128xbf16>
    %cst_217 = arith.constant dense<0.000000e+00> : vector<16x128xf32>
    %272 = tpu.matmul %269, %271, %cst_217 {dimension_numbers = #tpu.dot_dimension_numbers<[1], [0], [0], [1], [0, 0, 1, 1], [], []>} : vector<16x128xbf16>, vector<128x128xbf16>, vector<16x128xf32> -> vector<16x128xf32>
    %273 = arith.addf %267, %272 : vector<16x128xf32>
    %c2_218 = arith.constant 2 : index
    %c0_219 = arith.constant 0 : index
    %274 = vector.load %arg14[%c2_218, %c0_219] : memref<296x128xf32, #tpu.memory_space<vmem>>, vector<16x128xf32>
    %c3_i32_220 = arith.constant 3 : i32
    %275 = vector.broadcast %c3_i32_220 : i32 to vector<16x128xi32>
    %276 = arith.cmpi slt, %258, %275 : vector<16x128xi32>
    %cst_221 = arith.constant 0.000000e+00 : f32
    %277 = vector.broadcast %cst_221 : f32 to vector<16x128xf32>
    %278 = arith.select %276, %274, %277 : vector<16x128xi1>, vector<16x128xf32>
    %279 = arith.truncf %278 : vector<16x128xf32> to vector<16x128xbf16>
    %c2_222 = arith.constant 2 : index
    %c0_223 = arith.constant 0 : index
    %c0_224 = arith.constant 0 : index
    %280 = vector.load %arg5[%c2_222, %c0_223, %c0_224] : memref<9x128x128xbf16, #tpu.memory_space<vmem>>, vector<1x128x128xbf16>
    %281 = vector.shape_cast %280 : vector<1x128x128xbf16> to vector<128x128xbf16>
    %cst_225 = arith.constant dense<0.000000e+00> : vector<16x128xf32>
    %282 = tpu.matmul %279, %281, %cst_225 {dimension_numbers = #tpu.dot_dimension_numbers<[1], [0], [0], [1], [0, 0, 1, 1], [], []>} : vector<16x128xbf16>, vector<128x128xbf16>, vector<16x128xf32> -> vector<16x128xf32>
    %283 = arith.addf %273, %282 : vector<16x128xf32>
    %c4_226 = arith.constant 4 : index
    %c0_227 = arith.constant 0 : index
    %284 = vector.load %arg14[%c4_226, %c0_227] : memref<296x128xf32, #tpu.memory_space<vmem>>, vector<16x128xf32>
    %c0_i32_228 = arith.constant 0 : i32
    %285 = vector.broadcast %c0_i32_228 : i32 to vector<16x128xi32>
    %286 = arith.cmpi sgt, %258, %285 : vector<16x128xi32>
    %cst_229 = arith.constant 0.000000e+00 : f32
    %287 = vector.broadcast %cst_229 : f32 to vector<16x128xf32>
    %288 = arith.select %286, %284, %287 : vector<16x128xi1>, vector<16x128xf32>
    %289 = arith.truncf %288 : vector<16x128xf32> to vector<16x128xbf16>
    %c3_230 = arith.constant 3 : index
    %c0_231 = arith.constant 0 : index
    %c0_232 = arith.constant 0 : index
    %290 = vector.load %arg5[%c3_230, %c0_231, %c0_232] : memref<9x128x128xbf16, #tpu.memory_space<vmem>>, vector<1x128x128xbf16>
    %291 = vector.shape_cast %290 : vector<1x128x128xbf16> to vector<128x128xbf16>
    %cst_233 = arith.constant dense<0.000000e+00> : vector<16x128xf32>
    %292 = tpu.matmul %289, %291, %cst_233 {dimension_numbers = #tpu.dot_dimension_numbers<[1], [0], [0], [1], [0, 0, 1, 1], [], []>} : vector<16x128xbf16>, vector<128x128xbf16>, vector<16x128xf32> -> vector<16x128xf32>
    %293 = arith.addf %283, %292 : vector<16x128xf32>
    %c5_234 = arith.constant 5 : index
    %c0_235 = arith.constant 0 : index
    %294 = vector.load %arg14[%c5_234, %c0_235] : memref<296x128xf32, #tpu.memory_space<vmem>>, vector<16x128xf32>
    %295 = arith.truncf %294 : vector<16x128xf32> to vector<16x128xbf16>
    %c4_236 = arith.constant 4 : index
    %c0_237 = arith.constant 0 : index
    %c0_238 = arith.constant 0 : index
    %296 = vector.load %arg5[%c4_236, %c0_237, %c0_238] : memref<9x128x128xbf16, #tpu.memory_space<vmem>>, vector<1x128x128xbf16>
    %297 = vector.shape_cast %296 : vector<1x128x128xbf16> to vector<128x128xbf16>
    %cst_239 = arith.constant dense<0.000000e+00> : vector<16x128xf32>
    %298 = tpu.matmul %295, %297, %cst_239 {dimension_numbers = #tpu.dot_dimension_numbers<[1], [0], [0], [1], [0, 0, 1, 1], [], []>} : vector<16x128xbf16>, vector<128x128xbf16>, vector<16x128xf32> -> vector<16x128xf32>
    %299 = arith.addf %293, %298 : vector<16x128xf32>
    %c6_240 = arith.constant 6 : index
    %c0_241 = arith.constant 0 : index
    %300 = vector.load %arg14[%c6_240, %c0_241] : memref<296x128xf32, #tpu.memory_space<vmem>>, vector<16x128xf32>
    %c3_i32_242 = arith.constant 3 : i32
    %301 = vector.broadcast %c3_i32_242 : i32 to vector<16x128xi32>
    %302 = arith.cmpi slt, %258, %301 : vector<16x128xi32>
    %cst_243 = arith.constant 0.000000e+00 : f32
    %303 = vector.broadcast %cst_243 : f32 to vector<16x128xf32>
    %304 = arith.select %302, %300, %303 : vector<16x128xi1>, vector<16x128xf32>
    %305 = arith.truncf %304 : vector<16x128xf32> to vector<16x128xbf16>
    %c5_244 = arith.constant 5 : index
    %c0_245 = arith.constant 0 : index
    %c0_246 = arith.constant 0 : index
    %306 = vector.load %arg5[%c5_244, %c0_245, %c0_246] : memref<9x128x128xbf16, #tpu.memory_space<vmem>>, vector<1x128x128xbf16>
    %307 = vector.shape_cast %306 : vector<1x128x128xbf16> to vector<128x128xbf16>
    %cst_247 = arith.constant dense<0.000000e+00> : vector<16x128xf32>
    %308 = tpu.matmul %305, %307, %cst_247 {dimension_numbers = #tpu.dot_dimension_numbers<[1], [0], [0], [1], [0, 0, 1, 1], [], []>} : vector<16x128xbf16>, vector<128x128xbf16>, vector<16x128xf32> -> vector<16x128xf32>
    %309 = arith.addf %299, %308 : vector<16x128xf32>
    %c8_248 = arith.constant 8 : index
    %c0_249 = arith.constant 0 : index
    %310 = vector.load %arg14[%c8_248, %c0_249] : memref<296x128xf32, #tpu.memory_space<vmem>>, vector<16x128xf32>
    %c0_i32_250 = arith.constant 0 : i32
    %311 = vector.broadcast %c0_i32_250 : i32 to vector<16x128xi32>
    %312 = arith.cmpi sgt, %258, %311 : vector<16x128xi32>
    %cst_251 = arith.constant 0.000000e+00 : f32
    %313 = vector.broadcast %cst_251 : f32 to vector<16x128xf32>
    %314 = arith.select %312, %310, %313 : vector<16x128xi1>, vector<16x128xf32>
    %315 = arith.truncf %314 : vector<16x128xf32> to vector<16x128xbf16>
    %c6_252 = arith.constant 6 : index
    %c0_253 = arith.constant 0 : index
    %c0_254 = arith.constant 0 : index
    %316 = vector.load %arg5[%c6_252, %c0_253, %c0_254] : memref<9x128x128xbf16, #tpu.memory_space<vmem>>, vector<1x128x128xbf16>
    %317 = vector.shape_cast %316 : vector<1x128x128xbf16> to vector<128x128xbf16>
    %cst_255 = arith.constant dense<0.000000e+00> : vector<16x128xf32>
    %318 = tpu.matmul %315, %317, %cst_255 {dimension_numbers = #tpu.dot_dimension_numbers<[1], [0], [0], [1], [0, 0, 1, 1], [], []>} : vector<16x128xbf16>, vector<128x128xbf16>, vector<16x128xf32> -> vector<16x128xf32>
    %319 = arith.addf %309, %318 : vector<16x128xf32>
    %c9_256 = arith.constant 9 : index
    %c0_257 = arith.constant 0 : index
    %320 = vector.load %arg14[%c9_256, %c0_257] : memref<296x128xf32, #tpu.memory_space<vmem>>, vector<16x128xf32>
    %321 = arith.truncf %320 : vector<16x128xf32> to vector<16x128xbf16>
    %c7_258 = arith.constant 7 : index
    %c0_259 = arith.constant 0 : index
    %c0_260 = arith.constant 0 : index
    %322 = vector.load %arg5[%c7_258, %c0_259, %c0_260] : memref<9x128x128xbf16, #tpu.memory_space<vmem>>, vector<1x128x128xbf16>
    %323 = vector.shape_cast %322 : vector<1x128x128xbf16> to vector<128x128xbf16>
    %cst_261 = arith.constant dense<0.000000e+00> : vector<16x128xf32>
    %324 = tpu.matmul %321, %323, %cst_261 {dimension_numbers = #tpu.dot_dimension_numbers<[1], [0], [0], [1], [0, 0, 1, 1], [], []>} : vector<16x128xbf16>, vector<128x128xbf16>, vector<16x128xf32> -> vector<16x128xf32>
    %325 = arith.addf %319, %324 : vector<16x128xf32>
    %c10_262 = arith.constant 10 : index
    %c0_263 = arith.constant 0 : index
    %326 = vector.load %arg14[%c10_262, %c0_263] : memref<296x128xf32, #tpu.memory_space<vmem>>, vector<16x128xf32>
    %c3_i32_264 = arith.constant 3 : i32
    %327 = vector.broadcast %c3_i32_264 : i32 to vector<16x128xi32>
    %328 = arith.cmpi slt, %258, %327 : vector<16x128xi32>
    %cst_265 = arith.constant 0.000000e+00 : f32
    %329 = vector.broadcast %cst_265 : f32 to vector<16x128xf32>
    %330 = arith.select %328, %326, %329 : vector<16x128xi1>, vector<16x128xf32>
    %331 = arith.truncf %330 : vector<16x128xf32> to vector<16x128xbf16>
    %c8_266 = arith.constant 8 : index
    %c0_267 = arith.constant 0 : index
    %c0_268 = arith.constant 0 : index
    %332 = vector.load %arg5[%c8_266, %c0_267, %c0_268] : memref<9x128x128xbf16, #tpu.memory_space<vmem>>, vector<1x128x128xbf16>
    %333 = vector.shape_cast %332 : vector<1x128x128xbf16> to vector<128x128xbf16>
    %cst_269 = arith.constant dense<0.000000e+00> : vector<16x128xf32>
    %334 = tpu.matmul %331, %333, %cst_269 {dimension_numbers = #tpu.dot_dimension_numbers<[1], [0], [0], [1], [0, 0, 1, 1], [], []>} : vector<16x128xbf16>, vector<128x128xbf16>, vector<16x128xf32> -> vector<16x128xf32>
    %335 = arith.addf %325, %334 : vector<16x128xf32>
    %c3_270 = arith.constant 3 : index
    %c0_271 = arith.constant 0 : index
    %336 = vector.load %arg7[%c3_270, %c0_271] : memref<5x128xf32, #tpu.memory_space<vmem>>, vector<1x128xf32>
    %c3_272 = arith.constant 3 : index
    %c0_273 = arith.constant 0 : index
    %337 = vector.load %arg8[%c3_272, %c0_273] : memref<5x128xf32, #tpu.memory_space<vmem>>, vector<1x128xf32>
    %338 = vector.broadcast %336 : vector<1x128xf32> to vector<16x128xf32>
    %339 = arith.mulf %335, %338 : vector<16x128xf32>
    %340 = vector.broadcast %337 : vector<1x128xf32> to vector<16x128xf32>
    %341 = arith.addf %339, %340 : vector<16x128xf32>
    %cst_274 = arith.constant 1.000000e-01 : f32
    %342 = vector.broadcast %cst_274 : f32 to vector<16x128xf32>
    %343 = arith.mulf %342, %341 : vector<16x128xf32>
    %344 = arith.maximumf %341, %343 : vector<16x128xf32>
    %345 = arith.truncf %344 : vector<16x128xf32> to vector<16x128xbf16>
    %c4_275 = arith.constant 4 : index
    %c0_276 = arith.constant 0 : index
    %c0_277 = arith.constant 0 : index
    %346 = vector.load %arg6[%c4_275, %c0_276, %c0_277] : memref<5x128x128xbf16, #tpu.memory_space<vmem>>, vector<1x128x128xbf16>
    %347 = vector.shape_cast %346 : vector<1x128x128xbf16> to vector<128x128xbf16>
    %cst_278 = arith.constant dense<0.000000e+00> : vector<16x128xf32>
    %348 = tpu.matmul %345, %347, %cst_278 {dimension_numbers = #tpu.dot_dimension_numbers<[1], [0], [0], [1], [0, 0, 1, 1], [], []>} : vector<16x128xbf16>, vector<128x128xbf16>, vector<16x128xf32> -> vector<16x128xf32>
    %c0_279 = arith.constant 0 : index
    %c0_280 = arith.constant 0 : index
    %c0_281 = arith.constant 0 : index
    %349 = vector.load %arg12[%c0_279, %c0_280, %c0_281] : memref<4x16x64xf32, #tpu.memory_space<vmem>>, vector<1x16x64xf32>
    %350 = vector.shape_cast %349 : vector<1x16x64xf32> to vector<16x64xf32>
    %cst_282 = arith.constant dense<0.000000e+00> : vector<16x128xf32>
    %351 = tpu.matmul %350, %235, %cst_282 {dimension_numbers = #tpu.dot_dimension_numbers<[1], [0], [0], [1], [0, 0, 1, 1], [], []>} : vector<16x64xf32>, vector<64x128xf32>, vector<16x128xf32> -> vector<16x128xf32>
    %352 = arith.truncf %351 : vector<16x128xf32> to vector<16x128xbf16>
    %c0_283 = arith.constant 0 : index
    %c0_284 = arith.constant 0 : index
    %c0_285 = arith.constant 0 : index
    %353 = vector.load %arg6[%c0_283, %c0_284, %c0_285] : memref<5x128x128xbf16, #tpu.memory_space<vmem>>, vector<1x128x128xbf16>
    %354 = vector.shape_cast %353 : vector<1x128x128xbf16> to vector<128x128xbf16>
    %cst_286 = arith.constant dense<0.000000e+00> : vector<16x128xf32>
    %355 = tpu.matmul %352, %354, %cst_286 {dimension_numbers = #tpu.dot_dimension_numbers<[1], [0], [0], [1], [0, 0, 1, 1], [], []>} : vector<16x128xbf16>, vector<128x128xbf16>, vector<16x128xf32> -> vector<16x128xf32>
    %356 = arith.addf %348, %355 : vector<16x128xf32>
    %c1_287 = arith.constant 1 : index
    %c0_288 = arith.constant 0 : index
    %c0_289 = arith.constant 0 : index
    %357 = vector.load %arg12[%c1_287, %c0_288, %c0_289] : memref<4x16x64xf32, #tpu.memory_space<vmem>>, vector<1x16x64xf32>
    %358 = vector.shape_cast %357 : vector<1x16x64xf32> to vector<16x64xf32>
    %cst_290 = arith.constant dense<0.000000e+00> : vector<16x128xf32>
    %359 = tpu.matmul %358, %235, %cst_290 {dimension_numbers = #tpu.dot_dimension_numbers<[1], [0], [0], [1], [0, 0, 1, 1], [], []>} : vector<16x64xf32>, vector<64x128xf32>, vector<16x128xf32> -> vector<16x128xf32>
    %360 = arith.truncf %359 : vector<16x128xf32> to vector<16x128xbf16>
    %c1_291 = arith.constant 1 : index
    %c0_292 = arith.constant 0 : index
    %c0_293 = arith.constant 0 : index
    %361 = vector.load %arg6[%c1_291, %c0_292, %c0_293] : memref<5x128x128xbf16, #tpu.memory_space<vmem>>, vector<1x128x128xbf16>
    %362 = vector.shape_cast %361 : vector<1x128x128xbf16> to vector<128x128xbf16>
    %cst_294 = arith.constant dense<0.000000e+00> : vector<16x128xf32>
    %363 = tpu.matmul %360, %362, %cst_294 {dimension_numbers = #tpu.dot_dimension_numbers<[1], [0], [0], [1], [0, 0, 1, 1], [], []>} : vector<16x128xbf16>, vector<128x128xbf16>, vector<16x128xf32> -> vector<16x128xf32>
    %364 = arith.addf %356, %363 : vector<16x128xf32>
    %c2_295 = arith.constant 2 : index
    %c0_296 = arith.constant 0 : index
    %c0_297 = arith.constant 0 : index
    %365 = vector.load %arg12[%c2_295, %c0_296, %c0_297] : memref<4x16x64xf32, #tpu.memory_space<vmem>>, vector<1x16x64xf32>
    %366 = vector.shape_cast %365 : vector<1x16x64xf32> to vector<16x64xf32>
    %cst_298 = arith.constant dense<0.000000e+00> : vector<16x128xf32>
    %367 = tpu.matmul %366, %235, %cst_298 {dimension_numbers = #tpu.dot_dimension_numbers<[1], [0], [0], [1], [0, 0, 1, 1], [], []>} : vector<16x64xf32>, vector<64x128xf32>, vector<16x128xf32> -> vector<16x128xf32>
    %368 = arith.truncf %367 : vector<16x128xf32> to vector<16x128xbf16>
    %c2_299 = arith.constant 2 : index
    %c0_300 = arith.constant 0 : index
    %c0_301 = arith.constant 0 : index
    %369 = vector.load %arg6[%c2_299, %c0_300, %c0_301] : memref<5x128x128xbf16, #tpu.memory_space<vmem>>, vector<1x128x128xbf16>
    %370 = vector.shape_cast %369 : vector<1x128x128xbf16> to vector<128x128xbf16>
    %cst_302 = arith.constant dense<0.000000e+00> : vector<16x128xf32>
    %371 = tpu.matmul %368, %370, %cst_302 {dimension_numbers = #tpu.dot_dimension_numbers<[1], [0], [0], [1], [0, 0, 1, 1], [], []>} : vector<16x128xbf16>, vector<128x128xbf16>, vector<16x128xf32> -> vector<16x128xf32>
    %372 = arith.addf %364, %371 : vector<16x128xf32>
    %c3_303 = arith.constant 3 : index
    %c0_304 = arith.constant 0 : index
    %c0_305 = arith.constant 0 : index
    %373 = vector.load %arg12[%c3_303, %c0_304, %c0_305] : memref<4x16x64xf32, #tpu.memory_space<vmem>>, vector<1x16x64xf32>
    %374 = vector.shape_cast %373 : vector<1x16x64xf32> to vector<16x64xf32>
    %cst_306 = arith.constant dense<0.000000e+00> : vector<16x128xf32>
    %375 = tpu.matmul %374, %235, %cst_306 {dimension_numbers = #tpu.dot_dimension_numbers<[1], [0], [0], [1], [0, 0, 1, 1], [], []>} : vector<16x64xf32>, vector<64x128xf32>, vector<16x128xf32> -> vector<16x128xf32>
    %376 = arith.truncf %375 : vector<16x128xf32> to vector<16x128xbf16>
    %c3_307 = arith.constant 3 : index
    %c0_308 = arith.constant 0 : index
    %c0_309 = arith.constant 0 : index
    %377 = vector.load %arg6[%c3_307, %c0_308, %c0_309] : memref<5x128x128xbf16, #tpu.memory_space<vmem>>, vector<1x128x128xbf16>
    %378 = vector.shape_cast %377 : vector<1x128x128xbf16> to vector<128x128xbf16>
    %cst_310 = arith.constant dense<0.000000e+00> : vector<16x128xf32>
    %379 = tpu.matmul %376, %378, %cst_310 {dimension_numbers = #tpu.dot_dimension_numbers<[1], [0], [0], [1], [0, 0, 1, 1], [], []>} : vector<16x128xbf16>, vector<128x128xbf16>, vector<16x128xf32> -> vector<16x128xf32>
    %380 = arith.addf %372, %379 : vector<16x128xf32>
    %c4_311 = arith.constant 4 : index
    %c0_312 = arith.constant 0 : index
    %381 = vector.load %arg7[%c4_311, %c0_312] : memref<5x128xf32, #tpu.memory_space<vmem>>, vector<1x128xf32>
    %c4_313 = arith.constant 4 : index
    %c0_314 = arith.constant 0 : index
    %382 = vector.load %arg8[%c4_313, %c0_314] : memref<5x128xf32, #tpu.memory_space<vmem>>, vector<1x128xf32>
    %383 = vector.broadcast %381 : vector<1x128xf32> to vector<16x128xf32>
    %384 = arith.mulf %380, %383 : vector<16x128xf32>
    %385 = vector.broadcast %382 : vector<1x128xf32> to vector<16x128xf32>
    %386 = arith.addf %384, %385 : vector<16x128xf32>
    %c0_315 = arith.constant 0 : index
    %c0_316 = arith.constant 0 : index
    %c0_317 = arith.constant 0 : index
    %387 = vector.load %arg13[%c0_315, %c0_316, %c0_317] : memref<1x16x128xf32, #tpu.memory_space<vmem>>, vector<1x16x128xf32>
    %388 = vector.shape_cast %387 : vector<1x16x128xf32> to vector<16x128xf32>
    %389 = vector.shape_cast %386 : vector<16x128xf32> to vector<1x16x128xf32>
    tpu.vector_store %arg13[%c0_315, %c0_316, %c0_317], %389 {strides = array<i32>} : memref<1x16x128xf32, #tpu.memory_space<vmem>>, vector<1x16x128xf32>,
    return
  }
  func.func @transform_0(%arg0: i32) -> (i32, i32, i32) {
    %c0_i32 = arith.constant 0 : i32
    %c0_i32_0 = arith.constant 0 : i32
    %c0_i32_1 = arith.constant 0 : i32
    return %arg0, %c0_i32, %c0_i32_0 : i32, i32, i32
  }
  func.func @transform_1(%arg0: i32) -> (i32, i32, i32) {
    %c0_i32 = arith.constant 0 : i32
    %c0_i32_0 = arith.constant 0 : i32
    %c0_i32_1 = arith.constant 0 : i32
    %c0_i32_2 = arith.constant 0 : i32
    return %c0_i32, %c0_i32_0, %c0_i32_1 : i32, i32, i32
  }
  func.func @transform_2(%arg0: i32) -> (i32, i32, i32) {
    %c0_i32 = arith.constant 0 : i32
    %c0_i32_0 = arith.constant 0 : i32
    %c0_i32_1 = arith.constant 0 : i32
    %c0_i32_2 = arith.constant 0 : i32
    return %c0_i32, %c0_i32_0, %c0_i32_1 : i32, i32, i32
  }
  func.func @transform_3(%arg0: i32) -> (i32, i32) {
    %c0_i32 = arith.constant 0 : i32
    %c0_i32_0 = arith.constant 0 : i32
    %c0_i32_1 = arith.constant 0 : i32
    return %c0_i32, %c0_i32_0 : i32, i32
  }
  func.func @transform_4(%arg0: i32) -> (i32, i32, i32) {
    %c0_i32 = arith.constant 0 : i32
    %c0_i32_0 = arith.constant 0 : i32
    %c0_i32_1 = arith.constant 0 : i32
    %c0_i32_2 = arith.constant 0 : i32
    return %c0_i32, %c0_i32_0, %c0_i32_1 : i32, i32, i32
  }
  func.func @transform_5(%arg0: i32) -> (i32, i32, i32) {
    %c0_i32 = arith.constant 0 : i32
    %c0_i32_0 = arith.constant 0 : i32
    %c0_i32_1 = arith.constant 0 : i32
    %c0_i32_2 = arith.constant 0 : i32
    return %c0_i32, %c0_i32_0, %c0_i32_1 : i32, i32, i32
  }
  func.func @transform_6(%arg0: i32) -> (i32, i32) {
    %c0_i32 = arith.constant 0 : i32
    %c0_i32_0 = arith.constant 0 : i32
    %c0_i32_1 = arith.constant 0 : i32
    return %c0_i32, %c0_i32_0 : i32, i32
  }
  func.func @transform_7(%arg0: i32) -> (i32, i32) {
    %c0_i32 = arith.constant 0 : i32
    %c0_i32_0 = arith.constant 0 : i32
    %c0_i32_1 = arith.constant 0 : i32
    return %c0_i32, %c0_i32_0 : i32, i32
  }
  func.func @transform_8(%arg0: i32) -> (i32, i32, i32) {
    %c0_i32 = arith.constant 0 : i32
    %c0_i32_0 = arith.constant 0 : i32
    %c0_i32_1 = arith.constant 0 : i32
    %c0_i32_2 = arith.constant 0 : i32
    return %c0_i32, %c0_i32_0, %c0_i32_1 : i32, i32, i32
  }
  func.func @transform_9(%arg0: i32) -> (i32, i32, i32) {
    %c0_i32 = arith.constant 0 : i32
    %c0_i32_0 = arith.constant 0 : i32
    %c0_i32_1 = arith.constant 0 : i32
    %c0_i32_2 = arith.constant 0 : i32
    return %c0_i32, %c0_i32_0, %c0_i32_1 : i32, i32, i32
  }
  func.func @transform_10(%arg0: i32) -> (i32, i32, i32) {
    %c0_i32 = arith.constant 0 : i32
    %c0_i32_0 = arith.constant 0 : i32
    %c0_i32_1 = arith.constant 0 : i32
    %c0_i32_2 = arith.constant 0 : i32
    return %c0_i32, %c0_i32_0, %c0_i32_1 : i32, i32, i32
  }
  func.func @transform_11(%arg0: i32) -> (i32, i32, i32) {
    %c0_i32 = arith.constant 0 : i32
    %c0_i32_0 = arith.constant 0 : i32
    %c0_i32_1 = arith.constant 0 : i32
    %c0_i32_2 = arith.constant 0 : i32
    return %c0_i32, %c0_i32_0, %c0_i32_1 : i32, i32, i32
  }
  func.func @transform_12(%arg0: i32) -> (i32, i32, i32) {
    %c0_i32 = arith.constant 0 : i32
    %c0_i32_0 = arith.constant 0 : i32
    %c0_i32_1 = arith.constant 0 : i32
    return %arg0, %c0_i32, %c0_i32_0 : i32, i32, i32
  }
}

</mosaic_0001>

<bundles_post_ra>
// kernel: darknet_forward.1
= control target key start
LH: loop header
LB: loop body
LE: loop exit
PB: predicated region body
PF: predicated region fallthrough
CT: control target
= control target key end

     0   :  { %s15778_s0 = inlined_call_operand.vmem [shape: f32[2,256,128], index: 0, kind: input, shape index: {}]   ;;  %s15779_s1 = inlined_call_operand.hbm [shape: bf16[9,128,128], index: 1, kind: input, shape index: {}]   ;;  %s15780_s2 = inlined_call_operand.vmem [shape: bf16[9,128,128], index: 2, kind: input, shape index: {}]   ;;  %s15781_s3 = inlined_call_operand.vmem [shape: bf16[128,128], index: 3, kind: input, shape index: {}]   ;;  %s15782_s4 = inlined_call_operand.vmem [shape: bf16[9,128,128], index: 4, kind: input, shape index: {}]   ;;  %s15783_s5 = inlined_call_operand.vmem [shape: bf16[5,128,128], index: 5, kind: input, shape index: {}]   ;;  %s15784_s6 = inlined_call_operand.vmem [shape: f32[5,128], index: 6, kind: input, shape index: {}]   ;;  %s15785_s7 = inlined_call_operand.vmem [shape: f32[5,128], index: 7, kind: input, shape index: {}]   ;;  %s15786_s8 = inlined_call_operand.hbm [shape: f32[4,64,256], index: 8, kind: input, shape index: {}]   ;;  %s15787_s9 = inlined_call_operand.hbm [shape: f32[4,64,64], index: 9, kind: input, shape index: {}]   ;;  %s15788_s10 = inlined_call_operand.vmem [shape: f32[4,16,64], index: 10, kind: input, shape index: {}, may-alias: {10,11}]   ;;  %s15789_s11 = inlined_call_operand.vmem [shape: f32[4,16,64], index: 11, kind: input, shape index: {}, may-alias: {10,11}]   ;;  %s15790_s12 = inlined_call_operand.hbm [shape: f32[2,16,128], index: 12, kind: output, shape index: {}]  }
   0x1   :  { %15866 = sst [smem:[#allocation35_spill]] %s15786_s8 }
   0x2   :  { %15867 = sst [smem:[#allocation36_spill]] %s15790_s12 }
   0x3   :  { %17 = vsyncpa [#allocation4], 0 }
   0x4   :  { %18 = vsyncpa [#allocation7], 0 }
   0x5   :  { %19 = vsyncpa [#allocation5], 0 }
   0x6   :  { %21 = vsyncpa [#allocation5 + $0x1], 0  ;;  %s13199_s21 = smov 0   ;;  %s13201_s22 = smov 0  }
   0x7   :  { %s13203_s23 = smov 0   ;;  %s13205_s24 = smov 0  }
   0x8 LB: > { %15868 = sst [smem:[#allocation13_spill]] %s13104_s21  ;;  %s13220_s25 = sadd.s32 4294967295, %s13116_s24   ;;  %s13116_s24 = sphi %s13205_s24, %s16086_s24   ;;  %s13112_s23 = sphi %s13203_s23, %s16088_s23   ;;  %s13108_s22 = sphi %s13201_s22, %s16090_s22   ;;  %s13104_s21 = sphi %s13199_s21, %s16089_s21  }
   0x9   : > { %15869 = sst [smem:[#allocation14_spill]] %s13112_s23  ;;  %s8793_s26 = sadd.s32 4294967294, %s13116_s24  }
   0xa   : > { %15870 = sst [smem:[#allocation15_spill]] %s13116_s24  ;;  %s13224_s27 = sadd.s32 1, %s13116_s24  }
   0xb   : > { %15871 = sst [smem:[#allocation16_spill]] %s13224_s27  ;;  %s291_s28 = sadd.s32 1, %s13112_s23 }
   0xc   : > { %s288_s29 = ssub.s32 %s13116_s24, %s13224_s27  ;;  %p301_p0 = scmp.ne.s32.totalorder %s13112_s23, %s13108_s22 }
   0xd   : > { %p289_p1 = scmp.eq.s32.totalorder %s288_s29, 0  ;;  %p302_p2 = scmp.eq.s32.totalorder %s13220_s25, 1 }
   0xe   : > { %p307_p3 = scmp.ne.s32.totalorder %s13108_s22, %s13104_s21  ;;  %p308_p4 = scmp.eq.s32.totalorder %s8793_s26, 1 }
   0xf   : > { %s13235_s30 = scalar_select %p289_p1, %s13112_s23, %s291_s28  }
  0x10   : > { %p13237_p5 = por %p302_p2, %p301_p0  ;;  %p13241_p6 = por %p308_p4, %p307_p3 }
  0x11   : > { %15872 = sst [smem:[#allocation17_spill]] %s13235_s30  ;;  %p8794_p7 = scmp.ge.s32.totalorder %s13116_s24, 1 }
  0x12   : > { %s15873_s13 = scalar_select %p13237_p5, 1, 0 }
  0x13   : > { %s15874_s14 = scalar_select %p13241_p6, 1, 0 }
  0x14   : > { %p315_p8 = scmp.lt.s32.totalorder %s13116_s24, 3  ;;  %p15794_p9 = scmp.eq.s32.totalorder %s13220_s25, 0 }
  0x15   : > { %15875 = sst [smem:[#allocation18_spill]] %s15874_s14  ;;  %s13118_s16 = smov [#allocation6]  }
  0x16   : > { %p13248_p10 = pnand %p8794_p7, %p315_p8  ;;  %s358_s17 = sshll.u32 %s13118_s16, 4  ;;  %s359_s17 = int_to_ptr.vmem [resolvable:$true] %s358_s17 }
  0x17   : > { %s13119_s19 = smov [#allocation3]   ;;  %s15878_s8 = sld [smem:[#allocation35_spill]] }
  0x18   : > { %s15876_s15 = scalar_select %p13248_p10, 1, 0 }
  0x19   : > { %p12609_p11 = pneg %p13248_p10  ;;  %s327_s20 = sshll.u32 %s13119_s19, 4  ;;  %s13260_s20 = int_to_ptr.vmem [resolvable:$true] %s327_s20 }
  0x1b   : > { %p13256_p12 = pnand %p15794_p9, %p12609_p11 }
  0x1d   : > { %s12962_s29 = scalar_lea.hbm %s15878_s8, 8192  ;;  %p13270_p0 = pneg %p13256_p12 }
  0x1e   : > { %p12963_p13 = scmp.ne.s32.totalorder %s15878_s8, %s12962_s29  ;;  %p12969_p3 = scmp.lt.u32.totalorder %s12962_s29, %s15878_s8 }
  0x20   : > { %p12965_p1 = pnand %p13270_p0, %p12963_p13 }
  0x22   : > { %p12966_p2 = pneg %p12965_p1 }
  0x24   : > { %p12971_p4 = pnand %p12969_p3, %p12966_p2 }
  0x26   : > { %12974 = shalt.err (!%p12971_p4)
}
  0x27   : > { %s12975_s26 = scalar_lea.vmem %s359_s17, 8192  ;;  %p12983_p9 = scmp.lt.s32.totalorder %s359_s17, %s359_s17 }
  0x28   : > { %p12976_p7 = scmp.ne.s32.totalorder %s359_s17, %s12975_s26  ;;  %p12984_p6 = scmp.lt.s32.totalorder %s12975_s26, %s12975_s26 }
  0x2a   : > { %p12978_p8 = pnand %p12976_p7, %p13270_p0  ;;  %p12985_p5 = por %p12984_p6, %p12983_p9 }
  0x2c   : > { %p12979_p11 = pneg %p12978_p8 }
  0x2e   : > { %p12986_p10 = pnand %p12985_p5, %p12979_p11 }
  0x30   : > { %12989 = shalt.err (!%p12986_p10)
}
  0x31   : > { %s13120_s23 = smov 256   ;;  %s13121_s30 = smov 16  }
  0x32   : > { %12615 = dma.hbm_to_vmem [thread:$0]  (!%p13256_p12), %s15878_s8, 8192, %s359_s17, [#allocation7], %s13120_s23, %s13120_s23, %s13121_s30  }
  0x33   : > { %s12990_s14 = scalar_lea.hbm %s15779_s1, 9216 }
  0x34   : > { %p12991_p13 = scmp.ne.s32.totalorder %s15779_s1, %s12990_s14  ;;  %p12997_p9 = scmp.lt.u32.totalorder %s12990_s14, %s15779_s1 }
  0x36   : > { %p12993_p5 = pnand %p12991_p13, %p13270_p0 }
  0x38   : > { %p12994_p6 = pneg %p12993_p5 }
  0x3a   : > { %p12999_p10 = pnand %p12997_p9, %p12994_p6 }
  0x3c   : > { %13002 = shalt.err (!%p12999_p10)
}
  0x3d   : > { %s13003_s17 = scalar_lea.vmem %s13260_s20, 9216  ;;  %p13011_p4 = scmp.lt.s32.totalorder %s13260_s20, %s13260_s20 }
  0x3e   : > { %p13004_p1 = scmp.ne.s32.totalorder %s13260_s20, %s13003_s17  ;;  %p13012_p7 = scmp.lt.s32.totalorder %s13003_s17, %s13003_s17 }
  0x40   : > { %p13006_p2 = pnand %p13004_p1, %p13270_p0  ;;  %p13013_p8 = por %p13012_p7, %p13011_p4 }
  0x42   : > { %p13007_p3 = pneg %p13006_p2 }
  0x44   : > { %p13014_p11 = pnand %p13013_p8, %p13007_p3 }
  0x46   : > { %13017 = shalt.err (!%p13014_p11)
}
  0x47   : > { %s13122_s21 = smov 64   ;;  %s13123_s12 = smov 4  }
  0x48   : > { %12612 = dma.hbm_to_vmem [thread:$0]  (!%p13256_p12), %s15779_s1, 9216, %s13260_s20, [#allocation4], %s13122_s21, %s13122_s21, %s13123_s12  }
  0x49   : > { %s13124_s23 = smov [#allocation8]   ;;  %s13018_s29 = scalar_lea.hbm %s15787_s9, 4096 }
  0x4a   : > { %s371_s30 = sshll.u32 %s13124_s23, 4  ;;  %p13019_p13 = scmp.ne.s32.totalorder %s15787_s9, %s13018_s29  ;;  %s372_s30 = int_to_ptr.vmem [resolvable:$true] %s371_s30 }
  0x4b   : > { %p13025_p9 = scmp.lt.u32.totalorder %s13018_s29, %s15787_s9 }
  0x4c   : > { %p13021_p5 = pnand %p13019_p13, %p13270_p0 }
  0x4e   : > { %p13022_p6 = pneg %p13021_p5 }
  0x50   : > { %p13027_p10 = pnand %p13025_p9, %p13022_p6 }
  0x52   : > { %13030 = shalt.err (!%p13027_p10)
}
  0x53   : > { %s13031_s20 = scalar_lea.vmem %s372_s30, 4096  ;;  %p13039_p4 = scmp.lt.s32.totalorder %s372_s30, %s372_s30 }
  0x54   : > { %p13032_p1 = scmp.ne.s32.totalorder %s372_s30, %s13031_s20  ;;  %p13040_p7 = scmp.lt.s32.totalorder %s13031_s20, %s13031_s20 }
  0x56   : > { %p13034_p2 = pnand %p13032_p1, %p13270_p0  ;;  %p13041_p8 = por %p13040_p7, %p13039_p4 }
  0x58   : > { %p13035_p3 = pneg %p13034_p2 }
  0x5a   : > { %p13042_p11 = pnand %p13041_p8, %p13035_p3 }
  0x5c   : > { %13045 = shalt.err (!%p13042_p11)
}
  0x5d   : > { %s13125_s21 = smov 128   ;;  %s13126_s12 = smov 8  }
  0x5e   : > { %12618 = dma.hbm_to_vmem [thread:$0]  (!%p13256_p12), %s15787_s9, 4096, %s372_s30, [#allocation7], %s13125_s21, %s13125_s21, %s13126_s12  }
  0x5f   : > { %p15880_p13 = scmp.ne.s32.totalorder %s15876_s15, 0 }
  0x61   : > { %401 = sbr.rel (%p15880_p13) target bundleno = 3930 (0xf5a), region = 68 }
  0x68   : > { %p15881_p5 = scmp.eq.s32.totalorder %s13220_s25, 0 }
  0x6a   : > { %13091 = dma.done.wait (%p15881_p5), [#allocation4], 9216   ;;  %p15882_p0 = pmov %p15881_p5 }
  0x6c   : > { %13093 = vsyncadd (%p15882_p0), [#allocation4], 4294958080  ;;  %p15883_p6 = pmov %p15882_p0 }
  0x6d   : > { %p15884_p9 = pmov %p15882_p0 }
  0x6e   : > { %13095 = dma.done.wait (%p15883_p6), [#allocation7], 12288  }
  0x6f   : > { %13097 = vsyncadd (%p15884_p9), [#allocation7], 4294955008  ;;  %v13127_v0 = vmov 0.0   ;;  %p451_p12 = scmp.lt.s32.totalorder %s13220_s25, 1  ;;  %v12676_v1 = vld [vmem:[#allocation3 + $0x40] sm:$0xff]   ;;  %v12677_v2 = vld [vmem:[#allocation3 + $0x48] sm:$0xff]   ;;  %v527_v47 = vlaneseq }
  0x70   : > { %489 = vst [vmem:[#allocation2] sm:$0xff] %v13127_v0  ;;  %490 = vst [vmem:[#allocation2 + $0x8] sm:$0xff] %v13127_v0  ;;  %10675 = vmatprep.subr.bf16.mxu0 %v12676_v1  ;;  %12211 = vmatprep.subr.bf16.mxu1 %v12676_v1  ;;  %v12678_v3 = vld [vmem:[#allocation3 + $0x50] sm:$0xff]   ;;  %v12679_v4 = vld [vmem:[#allocation3 + $0x58] sm:$0xff]   ;;  %vm13128_vm1 = vmmov 1   ;;  %s448_s20 = sand.u32 1, %s13108_s22  }
  0x71   : > { %491 = vst [vmem:[#allocation2 + $0x10] sm:$0x1] %v13127_v0  ;;  %492 = vst [vmem:[#allocation2 + $0x111] sm:$0xff] %v13127_v0  ;;  %s452_s15 = scalar_select %p451_p12, %s13220_s25, 1  ;;  %10676 = vmatpush3.bf16.msra.mxu0 %v12676_v1  ;;  %12219 = vmatpush3.bf16.msra.mxu1 %v12676_v1  ;;  %v12680_v10 = vld [vmem:[#allocation3 + $0x60] sm:$0xff]   ;;  %v12681_v19 = vld [vmem:[#allocation3 + $0x68] sm:$0xff]  }
  0x72   : > { %493 = vst [vmem:[#allocation2 + $0x119] sm:$0xff] %v13127_v0  ;;  %494 = vst [vmem:[#allocation2 + $0x121] sm:$0x1] %v13127_v0  ;;  %10677 = vmatprep.subr.bf16.mxu0 %v12677_v2  ;;  %12212 = vmatprep.subr.bf16.mxu1 %v12677_v2  ;;  %v12682_v24 = vld [vmem:[#allocation3 + $0x70] sm:$0xff]   ;;  %v12683_v26 = vld [vmem:[#allocation3 + $0x78] sm:$0xff]   ;;  %v13432_v51 = vshrl.u32 %v527_v47, 7 }
  0x73   : > { %s9843_s18 = sshll.u32 %s452_s15, 8  ;;  %v12684_v27 = vld [vmem:[#allocation3] sm:$0xff]   ;;  %v12685_v30 = vld [vmem:[#allocation3 + $0x8] sm:$0xff]   ;;  %v12686_v35 = vld [vmem:[#allocation3 + $0x10] sm:$0xff]   ;;  %s8803_s21 = sshll.u32 %s448_s20, 4 }
  0x74   : > { %s13348_s23 = scalar_lea.vmem %s15778_s0, %s9843_s18  ;;  %v12687_v44 = vld [vmem:[#allocation3 + $0x18] sm:$0xff]   ;;  %v12688_v50 = vld [vmem:[#allocation3 + $0x20] sm:$0xff]   ;;  %15885 = vst [vmem:[#allocation19_spill] sm:$0xff] %v13432_v51  ;;  %v12689_v56 = vld [vmem:[#allocation3 + $0x28] sm:$0xff]   ;;  %v560_v57 = vand.u32 15, %v13432_v51  ;;  %v13442_v58 = vadd.s32 16, %v13432_v51 }
  0x75   : > { %10678 = vmatpush3.bf16.msra.mxu0 %v12677_v2  ;;  %12220 = vmatpush3.bf16.msra.mxu1 %v12677_v2  ;;  %v13351_v7 = vld [vmem:[%s13348_s23] sm:$0xff]  ;;  %v13354_v9 = vld [vmem:[%s13348_s23 + $0x8] sm:$0xff]  ;;  %v13359_v11 = vld [vmem:[%s13348_s23 + $0x10] sm:$0xff]  ;;  %v13445_v60 = vadd.s32 32, %v13432_v51  ;;  %v13457_v2 = vadd.s32 48, %v13432_v51  ;;  %s450_s18 = scalar_lea.vmem [#allocation9], %s8803_s21 }
  0x76   : > { %10679 = vmatprep.subr.bf16.mxu0 %v12678_v3  ;;  %12213 = vmatprep.subr.bf16.mxu1 %v12678_v3  ;;  %495 = vst [vmem:[#allocation2 + $0x11] sm:$0xff] %v13351_v7  ;;  %496 = vst [vmem:[#allocation2 + $0x19] sm:$0xff] %v13354_v9  ;;  %v13362_v12 = vld [vmem:[%s13348_s23 + $0x18] sm:$0xff]  ;;  %v13367_v13 = vld [vmem:[%s13348_s23 + $0x20] sm:$0xff]  ;;  %v753_v28 = vpack.c.bf16 %v13354_v9, %v13351_v7  ;;  %vm624_vm0 = vcmp.gt.s32.totalorder %v560_v57, 0  ;;  %v562_v62 = vand.u32 15, %v13442_v58 }
  0x77   : > { %v720_v5 = vld [vmem:[#allocation2 + $0x1] sm:$0xff]  ;;  %497 = vst [vmem:[#allocation2 + $0x21] sm:$0xff] %v13359_v11  ;;  %498 = vst [vmem:[#allocation2 + $0x29] sm:$0xff] %v13362_v12  ;;  %v13375_v15 = vld [vmem:[%s13348_s23 + $0x30] sm:$0xff]  ;;  %v754_v29 = vpack.c.bf16 %v13362_v12, %v13359_v11  ;;  %v564_v1 = vand.u32 15, %v13445_v60  ;;  %v540_v11 = vadd.s32 96, %v13432_v51 }
  0x78   : > { %v721_v6 = vld [vmem:[#allocation2 + $0x9] sm:$0xff]  ;;  %499 = vst [vmem:[#allocation2 + $0x31] sm:$0xff] %v13367_v13  ;;  %v13378_v16 = vld [vmem:[%s13348_s23 + $0x38] sm:$0xff]  ;;  %501 = vst [vmem:[#allocation2 + $0x41] sm:$0xff] %v13375_v15  ;;  %vm626_vm3 = vcmp.gt.s32.totalorder %v562_v62, 0  ;;  %v566_v12 = vand.u32 15, %v13457_v2 }
  0x79   : > { %v752_v8 = vpack.c.bf16 %v721_v6, %v720_v5  ;;  %10680 = vmatpush3.bf16.msra.mxu0 %v12678_v3  ;;  %v13370_v14 = vld [vmem:[%s13348_s23 + $0x28] sm:$0xff]  ;;  %12221 = vmatpush3.bf16.msra.mxu1 %v12678_v3  ;;  %v13382_v17 = vld [vmem:[%s13348_s23 + $0x40] sm:$0xff]  ;;  %502 = vst [vmem:[#allocation2 + $0x49] sm:$0xff] %v13378_v16  ;;  %v13391_v20 = vld [vmem:[%s13348_s23 + $0x50] sm:$0xff]  ;;  %v756_v41 = vpack.c.bf16 %v13378_v16, %v13375_v15  ;;  %v13129_v3 = vmov 0.0|0.0   ;;  %v536_v6 = vadd.s32 64, %v13432_v51 }
  0x7a   : > { %10681 = vmatprep.subr.bf16.mxu0 %v12679_v4  ;;  %500 = vst [vmem:[#allocation2 + $0x39] sm:$0xff] %v13370_v14  ;;  %12214 = vmatprep.subr.bf16.mxu1 %v12679_v4  ;;  %v13385_v18 = vld [vmem:[%s13348_s23 + $0x48] sm:$0xff]  ;;  %503 = vst [vmem:[#allocation2 + $0x51] sm:$0xff] %v13382_v17  ;;  %v13394_v21 = vld [vmem:[%s13348_s23 + $0x58] sm:$0xff]  ;;  %v755_v40 = vpack.c.bf16 %v13370_v14, %v13367_v13  ;;  %vm628_vm4 = vcmp.gt.s32.totalorder %v564_v1, 0  ;;  %v542_v13 = vadd.s32 112, %v13432_v51 }
  0x7b   : > { %10691 = vmatprep.mubr.bf16.mxu0 %v752_v8  ;;  %504 = vst [vmem:[#allocation2 + $0x59] sm:$0xff] %v13385_v18  ;;  %v13397_v22 = vld [vmem:[%s13348_s23 + $0x60] sm:$0xff]  ;;  %505 = vst [vmem:[#allocation2 + $0x61] sm:$0xff] %v13391_v20  ;;  %v13402_v23 = vld [vmem:[%s13348_s23 + $0x68] sm:$0xff]  ;;  %v757_v53 = vpack.c.bf16 %v13385_v18, %v13382_v17  ;;  %v758_v55 = vpack.c.bf16 %v13394_v21, %v13391_v20  ;;  %v544_v16 = vadd.s32 128, %v13432_v51  ;;  %v568_v20 = vand.u32 15, %v536_v6 }
  0x7c   : > { %506 = vst [vmem:[#allocation2 + $0x69] sm:$0xff] %v13394_v21  ;;  %507 = vst [vmem:[#allocation2 + $0x71] sm:$0xff] %v13397_v22  ;;  %v13406_v25 = vld [vmem:[#allocation2 + $0x2] sm:$0xff]  ;;  %v471_v31 = vld [vmem:[%s13348_s23 + $0x70] sm:$0xff]  ;;  %v759_v61 = vpack.c.bf16 %v13402_v23, %v13397_v22  ;;  %vm13481_vm7 = vcmp.gt.s32.totalorder %v566_v12, 0  ;;  %v15910_v62 = vmov 0 }
  0x7d   : > { %10682 = vmatpush3.bf16.msra.mxu0 %v12679_v4  ;;  %12222 = vmatpush3.bf16.msra.mxu1 %v12679_v4  ;;  %508 = vst [vmem:[#allocation2 + $0x79] sm:$0xff] %v13402_v23  ;;  %4186 = vst [vmem:[#allocation2] sm:$0xff] %v13127_v0  ;;  %v472_v32 = vld [vmem:[%s13348_s23 + $0x78] sm:$0xff]  ;;  %v473_v33 = vld [vmem:[%s13348_s23 + $0x80] sm:$0xff]  ;;  %v572_v23 = vand.u32 15, %v540_v11  ;;  %vm632_vm8 = vcmp.gt.s32.totalorder %v568_v20, 0 }
  0x7e   : > { %10683 = vmatprep.subr.bf16.mxu0 %v12680_v10  ;;  %12215 = vmatprep.subr.bf16.mxu1 %v12680_v10  ;;  %4187 = vst [vmem:[#allocation2 + $0x8] sm:$0x1] %v13127_v0  ;;  %509 = vst [vmem:[#allocation2 + $0x81] sm:$0xff] %v471_v31  ;;  %v474_v34 = vld [vmem:[%s13348_s23 + $0x88] sm:$0xff]  ;;  %v475_v36 = vld [vmem:[%s13348_s23 + $0x90] sm:$0xff]  ;;  %v13560_v1 = vadd.s32 40, %v13432_v51 }
  0x7f   : > { %510 = vst [vmem:[#allocation2 + $0x89] sm:$0xff] %v472_v32  ;;  %511 = vst [vmem:[#allocation2 + $0x91] sm:$0xff] %v473_v33  ;;  %v476_v37 = vld [vmem:[%s13348_s23 + $0x98] sm:$0xff]  ;;  %v477_v38 = vld [vmem:[%s13348_s23 + $0xa0] sm:$0xff]  ;;  %v13497_v32 = vadd.s32 192, %v13432_v51  ;;  %vm13512_vm10 = vcmp.gt.s32.totalorder %v572_v23, 0 }
  0x80   : > { %512 = vst [vmem:[#allocation2 + $0x99] sm:$0xff] %v474_v34  ;;  %513 = vst [vmem:[#allocation2 + $0xa1] sm:$0xff] %v475_v36  ;;  %v478_v39 = vld [vmem:[%s13348_s23 + $0xa8] sm:$0xff]  ;;  %v479_v42 = vld [vmem:[%s13348_s23 + $0xb0] sm:$0xff]  ;;  %v13500_v36 = vadd.s32 208, %v13432_v51  ;;  %v13573_v6 = vadd.s32 56, %v13432_v51 }
  0x81   : > { %10684 = vmatpush3.bf16.msra.mxu0 %v12680_v10  ;;  %12223 = vmatpush3.bf16.msra.mxu1 %v12680_v10  ;;  %514 = vst [vmem:[#allocation2 + $0xa9] sm:$0xff] %v476_v37  ;;  %515 = vst [vmem:[#allocation2 + $0xb1] sm:$0xff] %v477_v38  ;;  %v480_v43 = vld [vmem:[%s13348_s23 + $0xb8] sm:$0xff]  ;;  %v481_v45 = vld [vmem:[%s13348_s23 + $0xc0] sm:$0xff]  ;;  %v538_v10 = vadd.s32 80, %v13432_v51  ;;  %v13503_v37 = vadd.s32 224, %v13432_v51 }
  0x82   : > { %10685 = vmatprep.subr.bf16.mxu0 %v12681_v19  ;;  %12216 = vmatprep.subr.bf16.mxu1 %v12681_v19  ;;  %516 = vst [vmem:[#allocation2 + $0xb9] sm:$0xff] %v478_v39  ;;  %517 = vst [vmem:[#allocation2 + $0xc1] sm:$0xff] %v479_v42  ;;  %v482_v46 = vld [vmem:[%s13348_s23 + $0xc8] sm:$0xff]  ;;  %v483_v48 = vld [vmem:[%s13348_s23 + $0xd0] sm:$0xff]  ;;  %v13506_v38 = vadd.s32 240, %v13432_v51  ;;  %v15943_v11 = vmov 0 }
  0x83   : > { %518 = vst [vmem:[#allocation2 + $0xc9] sm:$0xff] %v480_v43  ;;  %519 = vst [vmem:[#allocation2 + $0xd1] sm:$0xff] %v481_v45  ;;  %v484_v49 = vld [vmem:[%s13348_s23 + $0xd8] sm:$0xff]  ;;  %v485_v52 = vld [vmem:[%s13348_s23 + $0xe0] sm:$0xff]  ;;  %v570_v22 = vand.u32 15, %v538_v10  ;;  %v565_v43 = vand.u32 15, %v13560_v1 }
  0x84   : > { %520 = vst [vmem:[#allocation2 + $0xd9] sm:$0xff] %v482_v46  ;;  %521 = vst [vmem:[#allocation2 + $0xe1] sm:$0xff] %v483_v48  ;;  %v486_v54 = vld [vmem:[%s13348_s23 + $0xe8] sm:$0xff]  ;;  %v12690_v59 = vld [vmem:[#allocation3 + $0x30] sm:$0xff]   ;;  %v15941_v10 = vmov 0  ;;  %s8700_s16 = sshll.u32 %s450_s18, 4  ;;  %s15730_s16 = int_to_ptr.vmem [resolvable:$true] %s8700_s16 }
  0x85   : > { %10686 = vmatpush3.bf16.msra.mxu0 %v12681_v19  ;;  %12224 = vmatpush3.bf16.msra.mxu1 %v12681_v19  ;;  %522 = vst [vmem:[#allocation2 + $0xe9] sm:$0xff] %v484_v49  ;;  %523 = vst [vmem:[#allocation2 + $0xf1] sm:$0xff] %v485_v52  ;;  %v12691_v63 = vld [vmem:[#allocation3 + $0x38] sm:$0xff]   ;;  %v594_v4 = vld [vmem:[#allocation2 + $0x10] sm:$0xff]  ;;  %vm13508_vm9 = vcmp.gt.s32.totalorder %v570_v22, 0  ;;  %v584_v49 = vand.u32 15, %v13497_v32 }
  0x86   : > { %10687 = vmatprep.subr.bf16.mxu0 %v12682_v24  ;;  %12217 = vmatprep.subr.bf16.mxu1 %v12682_v24  ;;  %524 = vst [vmem:[#allocation2 + $0xf9] sm:$0xff] %v486_v54  ;;  %15886 = vst [vmem:[#allocation20_spill] sm:$0xff] %v13442_v58  ;;  %v595_v5 = vld [vmem:[#allocation2 + $0x18] sm:$0xff]  ;;  %v12692_v7 = vld [vmem:[#allocation3 + $0x80] sm:$0xff]   ;;  %v588_v54 = vand.u32 15, %v13503_v37  ;;  %s9844_s14 = sshll.u32 %s13220_s25, 8 }
  0x87   : > { %15887 = vst [vmem:[#allocation21_spill] sm:$0xff] %v13445_v60  ;;  %vm13451_vm2 = vmpackc.low %vm13128_vm1, %vm624_vm0  ;;  %v596_v8 = vld [vmem:[#allocation2 + $0x20] sm:$0xff]  ;;  %v597_v9 = vld [vmem:[#allocation2 + $0x28] sm:$0xff]  ;;  %v13471_v15 = vpack.c.bf16 %v595_v5, %v594_v4  ;;  %v15914_v5 = vmov 0  ;;  %s16080_s27 = sld [smem:[#allocation36_spill]]  ;;  %s15737_s29 = scalar_lea.sflag [#allocation5], %s448_s20 }
  0x88   : > { %15890 = vst [vmem:[#allocation22_spill] sm:$0xff] %v13457_v2  ;;  %vm13467_vm5 = vmpackc.low %vm13128_vm1, %vm626_vm3  ;;  %v13479_v18 = vpack.c.bf16 %v597_v9, %v596_v8  ;;  %v12693_v19 = vld [vmem:[#allocation3 + $0x88] sm:$0xff]   ;;  %v599_v31 = vld [vmem:[#allocation2 + $0x38] sm:$0xff]  ;;  %v13582_v9 = vadd.s32 88, %v13432_v51  ;;  %s13046_s25 = scalar_lea.vmem %s15730_s16, 256  ;;  %p16081_p1 = scmp.ne.s32.totalorder %s15873_s13, 0 }
  0x89   : > { %10688 = vmatpush3.bf16.msra.mxu0 %v12682_v24  ;;  %12225 = vmatpush3.bf16.msra.mxu1 %v12682_v24  ;;  %vm13475_vm6 = vmpackc.low %vm13128_vm1, %vm628_vm4  ;;  %v574_v24 = vand.u32 15, %v542_v13  ;;  %v600_v33 = vld [vmem:[#allocation2 + $0x40] sm:$0xff]  ;;  %v601_v34 = vld [vmem:[#allocation2 + $0x48] sm:$0xff]  ;;  %15913 = vst [vmem:[#allocation25_spill] sm:$0xff] %v13560_v1  ;;  %p13047_p10 = scmp.ne.s32.totalorder %s15730_s16, %s13046_s25  ;;  %s13131_s19 = smov [#allocation9]  }
  0x8a   : > { %10689 = vmatprep.subr.bf16.mxu0 %v12683_v26  ;;  %12218 = vmatprep.subr.bf16.mxu1 %v12683_v26  ;;  %vm13529_vm13 = vmpackc.low %vm13128_vm1, %vm13481_vm7  ;;  %v13533_v46 = vpack.c.bf16 %v601_v34, %v600_v33  ;;  %v12695_v52 = vld [vmem:[#allocation3 + $0x98] sm:$0xff]   ;;  %v487_v57 = vld [vmem:[%s13348_s23 + $0xf0] sm:$0xff]  ;;  %15916 = vst [vmem:[#allocation26_spill] sm:$0xff] %v13573_v6  ;;  %v15929_v34 = vmov 0  ;;  %s13050_s26 = sshll.u32 %s13131_s19, 4  ;;  %s13051_s26 = int_to_ptr.vmem [resolvable:$false] %s13050_s26 }
  0x8b   : > { %vm13516_vm11 = vcmp.gt.s32.totalorder %v574_v24, 0  ;;  %vm13538_vm14 = vmpackc.low %vm13128_vm1, %vm632_vm8  ;;  %525 = vst [vmem:[#allocation2 + $0x101] sm:$0xff] %v487_v57  ;;  %v605_v4 = vld [vmem:[#allocation2 + $0x68] sm:$0xff]  ;;  %v12697_v20 = vld [vmem:[#allocation3 + $0xa8] sm:$0xff]   ;;  %p13048_p2 = pnand %p13047_p10, %p16081_p1  ;;  %s13052_s17 = scalar_lea.vmem %s13051_s26, 512 }
  0x8c   : > { %vm13552_vm15 = vmpackc.low %vm13128_vm1, %vm13508_vm9  ;;  %v12696_v8 = vld [vmem:[#allocation3 + $0xa0] sm:$0xff]   ;;  %v606_v22 = vld [vmem:[#allocation2 + $0x70] sm:$0xff]  ;;  %p13053_p4 = scmp.lt.s32.totalorder %s15730_s16, %s13051_s26  ;;  %p13054_p7 = scmp.lt.s32.totalorder %s13052_s17, %s13046_s25 }
  0x8d   : > { %10690 = vmatpush3.bf16.msra.mxu0 %v12683_v26  ;;  %12226 = vmatpush3.bf16.msra.mxu1 %v12683_v26  ;;  %v598_v26 = vld [vmem:[#allocation2 + $0x30] sm:$0xff]  ;;  %v15911_v62 = vsel %vm13552_vm15, 4294967295, %v15910_v62  ;;  %vm13568_vm0 = vmpackc.low %vm13128_vm1, %vm13512_vm10  ;;  %v607_v23 = vld [vmem:[#allocation2 + $0x78] sm:$0xff]  ;;  %vm13622_vm10 = vcmp.gt.s32.totalorder %v584_v49, 0  ;;  %s15735_s28 = scalar_lea.hbm %s16080_s27, %s9844_s14  ;;  %p13049_p3 = pneg %p13048_p2 }
  0x8e   : > { %10723 = vmatprep.subr.bf16.mxu0 %v12684_v27  ;;  %v13520_v42 = vpack.c.bf16 %v599_v31, %v598_v26  ;;  %v15915_v5 = vsel %vm13568_vm0, 4294967295, %v15914_v5  ;;  %vm13599_vm7 = vmpackc.low %vm13128_vm1, %vm13516_vm11  ;;  %v608_v24 = vld [vmem:[#allocation2 + $0x80] sm:$0xff]  ;;  %v609_v26 = vld [vmem:[#allocation2 + $0x88] sm:$0xff]  ;;  %v13626_v31 = vpack.c.bf16 %v607_v23, %v606_v22  ;;  %p13055_p8 = por %p13054_p7, %p13053_p4 }
  0x8f   : > { %v12699_v32 = vld [vmem:[#allocation3 + $0xb8] sm:$0xff]   ;;  %v13628_v33 = vpack.c.bf16 %v609_v26, %v608_v24  ;;  %v611_v37 = vld [vmem:[#allocation2 + $0x98] sm:$0xff]  ;;  %v621_v22 = vld [vmem:[#allocation2 + $0xe8] sm:$0xff] }
  0x90   : > { %10692 = vmatmul.mubr.bf16.vlgmr.msra.gmra.mrb[0].mxu0 %v753_v28  ;;  %v546_v28 = vadd.s32 144, %v13432_v51  ;;  %v612_v39 = vld [vmem:[#allocation2 + $0xa0] sm:$0xff]  ;;  %v615_v57 = vld [vmem:[#allocation2 + $0xb8] sm:$0xff]  ;;  %v2564_v14 = vld [vmem:[#allocation2 + $0x68] sm:$0xff]  ;;  %p13056_p11 = pnand %p13055_p8, %p13049_p3 }
  0x91   : > { %10724 = vmatpush3.bf16.msra.mxu0 %v12684_v27  ;;  %10695 = vmatprep.mubr.bf16.mxu0 %v754_v29  ;;  %v576_v27 = vand.u32 15, %v544_v16  ;;  %v548_v29 = vadd.s32 160, %v13432_v51  ;;  %v15921_v16 = vmov 0  ;;  %v12703_v2 = vld [vmem:[#allocation3 + $0xd8] sm:$0xff]   ;;  %v1213_v1 = vld [vmem:[#allocation2 + $0x52] sm:$0xff] }
  0x92   : > { %10725 = vmatprep.subr.bf16.mxu0 %v12685_v30  ;;  %v15922_v16 = vsel %vm13599_vm7, 4294967295, %v15921_v16  ;;  %v1214_v60 = vld [vmem:[#allocation2 + $0x5a] sm:$0xff]  ;;  %v2565_v17 = vld [vmem:[#allocation2 + $0x70] sm:$0xff] }
  0x93   : > { %vm13522_vm12 = vcmp.gt.s32.totalorder %v576_v27, 0  ;;  %v580_v47 = vand.u32 15, %v548_v29  ;;  %v12698_v27 = vld [vmem:[#allocation3 + $0xb0] sm:$0xff]   ;;  %v571_v29 = vand.u32 15, %v13582_v9  ;;  %v15947_v9 = vmov 0  ;;  %v2569_v45 = vld [vmem:[#allocation2 + $0x90] sm:$0xff] }
  0x94   : > { %vm13606_vm8 = vmpackc.low %vm13128_vm1, %vm13522_vm12  ;;  %v1218_v58 = vld [vmem:[#allocation2 + $0x7a] sm:$0xff] }
  0x95   : > { %10726 = vmatpush3.bf16.msra.mxu0 %v12685_v30  ;;  %v13491_v30 = vadd.s32 176, %v13432_v51  ;;  %vm13588_vm4 = vcmp.gt.s32.totalorder %v580_v47, 0  ;;  %v1207_v47 = vld [vmem:[#allocation2 + $0x22] sm:$0xff]  ;;  %v2562_v0 = vld [vmem:[#allocation2 + $0x58] sm:$0xff] }
  0x96   : > { %10727 = vmatprep.subr.bf16.mxu0 %v12686_v35  ;;  %vm13640_vm12 = vmpackc.low %vm13128_vm1, %vm13588_vm4  ;;  %vm13657_vm4 = vcmp.gt.s32.totalorder %v588_v54, 0  ;;  %v614_v54 = vld [vmem:[#allocation2 + $0xb0] sm:$0xff] }
  0x97   : > { %v582_v48 = vand.u32 15, %v13491_v30  ;;  %v488_v30 = vld [vmem:[%s13348_s23 + $0xf8] sm:$0xff] }
  0x98   : > { %10696 = vmatmul.mubr.bf16.gmra.mrb[4].mxu0 %v755_v40  ;;  %v613_v40 = vld [vmem:[#allocation2 + $0xa8] sm:$0xff]  ;;  %526 = vst [vmem:[#allocation2 + $0x109] sm:$0xff] %v488_v30  ;;  %v1209_v30 = vld [vmem:[#allocation2 + $0x32] sm:$0xff] }
  0x99   : > { %10728 = vmatpush3.bf16.msra.mxu0 %v12686_v35  ;;  %10699 = vmatprep.mubr.bf16.mxu0 %v756_v41  ;;  %v12694_v35 = vld [vmem:[#allocation3 + $0x90] sm:$0xff]   ;;  %vm13618_vm9 = vcmp.gt.s32.totalorder %v582_v48, 0  ;;  %v13647_v41 = vld [vmem:[#allocation3 + $0xc0] sm:$0xff]   ;;  %v13663_v49 = vpack.c.bf16 %v613_v40, %v612_v39  ;;  %v541_v40 = vadd.s32 104, %v13432_v51 }
  0x9a   : > { %10729 = vmatprep.subr.bf16.mxu0 %v12687_v44 }
  0x9d   : > { %10730 = vmatpush3.bf16.msra.mxu0 %v12687_v44  ;;  %v578_v44 = vand.u32 15, %v546_v28 }
  0x9e   : > { %10731 = vmatprep.subr.bf16.mxu0 %v12688_v50 }
  0x9f   : > { %vm13584_vm3 = vcmp.gt.s32.totalorder %v578_v44, 0  ;;  %v1205_v44 = vld [vmem:[#allocation2 + $0x12] sm:$0xff] }
  0xa0   : > { %10700 = vmatmul.mubr.bf16.gmra.mrb[8].mxu0 %v757_v53  ;;  %v586_v53 = vand.u32 15, %v13500_v36  ;;  %vm13633_vm11 = vmpackc.low %vm13128_vm1, %vm13584_vm3  ;;  %v610_v36 = vld [vmem:[#allocation2 + $0x90] sm:$0xff] }
  0xa1   : > { %10732 = vmatpush3.bf16.msra.mxu0 %v12688_v50  ;;  %10703 = vmatprep.mubr.bf16.mxu0 %v758_v55  ;;  %v15907_v50 = vmov 0  ;;  %v590_v55 = vand.u32 15, %v13506_v38  ;;  %v15930_v34 = vsel %vm13633_vm11, 4294967295, %v15929_v34  ;;  %v13661_v48 = vpack.c.bf16 %v611_v37, %v610_v36  ;;  %v618_v38 = vld [vmem:[#allocation2 + $0xd0] sm:$0xff]  ;;  %v623_v36 = vld [vmem:[#allocation2 + $0xf8] sm:$0xff] }
  0xa2   : > { %10733 = vmatprep.subr.bf16.mxu0 %v12689_v56  ;;  %v15908_v50 = vsel %vm13538_vm14, 4294967295, %v15907_v50  ;;  %vm13653_vm3 = vcmp.gt.s32.totalorder %v586_v53, 0  ;;  %v15939_v53 = vmov 0 }
  0xa5   : > { %10734 = vmatpush3.bf16.msra.mxu0 %v12689_v56  ;;  %v13546_v56 = vadd.s32 8, %v13432_v51 }
  0xa6   : > { %10735 = vmatprep.subr.bf16.mxu0 %v12690_v59 }
  0xa7   : > { %15909 = vst [vmem:[#allocation23_spill] sm:$0xff] %v13546_v56  ;;  %v561_v21 = vand.u32 15, %v13546_v56  ;;  %v559_v56 = vadd.s32 248, %v13432_v51 }
  0xa8   : > { %10704 = vmatmul.mubr.bf16.gmra.mrb[12].mxu0 %v759_v61  ;;  %v603_v61 = vld [vmem:[#allocation2 + $0x58] sm:$0xff] }
  0xa9   : > { %10736 = vmatpush3.bf16.msra.mxu0 %v12690_v59  ;;  %10739 = vmatprep.mubr.msk.bf16.mxu0 %vm13451_vm2, %v13129_v3  ;;  %v602_v59 = vld [vmem:[#allocation2 + $0x50] sm:$0xff]  ;;  %v604_v3 = vld [vmem:[#allocation2 + $0x60] sm:$0xff] }
  0xaa   : > { %10737 = vmatprep.subr.bf16.mxu0 %v12691_v63  ;;  %v13592_v12 = vpack.c.bf16 %v603_v61, %v602_v59  ;;  %v13594_v13 = vpack.c.bf16 %v605_v4, %v604_v3  ;;  %v616_v59 = vld [vmem:[#allocation2 + $0xc0] sm:$0xff]  ;;  %v617_v61 = vld [vmem:[#allocation2 + $0xc8] sm:$0xff]  ;;  %v567_v3 = vand.u32 15, %v13573_v6  ;;  %v13689_v4 = vpack.c.bf16 %v615_v57, %v614_v54 }
  0xab   : > { %v545_v57 = vadd.s32 136, %v13432_v51 }
  0xad   : > { %10738 = vmatpush3.bf16.msra.mxu0 %v12691_v63  ;;  %v13557_v63 = vadd.s32 24, %v13432_v51 }
  0xae   : > { %10771 = vmatprep.subr.bf16.mxu0 %v12692_v7 }
  0xaf   : > { %15912 = vst [vmem:[#allocation24_spill] sm:$0xff] %v13557_v63  ;;  %v563_v28 = vand.u32 15, %v13557_v63 }
  0xb0   : > { %10740 = vmatmul.mubr.msk.bf16.vlgmr.msra.gmra.mrb[0].mxu0 %vm13467_vm5, %v13471_v15 }
  0xb1   : > { %10772 = vmatpush3.bf16.msra.mxu0 %v12692_v7  ;;  %10743 = vmatprep.mubr.msk.bf16.mxu0 %vm13475_vm6, %v13479_v18  ;;  %v13576_v7 = vadd.s32 72, %v13432_v51 }
  0xb2   : > { %10773 = vmatprep.subr.bf16.mxu0 %v12693_v19 }
  0xb3   : > { %v569_v23 = vand.u32 15, %v13576_v7  ;;  %v622_v7 = vld [vmem:[#allocation2 + $0xf0] sm:$0xff] }
  0xb4   : > { %v13733_v37 = vpack.c.bf16 %v623_v36, %v622_v7  ;;  %v1210_v7 = vld [vmem:[#allocation2 + $0x3a] sm:$0xff] }
  0xb5   : > { %10774 = vmatpush3.bf16.msra.mxu0 %v12693_v19  ;;  %v15923_v19 = vmov 0  ;;  %v13803_v6 = vpack.c.bf16 %v1210_v7, %v1209_v30  ;;  %v15973_v30 = vmov 0  ;;  %v12704_v7 = vld [vmem:[#allocation3 + $0xe0] sm:$0xff]  }
  0xb6   : > { %10775 = vmatprep.subr.bf16.mxu0 %v12694_v35  ;;  %v15924_v19 = vsel %vm13606_vm8, 4294967295, %v15923_v19 }
  0xb8   : > { %10744 = vmatmul.mubr.msk.bf16.gmra.mrb[4].mxu0 %vm13529_vm13, %v13520_v42 }
  0xb9   : > { %10747 = vmatprep.mubr.msk.bf16.mxu0 %vm13538_vm14, %v13533_v46  ;;  %10776 = vmatpush3.bf16.msra.mxu0 %v12694_v35  ;;  %v15931_v35 = vmov 0 }
  0xba   : > { %10777 = vmatprep.subr.bf16.mxu0 %v12695_v52  ;;  %v15932_v35 = vsel %vm13640_vm12, 4294967295, %v15931_v35 }
  0xbd   : > { %10778 = vmatpush3.bf16.msra.mxu0 %v12695_v52  ;;  %v15937_v52 = vmov 0 }
  0xbe   : > { %10779 = vmatprep.subr.bf16.mxu0 %v12696_v8 }
  0xc0   : > { %10748 = vmatmul.mubr.msk.bf16.gmra.mrb[8].mxu0 %vm13552_vm15, %v13592_v12 }
  0xc1   : > { %10751 = vmatprep.mubr.msk.bf16.mxu0 %vm13568_vm0, %v13594_v13  ;;  %10780 = vmatpush3.bf16.msra.mxu0 %v12696_v8  ;;  %v13691_v8 = vpack.c.bf16 %v617_v61, %v616_v59  ;;  %v1208_v59 = vld [vmem:[#allocation2 + $0x2a] sm:$0xff]  ;;  %v15955_v61 = vmov 0 }
  0xc2   : > { %10781 = vmatprep.subr.bf16.mxu0 %v12697_v20 }
  0xc5   : > { %10782 = vmatpush3.bf16.msra.mxu0 %v12697_v20  ;;  %v620_v20 = vld [vmem:[#allocation2 + $0xe0] sm:$0xff] }
  0xc6   : > { %10783 = vmatprep.subr.bf16.mxu0 %v12698_v27  ;;  %v13716_v26 = vpack.c.bf16 %v621_v22, %v620_v20  ;;  %v12701_v22 = vld [vmem:[#allocation3 + $0xc8] sm:$0xff]  }
  0xc8   : > { %10752 = vmatmul.mubr.msk.bf16.gmra.mrb[12].mxu0 %vm13599_vm7, %v13626_v31  ;;  %vm13668_vm7 = vmpackc.low %vm13128_vm1, %vm13618_vm9  ;;  %vm654_vm9 = vcmp.gt.s32.totalorder %v590_v55, 0  ;;  %v619_v55 = vld [vmem:[#allocation2 + $0xd8] sm:$0xff] }
  0xc9   : > { %10755 = vmatprep.mubr.msk.bf16.mxu0 %vm13606_vm8, %v13628_v33  ;;  %10784 = vmatpush3.bf16.msra.mxu0 %v12698_v27  ;;  %v15938_v52 = vsel %vm13668_vm7, 4294967295, %v15937_v52  ;;  %vm13675_vm8 = vmpackc.low %vm13128_vm1, %vm13622_vm10  ;;  %v13714_v24 = vpack.c.bf16 %v619_v55, %v618_v38  ;;  %v15945_v27 = vmov 0  ;;  %v547_v38 = vadd.s32 152, %v13432_v51 }
  0xca   : > { %10785 = vmatprep.subr.bf16.mxu0 %v12699_v32  ;;  %v15940_v53 = vsel %vm13675_vm8, 4294967295, %v15939_v53  ;;  %vm13696_vm10 = vmpackc.low %vm13128_vm1, %vm13653_vm3  ;;  %v549_v55 = vadd.s32 168, %v13432_v51 }
  0xcb   : > { %v15942_v10 = vsel %vm13696_vm10, 4294967295, %v15941_v10  ;;  %vm13719_vm3 = vmpackc.low %vm13128_vm1, %vm654_vm9  ;;  %vm1238_vm9 = vcmp.lt.s32.totalorder %v563_v28, 15  ;;  %v15949_v28 = vmov 0  ;;  %v579_v54 = vand.u32 15, %v547_v38  ;;  %v1216_v38 = vld [vmem:[#allocation2 + $0x6a] sm:$0xff] }
  0xcc   : > { %v15946_v27 = vsel %vm13719_vm3, 4294967295, %v15945_v27 }
  0xcd   : > { %10786 = vmatpush3.bf16.msra.mxu0 %v12699_v32  ;;  %v1204_v32 = vld [vmem:[#allocation2 + $0xa] sm:$0xff] }
  0xce   : > { %10819 = vmatprep.subr.bf16.mxu0 %v13647_v41  ;;  %v8879_v39 = vpack.c.bf16 %v1204_v32, %v13406_v25  ;;  %v15957_v32 = vmov 0 }
  0xd0   : > { %10756 = vmatmul.mubr.msk.bf16.gmra.mrb[16].mxu0 %vm13633_vm11, %v13661_v48  ;;  %vm13703_vm11 = vmpackc.low %vm13128_vm1, %vm13657_vm4  ;;  %vm1236_vm4 = vcmp.lt.s32.totalorder %v561_v21, 15  ;;  %v1206_v21 = vld [vmem:[#allocation2 + $0x1a] sm:$0xff] }
  0xd1   : > { %10759 = vmatprep.mubr.msk.bf16.mxu0 %vm13640_vm12, %v13663_v49  ;;  %v15944_v11 = vsel %vm13703_vm11, 4294967295, %v15943_v11  ;;  %v13769_v20 = vpack.c.bf16 %v1206_v21, %v1205_v44  ;;  %v1212_v44 = vld [vmem:[#allocation2 + $0x4a] sm:$0xff]  ;;  %v15961_v21 = vmov 0 }
  0xd8   : > { %10760 = vmatmul.mubr.msk.bf16.gmra.mrb[20].mxu0 %vm13668_vm7, %v13689_v4  ;;  %vm13754_vm7 = vcmp.lt.s32.totalorder %v569_v23, 15  ;;  %v13771_v23 = vpack.c.bf16 %v1208_v59, %v1207_v47  ;;  %v577_v47 = vand.u32 15, %v545_v57  ;;  %v551_v59 = vadd.s32 184, %v13432_v51 }
  0xd9   : > { %10763 = vmatprep.mubr.msk.bf16.mxu0 %vm13675_vm8, %v13691_v8  ;;  %vm13736_vm8 = vmpackc.low %vm1236_vm4, %vm13128_vm1  ;;  %vm13750_vm4 = vcmp.lt.s32.totalorder %v567_v3, 15  ;;  %v573_v3 = vand.u32 15, %v541_v40  ;;  %v1211_v40 = vld [vmem:[#allocation2 + $0x42] sm:$0xff]  ;;  %v15966_v57 = vmov 0 }
  0xda   : > { %v15948_v9 = vsel %vm13736_vm8, 4294967295, %v15947_v9  ;;  %v13805_v25 = vpack.c.bf16 %v1212_v44, %v1211_v40  ;;  %v583_v36 = vand.u32 15, %v551_v59  ;;  %v555_v40 = vadd.s32 216, %v13432_v51  ;;  %v1223_v44 = vld [vmem:[#allocation2 + $0xa2] sm:$0xff] }
  0xdb   : > { %v15979_v59 = vmov 0 }
  0xe0   : > { %10764 = vmatmul.mubr.msk.bf16.gmra.mrb[24].mxu0 %vm13696_vm10, %v13714_v24  ;;  %vm1240_vm10 = vcmp.lt.s32.totalorder %v565_v43, 15  ;;  %v543_v43 = vadd.s32 120, %v13432_v51 }
  0xe1   : > { %10767 = vmatprep.mubr.msk.bf16.mxu0 %vm13703_vm11, %v13716_v26  ;;  %vm13746_vm11 = vmpackc.low %vm1238_vm9, %vm13128_vm1 }
  0xe2   : > { %v15950_v28 = vsel %vm13746_vm11, 4294967295, %v15949_v28  ;;  %vm13763_vm9 = vmpackc.low %vm1240_vm10, %vm13128_vm1 }
  0xe3   : > { %v15956_v61 = vsel %vm13763_vm9, 4294967295, %v15955_v61  ;;  %vm13779_vm10 = vmpackc.low %vm13750_vm4, %vm13128_vm1 }
  0xe4   : > { %v15958_v32 = vsel %vm13779_vm10, 4294967295, %v15957_v32  ;;  %vm13794_vm4 = vmpackc.low %vm13754_vm7, %vm13128_vm1 }
  0xe5   : > { %v15962_v21 = vsel %vm13794_vm4, 4294967295, %v15961_v21 }
  0xe6   : > { %15963 = vst [vmem:[#allocation27_spill] sm:$0xff] %v15962_v21  ;;  %v12707_v21 = vld [vmem:[#allocation3 + $0xf8] sm:$0xff]  }
  0xe8   : > { %10768 = vmatmul.mubr.msk.bf16.gmra.mrb[28].mxu0 %vm13719_vm3, %v13733_v37  ;;  %vm13821_vm3 = vcmp.lt.s32.totalorder %v577_v47, 15 }
  0xe9   : > { %10787 = vmatprep.mubr.msk.bf16.mxu0 %vm13736_vm8, %v8879_v39  ;;  %vm13783_vm8 = vcmp.lt.s32.totalorder %v571_v29, 15  ;;  %v575_v39 = vand.u32 15, %v543_v43  ;;  %v12702_v43 = vld [vmem:[#allocation3 + $0xd0] sm:$0xff]   ;;  %v13845_v29 = vpack.c.bf16 %v1214_v60, %v1213_v1  ;;  %v1219_v60 = vld [vmem:[#allocation2 + $0x82] sm:$0xff]  ;;  %v1220_v1 = vld [vmem:[#allocation2 + $0x8a] sm:$0xff] }
  0xea   : > { %vm13813_vm7 = vmpackc.low %vm13783_vm8, %vm13128_vm1 }
  0xeb   : > { %v15967_v57 = vsel %vm13813_vm7, 4294967295, %v15966_v57  ;;  %vm13862_vm12 = vmpackc.low %vm13821_vm3, %vm13128_vm1 }
  0xec   : > { %15968 = vst [vmem:[#allocation28_spill] sm:$0xff] %v15967_v57  ;;  %v591_v57 = vand.u32 15, %v559_v56  ;;  %v1231_v56 = vld [vmem:[#allocation2 + $0xe2] sm:$0xff] }
  0xf0   : > { %10788 = vmatmul.mubr.msk.bf16.vlgmr.msra.gmra.mrb[0].mxu0 %vm13746_vm11, %v13769_v20  ;;  %vm13798_vm11 = vcmp.lt.s32.totalorder %v573_v3, 15  ;;  %v1215_v3 = vld [vmem:[#allocation2 + $0x62] sm:$0xff] }
  0xf1   : > { %10820 = vmatpush3.bf16.msra.mxu0 %v13647_v41  ;;  %10791 = vmatprep.mubr.msk.bf16.mxu0 %vm13763_vm9, %v13771_v23  ;;  %v581_v41 = vand.u32 15, %v549_v55  ;;  %vm13817_vm9 = vcmp.lt.s32.totalorder %v575_v39, 15  ;;  %vm13831_vm8 = vmpackc.low %vm13798_vm11, %vm13128_vm1  ;;  %v553_v39 = vadd.s32 200, %v13432_v51  ;;  %v13847_v63 = vpack.c.bf16 %v1216_v38, %v1215_v3  ;;  %v12706_v55 = vld [vmem:[#allocation3 + $0xf0] sm:$0xff]  }
  0xf2   : > { %10821 = vmatprep.subr.bf16.mxu0 %v12701_v22  ;;  %v15974_v30 = vsel %vm13831_vm8, 4294967295, %v15973_v30  ;;  %vm13852_vm11 = vmpackc.low %vm13817_vm9, %vm13128_vm1  ;;  %v587_v38 = vand.u32 15, %v555_v40  ;;  %vm13871_vm9 = vcmp.lt.s32.totalorder %v583_v36, 15  ;;  %v15986_v40 = vmov 0  ;;  %v1221_v36 = vld [vmem:[#allocation2 + $0x92] sm:$0xff] }
  0xf3   : > { %v15980_v59 = vsel %vm13852_vm11, 4294967295, %v15979_v59  ;;  %v585_v3 = vand.u32 15, %v553_v39  ;;  %v13877_v39 = vpack.c.bf16 %v1220_v1, %v1219_v60  ;;  %v12708_v1 = vld [vmem:[#allocation3 + $0x100] sm:$0xff]  }
  0xf5   : > { %10822 = vmatpush3.bf16.msra.mxu0 %v12701_v22 }
  0xf6   : > { %10823 = vmatprep.subr.bf16.mxu0 %v12702_v43 }
  0xf8   : > { %10792 = vmatmul.mubr.msk.bf16.gmra.mrb[4].mxu0 %vm13779_vm10, %v13803_v6  ;;  %vm13837_vm10 = vcmp.lt.s32.totalorder %v579_v54, 15  ;;  %v1217_v54 = vld [vmem:[#allocation2 + $0x72] sm:$0xff] }
  0xf9   : > { %10795 = vmatprep.mubr.msk.bf16.mxu0 %vm13794_vm4, %v13805_v25  ;;  %10824 = vmatpush3.bf16.msra.mxu0 %v12702_v43  ;;  %vm13841_vm4 = vcmp.lt.s32.totalorder %v581_v41, 15  ;;  %v12705_v43 = vld [vmem:[#allocation3 + $0xe8] sm:$0xff]   ;;  %v15981_v41 = vmov 0  ;;  %v13875_v22 = vpack.c.bf16 %v1218_v58, %v1217_v54  ;;  %vm13882_vm3 = vmpackc.low %vm13837_vm10, %vm13128_vm1  ;;  %v15991_v58 = vmov 0  ;;  %v1222_v54 = vld [vmem:[#allocation2 + $0x9a] sm:$0xff] }
  0xfa   : > { %10825 = vmatprep.subr.bf16.mxu0 %v12703_v2  ;;  %v15982_v41 = vsel %vm13862_vm12, 4294967295, %v15981_v41  ;;  %v15987_v40 = vsel %vm13882_vm3, 4294967295, %v15986_v40  ;;  %vm13903_vm10 = vcmp.lt.s32.totalorder %v587_v38, 15  ;;  %v1227_v38 = vld [vmem:[#allocation2 + $0xc2] sm:$0xff] }
  0xfb   : > { %15983 = vst [vmem:[#allocation29_spill] sm:$0xff] %v15982_v41  ;;  %15988 = vst [vmem:[#allocation30_spill] sm:$0xff] %v15987_v40  ;;  %v1225_v41 = vld [vmem:[#allocation2 + $0xb2] sm:$0xff]  ;;  %v1230_v40 = vld [vmem:[#allocation2 + $0xda] sm:$0xff] }
  0xfd   : > { %10826 = vmatpush3.bf16.msra.mxu0 %v12703_v2  ;;  %v557_v2 = vadd.s32 232, %v13432_v51 }
  0xfe   : > { %10827 = vmatprep.subr.bf16.mxu0 %v12704_v7 }
  0xff   : > { %v589_v60 = vand.u32 15, %v557_v2  ;;  %v15995_v2 = vmov 0 }
 0x100   : > { %10796 = vmatmul.mubr.msk.bf16.gmra.mrb[8].mxu0 %vm13813_vm7, %v13845_v29  ;;  %vm13893_vm7 = vmpackc.low %vm13841_vm4, %vm13128_vm1 }
 0x101   : > { %10799 = vmatprep.mubr.msk.bf16.mxu0 %vm13831_vm8, %v13847_v63  ;;  %10828 = vmatpush3.bf16.msra.mxu0 %v12704_v7  ;;  %vm13886_vm8 = vcmp.lt.s32.totalorder %v585_v3, 15  ;;  %v15992_v58 = vsel %vm13893_vm7, 4294967295, %v15991_v58  ;;  %v13907_v3 = vpack.c.bf16 %v1222_v54, %v1221_v36  ;;  %vm13914_vm4 = vmpackc.low %vm13871_vm9, %vm13128_vm1  ;;  %v1228_v36 = vld [vmem:[#allocation2 + $0xca] sm:$0xff]  ;;  %vm1264_vm9 = vcmp.lt.s32.totalorder %v589_v60, 15  ;;  %v1229_v7 = vld [vmem:[#allocation2 + $0xd2] sm:$0xff] }
 0x102   : > { %10829 = vmatprep.subr.bf16.mxu0 %v12705_v43  ;;  %v15996_v2 = vsel %vm13914_vm4, 4294967295, %v15995_v2  ;;  %v1232_v60 = vld [vmem:[#allocation2 + $0xea] sm:$0xff]  ;;  %v13953_v47 = vpack.c.bf16 %v1230_v40, %v1229_v7  ;;  %v12710_v7 = vld [vmem:[#allocation3 + $0x110] sm:$0xff]  }
 0x103   : > { %15997 = vst [vmem:[#allocation31_spill] sm:$0xff] %v15996_v2  ;;  %v1234_v2 = vld [vmem:[#allocation2 + $0xfa] sm:$0xff]  ;;  %v12709_v40 = vld [vmem:[#allocation3 + $0x108] sm:$0xff]  }
 0x105   : > { %10830 = vmatpush3.bf16.msra.mxu0 %v12705_v43  ;;  %v1224_v43 = vld [vmem:[#allocation2 + $0xaa] sm:$0xff] }
 0x106   : > { %10831 = vmatprep.subr.bf16.mxu0 %v12706_v55  ;;  %v13909_v51 = vpack.c.bf16 %v1224_v43, %v1223_v44  ;;  %v13933_v44 = vpack.c.bf16 %v1228_v36, %v1227_v38  ;;  %v1233_v36 = vld [vmem:[#allocation2 + $0xf2] sm:$0xff] }
 0x108   : > { %10800 = vmatmul.mubr.msk.bf16.gmra.mrb[12].mxu0 %vm13852_vm11, %v13875_v22 }
 0x109   : > { %10803 = vmatprep.mubr.msk.bf16.mxu0 %vm13862_vm12, %v13877_v39  ;;  %10832 = vmatpush3.bf16.msra.mxu0 %v12706_v55  ;;  %v1226_v55 = vld [vmem:[#allocation2 + $0xba] sm:$0xff]  ;;  %vm13924_vm12 = vmpackc.low %vm13886_vm8, %vm13128_vm1 }
 0x10a   : > { %10833 = vmatprep.subr.bf16.mxu0 %v12707_v21  ;;  %vm13946_vm8 = vmpackc.low %vm1264_vm9, %vm13128_vm1  ;;  %vm16008_vm9 = vnez %v15930_v34  ;;  %v2585_v34 = vld [vmem:[#allocation2 + $0x110] sm:$0xff] }
 0x10d   : > { %10834 = vmatpush3.bf16.msra.mxu0 %v12707_v21  ;;  %v13931_v21 = vpack.c.bf16 %v1226_v55, %v1225_v41  ;;  %v13955_v55 = vpack.c.bf16 %v1232_v60, %v1231_v56 }
 0x10e   : > { %10867 = vmatprep.subr.bf16.mxu0 %v12708_v1 }
 0x110   : > { %10804 = vmatmul.mubr.msk.bf16.gmra.mrb[16].mxu0 %vm13882_vm3, %v13907_v3  ;;  %vm13938_vm3 = vmpackc.low %vm13903_vm10, %vm13128_vm1 }
 0x111   : > { %10807 = vmatprep.mubr.msk.bf16.mxu0 %vm13893_vm7, %v13909_v51  ;;  %vm1266_vm7 = vcmp.lt.s32.totalorder %v591_v57, 15  ;;  %v13968_v57 = vpack.c.bf16 %v1234_v2, %v1233_v36  ;;  %v12711_v2 = vld [vmem:[#allocation3 + $0x118] sm:$0xff]  }
 0x112   : > { %vm13958_vm10 = vmpackc.low %vm1266_vm7, %vm13128_vm1  ;;  %vm16006_vm1 = vnez %v15922_v16  ;;  %vm16007_vm7 = vnez %v15924_v19  ;;  %v1917_v36 = vld [vmem:[#allocation2 + $0x41] sm:$0xff] }
 0x118   : > { %10808 = vmatmul.mubr.msk.bf16.gmra.mrb[20].mxu0 %vm13914_vm4, %v13931_v21 }
 0x119   : > { %10811 = vmatprep.mubr.msk.bf16.mxu0 %vm13924_vm12, %v13933_v44 }
 0x120   : > { %10812 = vmatmul.mubr.msk.bf16.gmra.mrb[24].mxu0 %vm13938_vm3, %v13953_v47 }
 0x121   : > { %10815 = vmatprep.mubr.msk.bf16.mxu0 %vm13946_vm8, %v13955_v55 }
 0x128   : > { %10816 = vmatmul.mubr.msk.bf16.gmra.mrb[28].mxu0 %vm13958_vm10, %v13968_v57 }
 0x129   : > { %10835 = vmatprep.mubr.msk.bf16.mxu0 %vm13451_vm2, %v13471_v15  ;;  %v12712_v15 = vld [vmem:[#allocation3 + $0x120] sm:$0xff]  }
 0x130   : > { %10836 = vmatmul.mubr.msk.bf16.vlgmr.msra.gmra.mrb[0].mxu0 %vm13467_vm5, %v13479_v18  ;;  %v12713_v18 = vld [vmem:[#allocation3 + $0x128] sm:$0xff]  }
 0x131   : > { %10868 = vmatpush3.bf16.msra.mxu0 %v12708_v1  ;;  %10839 = vmatprep.mubr.msk.bf16.mxu0 %vm13475_vm6, %v13520_v42  ;;  %v12714_v42 = vld [vmem:[#allocation3 + $0x130] sm:$0xff]  }
 0x132   : > { %10869 = vmatprep.subr.bf16.mxu0 %v12709_v40  ;;  %v1915_v1 = vld [vmem:[#allocation2 + $0x31] sm:$0xff] }
 0x135   : > { %10870 = vmatpush3.bf16.msra.mxu0 %v12709_v40  ;;  %v1918_v40 = vld [vmem:[#allocation2 + $0x49] sm:$0xff] }
 0x136   : > { %10871 = vmatprep.subr.bf16.mxu0 %v12710_v7 }
 0x138   : > { %10840 = vmatmul.mubr.msk.bf16.gmra.mrb[4].mxu0 %vm13529_vm13, %v13533_v46  ;;  %v12715_v46 = vld [vmem:[#allocation3 + $0x138] sm:$0xff]  }
 0x139   : > { %10843 = vmatprep.mubr.msk.bf16.mxu0 %vm13538_vm14, %v13592_v12  ;;  %10872 = vmatpush3.bf16.msra.mxu0 %v12710_v7  ;;  %v12716_v12 = vld [vmem:[#allocation3 + $0x140] sm:$0xff]   ;;  %vm16013_vm14 = vnez %v15944_v11  ;;  %v1919_v7 = vld [vmem:[#allocation2 + $0x51] sm:$0xff] }
 0x13a   : > { %10873 = vmatprep.subr.bf16.mxu0 %v12711_v2 }
 0x13d   : > { %10874 = vmatpush3.bf16.msra.mxu0 %v12711_v2  ;;  %v1920_v2 = vld [vmem:[#allocation2 + $0x59] sm:$0xff] }
 0x13e   : > { %10875 = vmatprep.subr.bf16.mxu0 %v12712_v15 }
 0x140   : > { %10844 = vmatmul.mubr.msk.bf16.gmra.mrb[8].mxu0 %vm13552_vm15, %v13594_v13  ;;  %vm16011_vm15 = vnez %v15940_v53  ;;  %v1603_v13 = vld [vmem:[#allocation2 + $0x100] sm:$0xff] }
 0x141   : > { %10847 = vmatprep.mubr.msk.bf16.mxu0 %vm13568_vm0, %v13626_v31  ;;  %10876 = vmatpush3.bf16.msra.mxu0 %v12712_v15  ;;  %vm16009_vm0 = vnez %v15932_v35  ;;  %v1604_v31 = vld [vmem:[#allocation2 + $0x108] sm:$0xff]  ;;  %v12718_v15 = vld [vmem:[#allocation3 + $0x150] sm:$0xff]  }
 0x142   : > { %10877 = vmatprep.subr.bf16.mxu0 %v12713_v18  ;;  %v2586_v35 = vld [vmem:[#allocation2 + $0x118] sm:$0xff] }
 0x145   : > { %10878 = vmatpush3.bf16.msra.mxu0 %v12713_v18  ;;  %v14029_v18 = vpack.c.bf16 %v1918_v40, %v1917_v36  ;;  %v12942_v40 = vld [vmem:[#allocation2 + $0x91] sm:$0xff] }
 0x146   : > { %10879 = vmatprep.subr.bf16.mxu0 %v12714_v42 }
 0x148   : > { %10848 = vmatmul.mubr.msk.bf16.gmra.mrb[12].mxu0 %vm16006_vm1, %v13628_v33  ;;  %vm16010_vm1 = vnez %v15938_v52  ;;  %v1911_v33 = vld [vmem:[#allocation2 + $0x11] sm:$0xff] }
 0x149   : > { %10851 = vmatprep.mubr.msk.bf16.mxu0 %vm16007_vm7, %v13661_v48  ;;  %10880 = vmatpush3.bf16.msra.mxu0 %v12714_v42  ;;  %vm16012_vm7 = vnez %v15942_v10  ;;  %v1912_v48 = vld [vmem:[#allocation2 + $0x19] sm:$0xff]  ;;  %v14031_v42 = vpack.c.bf16 %v1920_v2, %v1919_v7 }
 0x14a   : > { %10881 = vmatprep.subr.bf16.mxu0 %v12715_v46  ;;  %v12943_v7 = vld [vmem:[#allocation2 + $0x99] sm:$0xff] }
 0x14b   : > { %16015 = vst [vmem:[#allocation32_spill] sm:$0xff] %v14031_v42  ;;  %v1951_v2 = vpack.c.bf16 %v12943_v7, %v12942_v40  ;;  %v12950_v40 = vld [vmem:[#allocation2 + $0xd1] sm:$0xff]  ;;  %v12951_v7 = vld [vmem:[#allocation2 + $0xd9] sm:$0xff] }
 0x14d   : > { %10882 = vmatpush3.bf16.msra.mxu0 %v12715_v46  ;;  %v12719_v46 = vld [vmem:[#allocation3 + $0x158] sm:$0xff]  }
 0x14e   : > { %10915 = vmatprep.subr.bf16.mxu0 %v12716_v12 }
 0x150   : > { %10852 = vmatmul.mubr.msk.bf16.gmra.mrb[16].mxu0 %vm16008_vm9, %v13663_v49  ;;  %v14018_v49 = vpack.c.bf16 %v1604_v31, %v1603_v13  ;;  %v1922_v13 = vld [vmem:[#allocation2 + $0x69] sm:$0xff]  ;;  %v1923_v31 = vld [vmem:[#allocation2 + $0x71] sm:$0xff] }
 0x151   : > { %10855 = vmatprep.mubr.msk.bf16.mxu0 %vm16009_vm0, %v13689_v4  ;;  %v1943_v4 = vpack.c.bf16 %v1912_v48, %v1911_v33  ;;  %v1924_v33 = vld [vmem:[#allocation2 + $0x79] sm:$0xff]  ;;  %v12720_v48 = vld [vmem:[#allocation3 + $0x160] sm:$0xff]  }
 0x158   : > { %10856 = vmatmul.mubr.msk.bf16.gmra.mrb[20].mxu0 %vm16010_vm1, %v13691_v8  ;;  %vm16014_vm1 = vnez %v15946_v27  ;;  %v1913_v8 = vld [vmem:[#allocation2 + $0x21] sm:$0xff] }
 0x159   : > { %10859 = vmatprep.mubr.msk.bf16.mxu0 %vm16011_vm15, %v13714_v24  ;;  %v1914_v24 = vld [vmem:[#allocation2 + $0x29] sm:$0xff]  ;;  %vm16021_vm15 = vnez %v15958_v32 }
 0x15a   : > { %v14023_v56 = vpack.c.bf16 %v1914_v24, %v1913_v8  ;;  %v14037_v8 = vpack.c.bf16 %v1924_v33, %v1923_v31  ;;  %v12721_v24 = vld [vmem:[#allocation3 + $0x168] sm:$0xff]  }
 0x15b   : > { %v12946_v33 = vld [vmem:[#allocation2 + $0xb1] sm:$0xff] }
 0x15c   : > { %16017 = vst [vmem:[#allocation34_spill] sm:$0xff] %v14037_v8  ;;  %v3216_v32 = vld [vmem:[#allocation2 + $0xaa] sm:$0xff] }
 0x160   : > { %10860 = vmatmul.mubr.msk.bf16.gmra.mrb[24].mxu0 %vm16012_vm7, %v13716_v26  ;;  %v1916_v26 = vld [vmem:[#allocation2 + $0x39] sm:$0xff]  ;;  %vm16020_vm7 = vnez %v15956_v61 }
 0x161   : > { %10863 = vmatprep.mubr.msk.bf16.mxu0 %vm16013_vm14, %v13733_v37  ;;  %v14025_v60 = vpack.c.bf16 %v1916_v26, %v1915_v1  ;;  %v12717_v37 = vld [vmem:[#allocation3 + $0x148] sm:$0xff]   ;;  %v12722_v1 = vld [vmem:[#allocation3 + $0x170] sm:$0xff]   ;;  %v12940_v26 = vld [vmem:[#allocation2 + $0x81] sm:$0xff]  ;;  %vm16019_vm14 = vnez %v15950_v28 }
 0x168   : > { %10864 = vmatmul.mubr.msk.bf16.gmra.mrb[28].mxu0 %vm16014_vm1, %v14018_v49  ;;  %vm16018_vm1 = vnez %v15948_v9 }
 0x169   : > { %10883 = vmatprep.mubr.bf16.mxu0 %v1943_v4 }
 0x170   : > { %10884 = vmatmul.mubr.bf16.vlgmr.msra.gmra.mrb[0].mxu0 %v14023_v56 }
 0x171   : > { %10916 = vmatpush3.bf16.msra.mxu0 %v12716_v12  ;;  %10887 = vmatprep.mubr.bf16.mxu0 %v14025_v60  ;;  %v1921_v12 = vld [vmem:[#allocation2 + $0x61] sm:$0xff] }
 0x172   : > { %10917 = vmatprep.subr.bf16.mxu0 %v12717_v37  ;;  %v14035_v4 = vpack.c.bf16 %v1922_v13, %v1921_v12  ;;  %v12944_v12 = vld [vmem:[#allocation2 + $0xa1] sm:$0xff]  ;;  %v12945_v13 = vld [vmem:[#allocation2 + $0xa9] sm:$0xff] }
 0x173   : > { %v1952_v31 = vpack.c.bf16 %v12945_v13, %v12944_v12  ;;  %v12955_v12 = vld [vmem:[#allocation2 + $0xf9] sm:$0xff] }
 0x174   : > { %16016 = vst [vmem:[#allocation33_spill] sm:$0xff] %v14035_v4 }
 0x175   : > { %10918 = vmatpush3.bf16.msra.mxu0 %v12717_v37  ;;  %v12941_v37 = vld [vmem:[#allocation2 + $0x89] sm:$0xff] }
 0x176   : > { %10919 = vmatprep.subr.bf16.mxu0 %v12718_v15  ;;  %v1950_v36 = vpack.c.bf16 %v12941_v37, %v12940_v26  ;;  %v12948_v26 = vld [vmem:[#allocation2 + $0xc1] sm:$0xff]  ;;  %v12949_v37 = vld [vmem:[#allocation2 + $0xc9] sm:$0xff] }
 0x178   : > { %10888 = vmatmul.mubr.bf16.gmra.mrb[4].mxu0 %v14029_v18 }
 0x179   : > { %10891 = vmatprep.mubr.bf16.mxu0 %v14031_v42  ;;  %10920 = vmatpush3.bf16.msra.mxu0 %v12718_v15  ;;  %v12723_v15 = vld [vmem:[#allocation3 + $0x178] sm:$0xff]   ;;  %v12954_v42 = vld [vmem:[#allocation2 + $0xf1] sm:$0xff] }
 0x17a   : > { %10921 = vmatprep.subr.bf16.mxu0 %v12719_v46  ;;  %v1957_v13 = vpack.c.bf16 %v12955_v12, %v12954_v42  ;;  %v12726_v42 = vld [vmem:[#allocation3 + $0x190] sm:$0xff]  }
 0x17b   : > { %v2912_v12 = vld [vmem:[#allocation2 + $0xb9] sm:$0xff] }
 0x17d   : > { %10922 = vmatpush3.bf16.msra.mxu0 %v12719_v46  ;;  %v12724_v46 = vld [vmem:[#allocation3 + $0x180] sm:$0xff]  }
 0x17e   : > { %10923 = vmatprep.subr.bf16.mxu0 %v12720_v48 }
 0x180   : > { %10892 = vmatmul.mubr.bf16.gmra.mrb[8].mxu0 %v14035_v4 }
 0x181   : > { %10895 = vmatprep.mubr.bf16.mxu0 %v14037_v8  ;;  %10924 = vmatpush3.bf16.msra.mxu0 %v12720_v48  ;;  %v12947_v48 = vld [vmem:[#allocation2 + $0xb9] sm:$0xff] }
 0x182   : > { %10925 = vmatprep.subr.bf16.mxu0 %v12721_v24  ;;  %v1953_v8 = vpack.c.bf16 %v12947_v48, %v12946_v33  ;;  %v14041_v33 = vld [vmem:[#allocation2 + $0x109] sm:$0xff]  ;;  %v2905_v48 = vld [vmem:[#allocation2 + $0x81] sm:$0xff] }
 0x185   : > { %10926 = vmatpush3.bf16.msra.mxu0 %v12721_v24  ;;  %v1954_v24 = vpack.c.bf16 %v12949_v37, %v12948_v26  ;;  %v2906_v26 = vld [vmem:[#allocation2 + $0x89] sm:$0xff]  ;;  %v2908_v37 = vld [vmem:[#allocation2 + $0x99] sm:$0xff] }
 0x186   : > { %10927 = vmatprep.subr.bf16.mxu0 %v12722_v1 }
 0x188   : > { %10896 = vmatmul.mubr.bf16.gmra.mrb[12].mxu0 %v1950_v36  ;;  %v1955_v36 = vpack.c.bf16 %v12951_v7, %v12950_v40  ;;  %v2910_v7 = vld [vmem:[#allocation2 + $0xa9] sm:$0xff] }
 0x189   : > { %10899 = vmatprep.mubr.bf16.mxu0 %v1951_v2  ;;  %10928 = vmatpush3.bf16.msra.mxu0 %v12722_v1  ;;  %v12952_v1 = vld [vmem:[#allocation2 + $0xe1] sm:$0xff]  ;;  %v12953_v2 = vld [vmem:[#allocation2 + $0xe9] sm:$0xff] }
 0x18a   : > { %10929 = vmatprep.subr.bf16.mxu0 %v12723_v15  ;;  %v1956_v4 = vpack.c.bf16 %v12953_v2, %v12952_v1  ;;  %v2911_v2 = vld [vmem:[#allocation2 + $0xb1] sm:$0xff] }
 0x18d   : > { %10930 = vmatpush3.bf16.msra.mxu0 %v12723_v15  ;;  %v12956_v15 = vld [vmem:[#allocation2 + $0x101] sm:$0xff] }
 0x18e   : > { %10963 = vmatprep.subr.bf16.mxu0 %v12724_v46 }
 0x190   : > { %10900 = vmatmul.mubr.bf16.gmra.mrb[16].mxu0 %v1952_v31  ;;  %v12725_v31 = vld [vmem:[#allocation3 + $0x188] sm:$0xff]  }
 0x191   : > { %10903 = vmatprep.mubr.bf16.mxu0 %v1953_v8  ;;  %v1958_v8 = vpack.c.bf16 %v14041_v33, %v12956_v15  ;;  %v14079_v15 = vpack.c.bf16 %v2912_v12, %v2911_v2  ;;  %v2557_v2 = vld [vmem:[#allocation2 + $0x30] sm:$0xff]  ;;  %v2559_v12 = vld [vmem:[#allocation2 + $0x40] sm:$0xff] }
 0x198   : > { %10904 = vmatmul.mubr.bf16.gmra.mrb[20].mxu0 %v1954_v24  ;;  %v12730_v24 = vld [vmem:[#allocation3 + $0x1b0] sm:$0xff]  }
 0x199   : > { %10907 = vmatprep.mubr.bf16.mxu0 %v1955_v36  ;;  %v16027_v36 = vld [vmem:[#allocation29_spill] sm:$0xff] }
 0x1a0   : > { %10908 = vmatmul.mubr.bf16.gmra.mrb[24].mxu0 %v1956_v4  ;;  %v12727_v4 = vld [vmem:[#allocation3 + $0x198] sm:$0xff]  }
 0x1a1   : > { %10911 = vmatprep.mubr.bf16.mxu0 %v1957_v13  ;;  %v12732_v13 = vld [vmem:[#allocation3 + $0x1c0] sm:$0xff]  }
 0x1a8   : > { %10912 = vmatmul.mubr.bf16.gmra.mrb[28].mxu0 %v1958_v8  ;;  %v2914_v8 = vld [vmem:[#allocation2 + $0xc9] sm:$0xff] }
 0x1a9   : > { %10931 = vmatprep.mubr.msk.bf16.mxu0 %vm16018_vm1, %v13769_v20  ;;  %v16022_v20 = vld [vmem:[#allocation27_spill] sm:$0xff] }
 0x1aa   : > { %vm16023_vm1 = vnez %v16022_v20  ;;  %v3217_v20 = vld [vmem:[#allocation2 + $0xb2] sm:$0xff] }
 0x1b0   : > { %10932 = vmatmul.mubr.msk.bf16.vlgmr.msra.gmra.mrb[0].mxu0 %vm16019_vm14, %v13771_v23  ;;  %v12728_v23 = vld [vmem:[#allocation3 + $0x1a0] sm:$0xff]   ;;  %vm16026_vm14 = vnez %v15974_v30 }
 0x1b1   : > { %10964 = vmatpush3.bf16.msra.mxu0 %v12724_v46  ;;  %10935 = vmatprep.mubr.msk.bf16.mxu0 %vm16020_vm7, %v13803_v6  ;;  %v12729_v46 = vld [vmem:[#allocation3 + $0x1a8] sm:$0xff]  }
 0x1b2   : > { %10965 = vmatprep.subr.bf16.mxu0 %v12725_v31  ;;  %v16024_v6 = vld [vmem:[#allocation28_spill] sm:$0xff] }
 0x1b3   : > { %vm16025_vm7 = vnez %v16024_v6  ;;  %v3220_v6 = vld [vmem:[#allocation2 + $0xca] sm:$0xff] }
 0x1b5   : > { %10966 = vmatpush3.bf16.msra.mxu0 %v12725_v31 }
 0x1b6   : > { %10967 = vmatprep.subr.bf16.mxu0 %v12726_v42 }
 0x1b8   : > { %10936 = vmatmul.mubr.msk.bf16.gmra.mrb[4].mxu0 %vm16021_vm15, %v13805_v25  ;;  %v14065_v25 = vpack.c.bf16 %v2906_v26, %v2905_v48  ;;  %v2918_v48 = vld [vmem:[#allocation2 + $0xe9] sm:$0xff]  ;;  %v2919_v26 = vld [vmem:[#allocation2 + $0xf1] sm:$0xff] }
 0x1b9   : > { %10939 = vmatprep.mubr.msk.bf16.mxu0 %vm16023_vm1, %v13845_v29  ;;  %10968 = vmatpush3.bf16.msra.mxu0 %v12726_v42  ;;  %v2907_v29 = vld [vmem:[#allocation2 + $0x91] sm:$0xff] }
 0x1ba   : > { %10969 = vmatprep.subr.bf16.mxu0 %v12727_v4  ;;  %v14067_v40 = vpack.c.bf16 %v2908_v37, %v2907_v29  ;;  %10707 = vmatprep.mubr.bf16.mxu1 %v14065_v25  ;;  %v2915_v42 = vld [vmem:[#allocation2 + $0xd1] sm:$0xff]  ;;  %v2920_v29 = vld [vmem:[#allocation2 + $0xf9] sm:$0xff] }
 0x1bb   : > { %v14103_v37 = vpack.c.bf16 %v2920_v29, %v2919_v26  ;;  %v14128_v26 = vld [vmem:[#allocation2 + $0x111] sm:$0xff]  ;;  %v2563_v29 = vld [vmem:[#allocation2 + $0x60] sm:$0xff] }
 0x1bc   : > { %10708 = vmatmul.mubr.bf16.vlgmr.msra.gmra.mrb[0].mxu1 %v14067_v40 }
 0x1bd   : > { %10970 = vmatpush3.bf16.msra.mxu0 %v12727_v4  ;;  %v2916_v4 = vld [vmem:[#allocation2 + $0xd9] sm:$0xff] }
 0x1be   : > { %10971 = vmatprep.subr.bf16.mxu0 %v12728_v23 }
 0x1c0   : > { %10940 = vmatmul.mubr.msk.bf16.gmra.mrb[8].mxu0 %vm16025_vm7, %v13847_v63  ;;  %v12731_v63 = vld [vmem:[#allocation3 + $0x1b8] sm:$0xff]  }
 0x1c1   : > { %10943 = vmatprep.mubr.msk.bf16.mxu0 %vm16026_vm14, %v13875_v22  ;;  %10972 = vmatpush3.bf16.msra.mxu0 %v12728_v23  ;;  %v2909_v22 = vld [vmem:[#allocation2 + $0xa1] sm:$0xff]  ;;  %vm16028_vm14 = vnez %v16027_v36  ;;  %v14091_v23 = vpack.c.bf16 %v2916_v4, %v2915_v42  ;;  %v12733_v42 = vld [vmem:[#allocation3 + $0x1c8] sm:$0xff]  }
 0x1c2   : > { %10973 = vmatprep.subr.bf16.mxu0 %v12729_v46  ;;  %v14077_v1 = vpack.c.bf16 %v2910_v7, %v2909_v22  ;;  %v2561_v4 = vld [vmem:[#allocation2 + $0x50] sm:$0xff] }
 0x1c4   : > { %10711 = vmatprep.mubr.bf16.mxu1 %v14077_v1 }
 0x1c5   : > { %10974 = vmatpush3.bf16.msra.mxu0 %v12729_v46  ;;  %10712 = vmatmul.mubr.bf16.gmra.mrb[4].mxu1 %v14079_v15 }
 0x1c6   : > { %10975 = vmatprep.subr.bf16.mxu0 %v12730_v24 }
 0x1c8   : > { %10944 = vmatmul.mubr.msk.bf16.gmra.mrb[12].mxu0 %vm13852_vm11, %v13877_v39  ;;  %v16029_v39 = vld [vmem:[#allocation30_spill] sm:$0xff] }
 0x1c9   : > { %10947 = vmatprep.mubr.msk.bf16.mxu0 %vm16028_vm14, %v13907_v3  ;;  %10976 = vmatpush3.bf16.msra.mxu0 %v12730_v24  ;;  %vm16030_vm11 = vnez %v16029_v39  ;;  %v2913_v3 = vld [vmem:[#allocation2 + $0xc1] sm:$0xff]  ;;  %vm16031_vm14 = vnez %v15992_v58  ;;  %v3229_v58 = vld [vmem:[#allocation2 + $0x112] sm:$0xff] }
 0x1ca   : > { %10977 = vmatprep.subr.bf16.mxu0 %v12731_v63  ;;  %v14089_v31 = vpack.c.bf16 %v2914_v8, %v2913_v3  ;;  %v2555_v24 = vld [vmem:[#allocation2 + $0x20] sm:$0xff]  ;;  %v2560_v3 = vld [vmem:[#allocation2 + $0x48] sm:$0xff] }
 0x1cb   : > { %v3230_v39 = vld [vmem:[#allocation2 + $0x11a] sm:$0xff] }
 0x1cc   : > { %10715 = vmatprep.mubr.bf16.mxu1 %v14089_v31 }
 0x1cd   : > { %10978 = vmatpush3.bf16.msra.mxu0 %v12731_v63  ;;  %10716 = vmatmul.mubr.bf16.gmra.mrb[8].mxu1 %v14091_v23  ;;  %v2556_v63 = vld [vmem:[#allocation2 + $0x28] sm:$0xff] }
 0x1ce   : > { %11011 = vmatprep.subr.bf16.mxu0 %v12732_v13  ;;  %v9055_v7 = vpack.c.bf16 %v2556_v63, %v2555_v24  ;;  %v9067_v24 = vpack.c.bf16 %v2564_v14, %v2563_v29  ;;  %v12735_v63 = vld [vmem:[#allocation3 + $0x1d8] sm:$0xff]  }
 0x1cf   : > { %v12739_v14 = vld [vmem:[#allocation3 + $0x1f8] sm:$0xff]  }
 0x1d0   : > { %10948 = vmatmul.mubr.msk.bf16.gmra.mrb[16].mxu0 %vm16030_vm11, %v13909_v51  ;;  %v2917_v51 = vld [vmem:[#allocation2 + $0xe1] sm:$0xff] }
 0x1d1   : > { %10951 = vmatprep.mubr.msk.bf16.mxu0 %vm16031_vm14, %v13931_v21  ;;  %v14101_v21 = vpack.c.bf16 %v2918_v48, %v2917_v51  ;;  %v14122_v51 = vld [vmem:[#allocation2 + $0x42] sm:$0xff]  ;;  %v14124_v48 = vld [vmem:[#allocation2 + $0x4a] sm:$0xff] }
 0x1d2   : > { %4188 = vst [vmem:[#allocation2 + $0x49] sm:$0xff] %v14128_v26  ;;  %4189 = vst [vmem:[#allocation2 + $0x51] sm:$0x1] %v14128_v26 }
 0x1d3   : > { %10719 = vmatprep.mubr.bf16.mxu1 %v14101_v21 }
 0x1d5   : > { %10720 = vmatmul.mubr.bf16.gmra.mrb[12].mxu1 %v14103_v37 }
 0x1d8   : > { %10952 = vmatmul.mubr.msk.bf16.gmra.mrb[20].mxu0 %vm13914_vm4, %v13933_v44  ;;  %v2247_v44 = vld [vmem:[#allocation2 + $0x102] sm:$0xff] }
 0x1d9   : > { %10955 = vmatprep.mubr.msk.bf16.mxu0 %vm13924_vm12, %v13953_v47  ;;  %v2248_v47 = vld [vmem:[#allocation2 + $0x10a] sm:$0xff] }
 0x1da   : > { %v14113_v22 = vpack.c.bf16 %v2248_v47, %v2247_v44  ;;  %v12734_v44 = vld [vmem:[#allocation3 + $0x1d0] sm:$0xff]   ;;  %v9064_v47 = vpack.c.bf16 %v2562_v0, %v2561_v4 }
 0x1db   : > { %v12738_v4 = vld [vmem:[#allocation3 + $0x1f0] sm:$0xff]  }
 0x1e0   : > { %10956 = vmatmul.mubr.msk.bf16.gmra.mrb[24].mxu0 %vm13938_vm3, %v13955_v55  ;;  %v2558_v55 = vld [vmem:[#allocation2 + $0x38] sm:$0xff] }
 0x1e1   : > { %10959 = vmatprep.mubr.msk.bf16.mxu0 %vm13946_vm8, %v13968_v57  ;;  %v9058_v8 = vpack.c.bf16 %v2558_v55, %v2557_v2  ;;  %v9061_v57 = vpack.c.bf16 %v2560_v3, %v2559_v12  ;;  %v2568_v2 = vld [vmem:[#allocation2 + $0x88] sm:$0xff] }
 0x1e2   : > { %v12736_v55 = vld [vmem:[#allocation3 + $0x1e0] sm:$0xff]  }
 0x1e8   : > { %10960 = vmatmul.mubr.msk.bf16.gmra.mrb[28].mxu0 %vm13958_vm10, %v14113_v22 }
 0x1e9   : > { %10979 = vmatprep.mubr.msk.bf16.mxu0 %vm13451_vm2, %v9055_v7  ;;  %vm16033_vm2 = vnez %v15908_v50  ;;  %v2567_v7 = vld [vmem:[#allocation2 + $0x80] sm:$0xff]  ;;  %v2570_v50 = vld [vmem:[#allocation2 + $0x98] sm:$0xff] }
 0x1ea   : > { %v9073_v3 = vpack.c.bf16 %v2568_v2, %v2567_v7  ;;  %v9076_v0 = vpack.c.bf16 %v2570_v50, %v2569_v45  ;;  %v2580_v7 = vld [vmem:[#allocation2 + $0xe8] sm:$0xff]  ;;  %v9100_v45 = vpack.c.bf16 %v2586_v35, %v2585_v34  ;;  %v16045_v50 = vld [vmem:[#allocation34_spill] sm:$0xff]  ;;  %v9164_v34 = vpack.c.bf16 %v3230_v39, %v3229_v58 }
 0x1f0   : > { %10980 = vmatmul.mubr.msk.bf16.vlgmr.msra.gmra.mrb[0].mxu0 %vm13467_vm5, %v9058_v8  ;;  %v12737_v8 = vld [vmem:[#allocation3 + $0x1e8] sm:$0xff]   ;;  %vm16034_vm5 = vnez %v15911_v62 }
 0x1f1   : > { %11012 = vmatpush3.bf16.msra.mxu0 %v12732_v13  ;;  %10983 = vmatprep.mubr.msk.bf16.mxu0 %vm13475_vm6, %v9061_v57  ;;  %v2566_v13 = vld [vmem:[#allocation2 + $0x78] sm:$0xff]  ;;  %vm16035_vm6 = vnez %v15915_v5  ;;  %v2571_v57 = vld [vmem:[#allocation2 + $0xa0] sm:$0xff]  ;;  %v2573_v62 = vld [vmem:[#allocation2 + $0xb0] sm:$0xff] }
 0x1f2   : > { %11013 = vmatprep.subr.bf16.mxu0 %v12733_v42  ;;  %v9070_v12 = vpack.c.bf16 %v2566_v13, %v2565_v17  ;;  %v2574_v5 = vld [vmem:[#allocation2 + $0xb8] sm:$0xff]  ;;  %v2579_v13 = vld [vmem:[#allocation2 + $0xe0] sm:$0xff] }
 0x1f5   : > { %11014 = vmatpush3.bf16.msra.mxu0 %v12733_v42  ;;  %v2572_v42 = vld [vmem:[#allocation2 + $0xa8] sm:$0xff] }
 0x1f6   : > { %11015 = vmatprep.subr.bf16.mxu0 %v12734_v44  ;;  %v9079_v29 = vpack.c.bf16 %v2572_v42, %v2571_v57  ;;  %v2940_v42 = vpack.c.bf16 %v14128_v26, %v14128_v26 }
 0x1f8   : > { %10984 = vmatmul.mubr.msk.bf16.gmra.mrb[4].mxu0 %vm13529_vm13, %v9064_v47  ;;  %vm16036_vm13 = vnez %v15922_v16  ;;  %v2576_v47 = vld [vmem:[#allocation2 + $0xc8] sm:$0xff]  ;;  %v2577_v16 = vld [vmem:[#allocation2 + $0xd0] sm:$0xff] }
 0x1f9   : > { %10987 = vmatprep.mubr.msk.bf16.mxu0 %vm16033_vm2, %v9067_v24  ;;  %11016 = vmatpush3.bf16.msra.mxu0 %v12734_v44  ;;  %vm16037_vm2 = vnez %v15924_v19  ;;  %v2575_v44 = vld [vmem:[#allocation2 + $0xc0] sm:$0xff]  ;;  %v12740_v24 = vld [vmem:[#allocation3 + $0x200] sm:$0xff]   ;;  %v2578_v19 = vld [vmem:[#allocation2 + $0xd8] sm:$0xff] }
 0x1fa   : > { %11017 = vmatprep.subr.bf16.mxu0 %v12735_v63  ;;  %v9085_v17 = vpack.c.bf16 %v2576_v47, %v2575_v44  ;;  %v9088_v2 = vpack.c.bf16 %v2578_v19, %v2577_v16  ;;  %v3214_v44 = vld [vmem:[#allocation2 + $0x9a] sm:$0xff]  ;;  %v3215_v47 = vld [vmem:[#allocation2 + $0xa2] sm:$0xff] }
 0x1fb   : > { %v3219_v16 = vld [vmem:[#allocation2 + $0xc2] sm:$0xff] }
 0x1fd   : > { %11018 = vmatpush3.bf16.msra.mxu0 %v12735_v63  ;;  %v9082_v63 = vpack.c.bf16 %v2574_v5, %v2573_v62 }
 0x1fe   : > { %11019 = vmatprep.subr.bf16.mxu0 %v12736_v55 }
 0x200   : > { %10988 = vmatmul.mubr.msk.bf16.gmra.mrb[8].mxu0 %vm16034_vm5, %v9070_v12  ;;  %vm16038_vm5 = vnez %v15938_v52  ;;  %v2581_v12 = vld [vmem:[#allocation2 + $0xf0] sm:$0xff] }
 0x201   : > { %10991 = vmatprep.mubr.msk.bf16.mxu0 %vm16035_vm6, %v9073_v3  ;;  %11020 = vmatpush3.bf16.msra.mxu0 %v12736_v55  ;;  %v9091_v55 = vpack.c.bf16 %v2580_v7, %v2579_v13  ;;  %vm16039_vm6 = vnez %v15940_v53  ;;  %v2582_v3 = vld [vmem:[#allocation2 + $0xf8] sm:$0xff]  ;;  %v12741_v52 = vld [vmem:[#allocation3 + $0x208] sm:$0xff]   ;;  %v9149_v13 = vpack.c.bf16 %v3220_v6, %v3219_v16 }
 0x202   : > { %11021 = vmatprep.subr.bf16.mxu0 %v12737_v8  ;;  %v12742_v53 = vld [vmem:[#allocation3 + $0x210] sm:$0xff]  }
 0x203   : > { %v3222_v7 = vld [vmem:[#allocation2 + $0xda] sm:$0xff] }
 0x205   : > { %11022 = vmatpush3.bf16.msra.mxu0 %v12737_v8  ;;  %v9094_v8 = vpack.c.bf16 %v2582_v3, %v2581_v12  ;;  %v3226_v3 = vld [vmem:[#allocation2 + $0xfa] sm:$0xff] }
 0x206   : > { %11023 = vmatprep.subr.bf16.mxu0 %v12738_v4 }
 0x208   : > { %10992 = vmatmul.mubr.msk.bf16.gmra.mrb[12].mxu0 %vm16036_vm13, %v9076_v0  ;;  %vm16042_vm13 = vnez %v15946_v27  ;;  %v12744_v27 = vld [vmem:[#allocation3 + $0x220] sm:$0xff]  }
 0x209   : > { %10995 = vmatprep.mubr.msk.bf16.mxu0 %vm16037_vm2, %v9079_v29  ;;  %11024 = vmatpush3.bf16.msra.mxu0 %v12738_v4  ;;  %vm16046_vm2 = vnez %v15948_v9  ;;  %v3208_v0 = vld [vmem:[#allocation2 + $0x6a] sm:$0xff]  ;;  %v3209_v9 = vld [vmem:[#allocation2 + $0x72] sm:$0xff] }
 0x20a   : > { %11025 = vmatprep.subr.bf16.mxu0 %v12739_v14 }
 0x20d   : > { %11026 = vmatpush3.bf16.msra.mxu0 %v12739_v14 }
 0x20e   : > { %11059 = vmatprep.subr.bf16.mxu0 %v12740_v24 }
 0x210   : > { %10996 = vmatmul.mubr.msk.bf16.gmra.mrb[16].mxu0 %vm16008_vm9, %v9082_v63  ;;  %vm16040_vm9 = vnez %v15942_v10  ;;  %v12743_v10 = vld [vmem:[#allocation3 + $0x218] sm:$0xff]   ;;  %v9143_v63 = vpack.c.bf16 %v3216_v32, %v3215_v47 }
 0x211   : > { %10999 = vmatprep.mubr.msk.bf16.mxu0 %vm16009_vm0, %v9085_v17  ;;  %vm16041_vm0 = vnez %v15944_v11  ;;  %v16043_v11 = vld [vmem:[#allocation32_spill] sm:$0xff]  ;;  %v3218_v17 = vld [vmem:[#allocation2 + $0xba] sm:$0xff] }
 0x212   : > { %v9146_v19 = vpack.c.bf16 %v3218_v17, %v3217_v20 }
 0x218   : > { %11000 = vmatmul.mubr.msk.bf16.gmra.mrb[20].mxu0 %vm16038_vm5, %v9088_v2  ;;  %vm16047_vm5 = vnez %v15950_v28  ;;  %v3212_v28 = vld [vmem:[#allocation2 + $0x8a] sm:$0xff]  ;;  %v3223_v2 = vld [vmem:[#allocation2 + $0xe2] sm:$0xff] }
 0x219   : > { %11003 = vmatprep.mubr.msk.bf16.mxu0 %vm16039_vm6, %v9091_v55  ;;  %vm16048_vm6 = vnez %v15956_v61  ;;  %v3213_v61 = vld [vmem:[#allocation2 + $0x92] sm:$0xff] }
 0x220   : > { %11004 = vmatmul.mubr.msk.bf16.gmra.mrb[24].mxu0 %vm16040_vm9, %v9094_v8  ;;  %vm16049_vm9 = vnez %v15974_v30  ;;  %v3221_v30 = vld [vmem:[#allocation2 + $0xd2] sm:$0xff] }
 0x221   : > { %11007 = vmatprep.mubr.msk.bf16.mxu0 %vm16041_vm0, %v14018_v49  ;;  %v16044_v49 = vld [vmem:[#allocation33_spill] sm:$0xff]  ;;  %v9152_v55 = vpack.c.bf16 %v3222_v7, %v3221_v30 }
 0x228   : > { %11008 = vmatmul.mubr.msk.bf16.gmra.mrb[28].mxu0 %vm16042_vm13, %v9100_v45 }
 0x229   : > { %11027 = vmatprep.mubr.bf16.mxu0 %v14023_v56  ;;  %v12745_v56 = vld [vmem:[#allocation3 + $0x228] sm:$0xff]  }
 0x230   : > { %11028 = vmatmul.mubr.bf16.vlgmr.msra.gmra.mrb[0].mxu0 %v14025_v60  ;;  %v12746_v60 = vld [vmem:[#allocation3 + $0x230] sm:$0xff]  }
 0x231   : > { %11060 = vmatpush3.bf16.msra.mxu0 %v12740_v24  ;;  %11031 = vmatprep.mubr.bf16.mxu0 %v14029_v18  ;;  %v12747_v18 = vld [vmem:[#allocation3 + $0x238] sm:$0xff]   ;;  %v9140_v24 = vpack.c.bf16 %v3214_v44, %v3213_v61 }
 0x232   : > { %11061 = vmatprep.subr.bf16.mxu0 %v12741_v52 }
 0x235   : > { %11062 = vmatpush3.bf16.msra.mxu0 %v12741_v52 }
 0x236   : > { %11063 = vmatprep.subr.bf16.mxu0 %v12742_v53 }
 0x238   : > { %11032 = vmatmul.mubr.bf16.gmra.mrb[4].mxu0 %v16043_v11 }
 0x239   : > { %11035 = vmatprep.mubr.bf16.mxu0 %v16044_v49  ;;  %11064 = vmatpush3.bf16.msra.mxu0 %v12742_v53 }
 0x23a   : > { %11065 = vmatprep.subr.bf16.mxu0 %v12743_v10 }
 0x23d   : > { %11066 = vmatpush3.bf16.msra.mxu0 %v12743_v10 }
 0x23e   : > { %11067 = vmatprep.subr.bf16.mxu0 %v12744_v27 }
 0x240   : > { %11036 = vmatmul.mubr.bf16.gmra.mrb[8].mxu0 %v16045_v50 }
 0x241   : > { %11039 = vmatprep.mubr.bf16.mxu0 %v14065_v25  ;;  %11068 = vmatpush3.bf16.msra.mxu0 %v12744_v27  ;;  %v2921_v25 = vld [vmem:[#allocation2 + $0x101] sm:$0xff] }
 0x242   : > { %11069 = vmatprep.subr.bf16.mxu0 %v12745_v56  ;;  %v2939_v57 = vpack.c.bf16 %v14041_v33, %v2921_v25  ;;  %v3205_v33 = vld [vmem:[#allocation2 + $0x52] sm:$0xff] }
 0x245   : > { %11070 = vmatpush3.bf16.msra.mxu0 %v12745_v56 }
 0x246   : > { %11071 = vmatprep.subr.bf16.mxu0 %v12746_v60 }
 0x248   : > { %11040 = vmatmul.mubr.bf16.gmra.mrb[12].mxu0 %v14067_v40  ;;  %v3199_v40 = vld [vmem:[#allocation2 + $0x22] sm:$0xff] }
 0x249   : > { %11043 = vmatprep.mubr.bf16.mxu0 %v14077_v1  ;;  %11072 = vmatpush3.bf16.msra.mxu0 %v12746_v60  ;;  %v3200_v1 = vld [vmem:[#allocation2 + $0x2a] sm:$0xff] }
 0x24a   : > { %11073 = vmatprep.subr.bf16.mxu0 %v12747_v18  ;;  %v9119_v4 = vpack.c.bf16 %v3200_v1, %v3199_v40  ;;  %v3676_v60 = vld [vmem:[#allocation6 + $0x8] sm:$0xff] }
 0x24b   : > { %3755 = vmatprep.mubr.f32.mxu1 %v3676_v60 }
 0x24d   : > { %11074 = vmatpush3.bf16.msra.mxu0 %v12747_v18  ;;  %v14247_v18 = vld [vmem:[%s15784_s6] ss:$0 sm:$0xff] }
 0x24e   : > { %11535 = vmatprep.subr.bf16.mxu0 %v14128_v26  ;;  %v3207_v26 = vld [vmem:[#allocation2 + $0x62] sm:$0xff] }
 0x24f   : > { %v9131_v14 = vpack.c.bf16 %v3208_v0, %v3207_v26 }
 0x250   : > { %11044 = vmatmul.mubr.bf16.gmra.mrb[16].mxu0 %v14079_v15  ;;  %v3201_v15 = vld [vmem:[#allocation2 + $0x32] sm:$0xff] }
 0x251   : > { %11047 = vmatprep.mubr.bf16.mxu0 %v14089_v31  ;;  %v3202_v31 = vld [vmem:[#allocation2 + $0x3a] sm:$0xff] }
 0x258   : > { %11048 = vmatmul.mubr.bf16.gmra.mrb[20].mxu0 %v14091_v23  ;;  %v9122_v23 = vpack.c.bf16 %v3202_v31, %v3201_v15 }
 0x259   : > { %11051 = vmatprep.mubr.bf16.mxu0 %v14101_v21  ;;  %v9125_v21 = vpack.c.bf16 %v14124_v48, %v14122_v51  ;;  %v3210_v51 = vld [vmem:[#allocation2 + $0x7a] sm:$0xff]  ;;  %v3211_v48 = vld [vmem:[#allocation2 + $0x82] sm:$0xff] }
 0x25a   : > { %v9134_v62 = vpack.c.bf16 %v3210_v51, %v3209_v9  ;;  %v9137_v5 = vpack.c.bf16 %v3212_v28, %v3211_v48 }
 0x260   : > { %11052 = vmatmul.mubr.bf16.gmra.mrb[24].mxu0 %v14103_v37  ;;  %v3206_v37 = vld [vmem:[#allocation2 + $0x5a] sm:$0xff] }
 0x261   : > { %11055 = vmatprep.mubr.bf16.mxu0 %v2939_v57  ;;  %v9128_v29 = vpack.c.bf16 %v3206_v37, %v3205_v33  ;;  %v14252_v57 = vld [vmem:[%s15785_s7] ss:$0 sm:$0xff] }
 0x268   : > { %11056 = vmatmul.mubr.bf16.gmra.mrb[28].mxu0 %v2940_v42 }
 0x269   : > { %11075 = vmatprep.mubr.msk.bf16.mxu0 %vm16046_vm2, %v9119_v4 }
 0x270   : > { %11076 = vmatmul.mubr.msk.bf16.vlgmr.msra.gmra.mrb[0].mxu0 %vm16047_vm5, %v9122_v23 }
 0x271   : > { %11079 = vmatprep.mubr.msk.bf16.mxu0 %vm16048_vm6, %v9125_v21 }
 0x278   : > { %11080 = vmatmul.mubr.msk.bf16.gmra.mrb[4].mxu0 %vm16021_vm15, %v9128_v29  ;;  %vm16050_vm15 = vnez %v15980_v59  ;;  %v3224_v59 = vld [vmem:[#allocation2 + $0xea] sm:$0xff] }
 0x279   : > { %11083 = vmatprep.mubr.msk.bf16.mxu0 %vm16023_vm1, %v9131_v14  ;;  %vm16051_vm1 = vnez %v16027_v36  ;;  %v9155_v12 = vpack.c.bf16 %v3224_v59, %v3223_v2  ;;  %v3225_v36 = vld [vmem:[#allocation2 + $0xf2] sm:$0xff] }
 0x27a   : > { %v9158_v8 = vpack.c.bf16 %v3226_v3, %v3225_v36 }
 0x280   : > { %11084 = vmatmul.mubr.msk.bf16.gmra.mrb[8].mxu0 %vm16025_vm7, %v9134_v62 }
 0x281   : > { %11087 = vmatprep.mubr.msk.bf16.mxu0 %vm16049_vm9, %v9137_v5 }
 0x288   : > { %11088 = vmatmul.mubr.msk.bf16.gmra.mrb[12].mxu0 %vm16050_vm15, %v9140_v24 }
 0x289   : > { %11091 = vmatprep.mubr.msk.bf16.mxu0 %vm16051_vm1, %v9143_v63 }
 0x28f   : > { %v14212_v46 = vpop.f32.mrb[0].mxu1 }
 0x290   : > { %11092 = vmatmul.mubr.msk.bf16.gmra.mrb[16].mxu0 %vm16030_vm11, %v9146_v19  ;;  %v14214_v54 = vpop.f32.mrb[1].mxu1 }
 0x291   : > { %11095 = vmatprep.mubr.msk.bf16.mxu0 %vm16031_vm14, %v9149_v13  ;;  %v14216_v35 = vpop.f32.mrb[2].mxu1 }
 0x292   : > { %v14218_v45 = vpop.f32.mrb[3].mxu1 }
 0x298   : > { %11096 = vmatmul.mubr.msk.bf16.gmra.mrb[20].mxu0 %vm13914_vm4, %v9152_v55  ;;  %v14220_v43 = vpop.f32.mrb[4].mxu1 }
 0x299   : > { %11099 = vmatprep.mubr.msk.bf16.mxu0 %vm13924_vm12, %v9155_v12  ;;  %v14222_v52 = vpop.f32.mrb[5].mxu1 }
 0x29a   : > { %v14224_v41 = vpop.f32.mrb[6].mxu1 }
 0x2a0   : > { %11100 = vmatmul.mubr.msk.bf16.gmra.mrb[24].mxu0 %vm13938_vm3, %v9158_v8 }
 0x2a1   : > { %11103 = vmatprep.mubr.msk.bf16.mxu0 %vm13946_vm8, %v14113_v22  ;;  %v14226_v22 = vpop.f32.mrb[7].mxu1 }
 0x2a2   : > { %v14228_v53 = vpop.f32.mrb[8].mxu1 }
 0x2a3   : > { %v14230_v38 = vpop.f32.mrb[9].mxu1 }
 0x2a4   : > { %v14232_v10 = vpop.f32.mrb[10].mxu1 }
 0x2a5   : > { %v14234_v11 = vpop.f32.mrb[11].mxu1 }
 0x2a8   : > { %11104 = vmatmul.mubr.msk.bf16.gmra.mrb[28].mxu0 %vm13958_vm10, %v9164_v34  ;;  %v14236_v49 = vpop.f32.mrb[12].mxu1 }
 0x2a9   : > { %v14238_v27 = vpop.f32.mrb[13].mxu1 }
 0x2aa   : > { %v14240_v56 = vpop.f32.mrb[14].mxu1 }
 0x2ab   : > { %v14242_v50 = vpop.f32.mrb[15].mxu1 }
 0x343   : > { %v11077_v25 = vpop.f32.mrb[0].mxu0 }
 0x344   : > { %v3545_v40 = vmul.f32 %v11077_v25, %v14247_v18  ;;  %v3378_v1 = vpop.f32.mrb[1].mxu0 }
 0x345   : > { %v3543_v42 = vmul.f32 %v14247_v18, %v3378_v1  ;;  %v11078_v4 = vpop.f32.mrb[2].mxu0 }
 0x346   : > { %v3581_v15 = vadd.f32 %v14252_v57, %v3545_v40  ;;  %v3546_v31 = vmul.f32 %v11078_v4, %v14247_v18  ;;  %v3381_v23 = vpop.f32.mrb[3].mxu0 }
 0x347   : > { %v3579_v21 = vadd.f32 %v14252_v57, %v3543_v42  ;;  %v3544_v33 = vmul.f32 %v14247_v18, %v3381_v23 }
 0x348   : > { %v3613_v37 = vmul.f32 0.1, %v3581_v15  ;;  %v3582_v26 = vadd.f32 %v14252_v57, %v3546_v31 }
 0x349   : > { %v3611_v0 = vmul.f32 0.1, %v3579_v21  ;;  %v3580_v29 = vadd.f32 %v14252_v57, %v3544_v33 }
 0x34a   : > { %v3614_v14 = vmul.f32 0.1, %v3582_v26  ;;  %v3645_v48 = vmax.f32 %v3581_v15, %v3613_v37 }
 0x34b   : > { %v3612_v9 = vmul.f32 0.1, %v3580_v29  ;;  %v11081_v51 = vpop.f32.mrb[4].mxu0  ;;  %v3643_v61 = vmax.f32 %v3579_v21, %v3611_v0 }
 0x34c   : > { %v3646_v28 = vmax.f32 %v3582_v26, %v3614_v14  ;;  %v3549_v62 = vmul.f32 %v11081_v51, %v14247_v18  ;;  %v3394_v5 = vpop.f32.mrb[5].mxu0 }
 0x34d   : > { %v3644_v44 = vmax.f32 %v3580_v29, %v3612_v9  ;;  %v3547_v47 = vmul.f32 %v14247_v18, %v3394_v5  ;;  %v11082_v32 = vpop.f32.mrb[6].mxu0 }
 0x34e   : > { %v14264_v24 = vpack.c.bf16 %v3646_v28, %v3645_v48  ;;  %v3585_v63 = vadd.f32 %v14252_v57, %v3549_v62  ;;  %v3550_v20 = vmul.f32 %v11082_v32, %v14247_v18  ;;  %v3397_v17 = vpop.f32.mrb[7].mxu0 }
 0x34f   : > { %v14268_v16 = vpack.c.bf16 %v3644_v44, %v3643_v61  ;;  %v3583_v6 = vadd.f32 %v14252_v57, %v3547_v47  ;;  %v3548_v19 = vmul.f32 %v14247_v18, %v3397_v17 }
 0x350   : > { %v3617_v13 = vmul.f32 0.1, %v3585_v63  ;;  %v3586_v30 = vadd.f32 %v14252_v57, %v3550_v20 }
 0x351   : > { %v3615_v7 = vmul.f32 0.1, %v3583_v6  ;;  %v3584_v2 = vadd.f32 %v14252_v57, %v3548_v19 }
 0x352   : > { %v3618_v59 = vmul.f32 0.1, %v3586_v30  ;;  %v3649_v36 = vmax.f32 %v3585_v63, %v3617_v13 }
 0x353   : > { %v3616_v55 = vmul.f32 0.1, %v3584_v2  ;;  %v11085_v12 = vpop.f32.mrb[8].mxu0  ;;  %v3647_v39 = vmax.f32 %v3583_v6, %v3615_v7 }
 0x354   : > { %v3650_v3 = vmax.f32 %v3586_v30, %v3618_v59  ;;  %v3553_v8 = vmul.f32 %v11085_v12, %v14247_v18  ;;  %v3410_v58 = vpop.f32.mrb[9].mxu0 }
 0x355   : > { %v3648_v34 = vmax.f32 %v3584_v2, %v3616_v55  ;;  %v3551_v60 = vmul.f32 %v14247_v18, %v3410_v58  ;;  %v11086_v25 = vpop.f32.mrb[10].mxu0 }
 0x356   : > { %v14276_v40 = vpack.c.bf16 %v3650_v3, %v3649_v36  ;;  %v3589_v1 = vadd.f32 %v14252_v57, %v3553_v8  ;;  %v3554_v42 = vmul.f32 %v11086_v25, %v14247_v18  ;;  %v3413_v4 = vpop.f32.mrb[11].mxu0 }
 0x357   : > { %v14280_v15 = vpack.c.bf16 %v3648_v34, %v3647_v39  ;;  %v3587_v31 = vadd.f32 %v14252_v57, %v3551_v60  ;;  %v3552_v23 = vmul.f32 %v14247_v18, %v3413_v4 }
 0x358   : > { %v3621_v21 = vmul.f32 0.1, %v3589_v1  ;;  %v3590_v33 = vadd.f32 %v14252_v57, %v3554_v42 }
 0x359   : > { %v3619_v37 = vmul.f32 0.1, %v3587_v31  ;;  %v3588_v26 = vadd.f32 %v14252_v57, %v3552_v23 }
 0x35a   : > { %v3622_v0 = vmul.f32 0.1, %v3590_v33  ;;  %v3653_v9 = vmax.f32 %v3589_v1, %v3621_v21 }
 0x35b   : > { %v3620_v29 = vmul.f32 0.1, %v3588_v26  ;;  %v11089_v14 = vpop.f32.mrb[12].mxu0  ;;  %v3651_v62 = vmax.f32 %v3587_v31, %v3619_v37 }
 0x35c   : > { %v3654_v51 = vmax.f32 %v3590_v33, %v3622_v0  ;;  %v3557_v48 = vmul.f32 %v11089_v14, %v14247_v18  ;;  %v3426_v28 = vpop.f32.mrb[13].mxu0 }
 0x35d   : > { %v3652_v5 = vmax.f32 %v3588_v26, %v3620_v29  ;;  %v3555_v61 = vmul.f32 %v14247_v18, %v3426_v28  ;;  %v11090_v44 = vpop.f32.mrb[14].mxu0 }
 0x35e   : > { %v14288_v47 = vpack.c.bf16 %v3654_v51, %v3653_v9  ;;  %v3593_v32 = vadd.f32 %v14252_v57, %v3557_v48  ;;  %v3558_v63 = vmul.f32 %v11090_v44, %v14247_v18  ;;  %v3429_v20 = vpop.f32.mrb[15].mxu0 }
 0x35f   : > { %v14292_v17 = vpack.c.bf16 %v3652_v5, %v3651_v62  ;;  %v3591_v6 = vadd.f32 %v14252_v57, %v3555_v61  ;;  %v3556_v19 = vmul.f32 %v14247_v18, %v3429_v20 }
 0x360   : > { %v3625_v13 = vmul.f32 0.1, %v3593_v32  ;;  %v3594_v30 = vadd.f32 %v14252_v57, %v3558_v63 }
 0x361   : > { %v3623_v7 = vmul.f32 0.1, %v3591_v6  ;;  %v3592_v2 = vadd.f32 %v14252_v57, %v3556_v19 }
 0x362   : > { %v3626_v59 = vmul.f32 0.1, %v3594_v30  ;;  %v3657_v36 = vmax.f32 %v3593_v32, %v3625_v13 }
 0x363   : > { %v3624_v55 = vmul.f32 0.1, %v3592_v2  ;;  %v11093_v12 = vpop.f32.mrb[16].mxu0  ;;  %v3655_v39 = vmax.f32 %v3591_v6, %v3623_v7 }
 0x364   : > { %v3658_v3 = vmax.f32 %v3594_v30, %v3626_v59  ;;  %v12227_v8 = vadd.f32 %v11093_v12, %v14212_v46  ;;  %v3442_v58 = vpop.f32.mrb[17].mxu0 }
 0x365   : > { %v3656_v34 = vmax.f32 %v3592_v2, %v3624_v55  ;;  %v12228_v60 = vadd.f32 %v3442_v58, %v14214_v54  ;;  %v11094_v25 = vpop.f32.mrb[18].mxu0 }
 0x366   : > { %v14300_v1 = vpack.c.bf16 %v3658_v3, %v3657_v36  ;;  %v3561_v42 = vmul.f32 %v12227_v8, %v14247_v18  ;;  %v12229_v4 = vadd.f32 %v11094_v25, %v14216_v35  ;;  %v3445_v31 = vpop.f32.mrb[19].mxu0 }
 0x367   : > { %v14304_v23 = vpack.c.bf16 %v3656_v34, %v3655_v39  ;;  %v3559_v21 = vmul.f32 %v12228_v60, %v14247_v18  ;;  %v12230_v33 = vadd.f32 %v3445_v31, %v14218_v45 }
 0x368   : > { %v3597_v46 = vadd.f32 %v14252_v57, %v3561_v42  ;;  %v3562_v37 = vmul.f32 %v12229_v4, %v14247_v18 }
 0x369   : > { %v3595_v54 = vadd.f32 %v14252_v57, %v3559_v21  ;;  %v3560_v26 = vmul.f32 %v12230_v33, %v14247_v18 }
 0x36a   : > { %v3629_v0 = vmul.f32 0.1, %v3597_v46  ;;  %v3598_v29 = vadd.f32 %v14252_v57, %v3562_v37 }
 0x36b   : > { %v3627_v14 = vmul.f32 0.1, %v3595_v54  ;;  %v3596_v35 = vadd.f32 %v14252_v57, %v3560_v26  ;;  %v11097_v9 = vpop.f32.mrb[20].mxu0 }
 0x36c   : > { %v3630_v51 = vmul.f32 0.1, %v3598_v29  ;;  %v12231_v48 = vadd.f32 %v11097_v9, %v14220_v43  ;;  %v3458_v28 = vpop.f32.mrb[21].mxu0  ;;  %v3661_v61 = vmax.f32 %v3597_v46, %v3629_v0 }
 0x36d   : > { %v3628_v45 = vmul.f32 0.1, %v3596_v35  ;;  %v12232_v62 = vadd.f32 %v3458_v28, %v14222_v52  ;;  %v11098_v5 = vpop.f32.mrb[22].mxu0  ;;  %v3659_v6 = vmax.f32 %v3595_v54, %v3627_v14 }
 0x36e   : > { %v3662_v44 = vmax.f32 %v3598_v29, %v3630_v51  ;;  %v3565_v32 = vmul.f32 %v12231_v48, %v14247_v18  ;;  %v12233_v63 = vadd.f32 %v11098_v5, %v14224_v41  ;;  %v3461_v20 = vpop.f32.mrb[23].mxu0 }
 0x36f   : > { %v3660_v19 = vmax.f32 %v3596_v35, %v3628_v45  ;;  %v3563_v13 = vmul.f32 %v12232_v62, %v14247_v18  ;;  %v12234_v30 = vadd.f32 %v3461_v20, %v14226_v22 }
 0x370   : > { %v3601_v43 = vadd.f32 %v14252_v57, %v3565_v32  ;;  %v3566_v7 = vmul.f32 %v12233_v63, %v14247_v18  ;;  %v14322_v2 = vpack.c.bf16 %v3662_v44, %v3661_v61 }
 0x371   : > { %v3599_v52 = vadd.f32 %v14252_v57, %v3563_v13  ;;  %v3564_v59 = vmul.f32 %v12234_v30, %v14247_v18  ;;  %v14326_v55 = vpack.c.bf16 %v3660_v19, %v3659_v6 }
 0x372   : > { %v3633_v41 = vmul.f32 0.1, %v3601_v43  ;;  %v3602_v12 = vadd.f32 %v14252_v57, %v3566_v7 }
 0x373   : > { %v3631_v36 = vmul.f32 0.1, %v3599_v52  ;;  %v3600_v3 = vadd.f32 %v14252_v57, %v3564_v59  ;;  %v11101_v8 = vpop.f32.mrb[24].mxu0  ;;  %11892 = vmatprep.subr.bf16.mxu1 %v14326_v55 }
 0x374   : > { %v3634_v22 = vmul.f32 0.1, %v3602_v12  ;;  %v12235_v58 = vadd.f32 %v11101_v8, %v14228_v53  ;;  %v3474_v39 = vpop.f32.mrb[25].mxu0  ;;  %11894 = vmatpush3.bf16.msra.mxu1 %v14268_v16  ;;  %v3665_v42 = vmax.f32 %v3601_v43, %v3633_v41 }
 0x375   : > { %v3632_v34 = vmul.f32 0.1, %v3600_v3  ;;  %v12236_v60 = vadd.f32 %v3474_v39, %v14230_v38  ;;  %v11102_v25 = vpop.f32.mrb[26].mxu0  ;;  %11896 = vmatprep.subr.bf16.mxu1 %v14322_v2  ;;  %v3663_v46 = vmax.f32 %v3599_v52, %v3631_v36 }
 0x376   : > { %v3666_v4 = vmax.f32 %v3602_v12, %v3634_v22  ;;  %v3569_v31 = vmul.f32 %v12235_v58, %v14247_v18  ;;  %v12237_v21 = vadd.f32 %v11102_v25, %v14232_v10  ;;  %v3477_v33 = vpop.f32.mrb[27].mxu0 }
 0x377   : > { %v3664_v37 = vmax.f32 %v3600_v3, %v3632_v34  ;;  %v3567_v53 = vmul.f32 %v12236_v60, %v14247_v18  ;;  %v12238_v54 = vadd.f32 %v3477_v33, %v14234_v11  ;;  %v3682_v33 = vld [vmem:[#allocation6 + $0x38] sm:$0xff] }
 0x378   : > { %v3605_v26 = vadd.f32 %v14252_v57, %v3569_v31  ;;  %v3570_v38 = vmul.f32 %v12237_v21, %v14247_v18  ;;  %11898 = vmatpush3.bf16.msra.mxu1 %v14264_v24  ;;  %v14342_v0 = vpack.c.bf16 %v3666_v4, %v3665_v42  ;;  %v3678_v42 = vld [vmem:[#allocation6 + $0x18] sm:$0xff]  ;;  %v3677_v4 = vld [vmem:[#allocation6 + $0x10] sm:$0xff]  ;;  %v3680_v31 = vld [vmem:[#allocation6 + $0x28] sm:$0xff] }
 0x379   : > { %v3603_v29 = vadd.f32 %v14252_v57, %v3567_v53  ;;  %v3568_v14 = vmul.f32 %v12238_v54, %v14247_v18  ;;  %v14346_v10 = vpack.c.bf16 %v3664_v37, %v3663_v46  ;;  %v3679_v21 = vld [vmem:[#allocation6 + $0x20] sm:$0xff]  ;;  %v3681_v46 = vld [vmem:[#allocation6 + $0x30] sm:$0xff]  ;;  %v3684_v37 = vld [vmem:[#allocation6 + $0x48] sm:$0xff] }
 0x37a   : > { %v3637_v35 = vmul.f32 0.1, %v3605_v26  ;;  %v3606_v9 = vadd.f32 %v14252_v57, %v3570_v38  ;;  %v3683_v53 = vld [vmem:[#allocation6 + $0x40] sm:$0xff]  ;;  %v3686_v54 = vld [vmem:[#allocation6 + $0x58] sm:$0xff]  ;;  %v3688_v38 = vld [vmem:[#allocation6 + $0x68] sm:$0xff] }
 0x37b   : > { %v3635_v51 = vmul.f32 0.1, %v3603_v29  ;;  %v3604_v11 = vadd.f32 %v14252_v57, %v3568_v14  ;;  %v11105_v48 = vpop.f32.mrb[28].mxu0  ;;  %11900 = vmatprep.subr.bf16.mxu1 %v14346_v10  ;;  %v3690_v14 = vld [vmem:[#allocation6 + $0x78] sm:$0xff] }
 0x37c   : > { %v3638_v28 = vmul.f32 0.1, %v3606_v9  ;;  %v12239_v45 = vadd.f32 %v11105_v48, %v14236_v49  ;;  %v3490_v62 = vpop.f32.mrb[29].mxu0  ;;  %11902 = vmatpush3.bf16.msra.mxu1 %v14280_v15  ;;  %v3669_v32 = vmax.f32 %v3605_v26, %v3637_v35  ;;  %v3685_v26 = vld [vmem:[#allocation6 + $0x50] sm:$0xff] }
 0x37d   : > { %v3636_v5 = vmul.f32 0.1, %v3604_v11  ;;  %v12240_v61 = vadd.f32 %v3490_v62, %v14238_v27  ;;  %v11106_v44 = vpop.f32.mrb[30].mxu0  ;;  %11904 = vmatprep.subr.bf16.mxu1 %v14342_v0  ;;  %v3667_v13 = vmax.f32 %v3603_v29, %v3635_v51  ;;  %v3687_v29 = vld [vmem:[#allocation6 + $0x60] sm:$0xff]  ;;  %v3689_v35 = vld [vmem:[#allocation6 + $0x70] sm:$0xff]  ;;  %v3804_v62 = vld [vmem:[#allocation6 + $0xb8] sm:$0xff] }
 0x37e   : > { %v3670_v63 = vmax.f32 %v3606_v9, %v3638_v28  ;;  %v3573_v20 = vmul.f32 %v12239_v45, %v14247_v18  ;;  %v12241_v6 = vadd.f32 %v11106_v44, %v14240_v56  ;;  %v3493_v19 = vpop.f32.mrb[31].mxu0  ;;  %v3798_v9 = vld [vmem:[#allocation6 + $0x88] sm:$0xff]  ;;  %v3797_v51 = vld [vmem:[#allocation6 + $0x80] sm:$0xff]  ;;  %v3799_v48 = vld [vmem:[#allocation6 + $0x90] sm:$0xff] }
 0x37f   : > { %v3668_v30 = vmax.f32 %v3604_v11, %v3636_v5  ;;  %v3571_v49 = vmul.f32 %v12240_v61, %v14247_v18  ;;  %v12242_v43 = vadd.f32 %v3493_v19, %v14242_v50  ;;  %v3800_v11 = vld [vmem:[#allocation6 + $0x98] sm:$0xff]  ;;  %v3802_v28 = vld [vmem:[#allocation6 + $0xa8] sm:$0xff]  ;;  %v3801_v45 = vld [vmem:[#allocation6 + $0xa0] sm:$0xff] }
 0x380   : > { %v3609_v7 = vadd.f32 %v14252_v57, %v3573_v20  ;;  %v3574_v27 = vmul.f32 %v12241_v6, %v14247_v18  ;;  %11906 = vmatpush3.bf16.msra.mxu1 %v14276_v40  ;;  %v14362_v52 = vpack.c.bf16 %v3670_v63, %v3669_v32  ;;  %v3803_v5 = vld [vmem:[#allocation6 + $0xb0] sm:$0xff]  ;;  %v3806_v61 = vld [vmem:[#allocation6 + $0xc8] sm:$0xff]  ;;  %v3805_v44 = vld [vmem:[#allocation6 + $0xc0] sm:$0xff] }
 0x381   : > { %v3607_v59 = vadd.f32 %v14252_v57, %v3571_v49  ;;  %v3572_v41 = vmul.f32 %v12242_v43, %v14247_v18  ;;  %v14366_v56 = vpack.c.bf16 %v3668_v30, %v3667_v13  ;;  %v3808_v32 = vld [vmem:[#allocation6 + $0xd8] sm:$0xff]  ;;  %v3807_v63 = vld [vmem:[#allocation6 + $0xd0] sm:$0xff]  ;;  %v3810_v20 = vld [vmem:[#allocation6 + $0xe8] sm:$0xff] }
 0x382   : > { %v3641_v12 = vmul.f32 0.1, %v3609_v7  ;;  %v3610_v36 = vadd.f32 %v14252_v57, %v3574_v27  ;;  %v3809_v6 = vld [vmem:[#allocation6 + $0xe0] sm:$0xff]  ;;  %v3812_v19 = vld [vmem:[#allocation6 + $0xf8] sm:$0xff]  ;;  %v3811_v13 = vld [vmem:[#allocation6 + $0xf0] sm:$0xff] }
 0x383   : > { %v3639_v3 = vmul.f32 0.1, %v3607_v59  ;;  %v3608_v50 = vadd.f32 %v14252_v57, %v3572_v41  ;;  %11908 = vmatprep.subr.bf16.mxu1 %v14366_v56  ;;  %v3675_v57 = vld [vmem:[#allocation6] sm:$0xff]  ;;  %v3928_v30 = vld [vmem:[#allocation6 + $0x108] sm:$0xff]  ;;  %v3930_v43 = vld [vmem:[#allocation6 + $0x118] sm:$0xff] }
 0x384   : > { %v3642_v8 = vmul.f32 0.1, %v3610_v36  ;;  %11910 = vmatpush3.bf16.msra.mxu1 %v14292_v17  ;;  %v3673_v58 = vmax.f32 %v3609_v7, %v3641_v12  ;;  %v3927_v49 = vld [vmem:[#allocation6 + $0x100] sm:$0xff]  ;;  %v3929_v7 = vld [vmem:[#allocation6 + $0x110] sm:$0xff]  ;;  %v3932_v27 = vld [vmem:[#allocation6 + $0x128] sm:$0xff] }
 0x385   : > { %v3640_v22 = vmul.f32 0.1, %v3608_v50  ;;  %11912 = vmatprep.subr.bf16.mxu1 %v14362_v52  ;;  %v3671_v34 = vmax.f32 %v3607_v59, %v3639_v3  ;;  %v3931_v59 = vld [vmem:[#allocation6 + $0x120] sm:$0xff]  ;;  %v3934_v41 = vld [vmem:[#allocation6 + $0x138] sm:$0xff] }
 0x386   : > { %v3674_v39 = vmax.f32 %v3610_v36, %v3642_v8  ;;  %v4060_v12 = vld [vmem:[#allocation6 + $0x198] sm:$0xff]  ;;  %v4062_v36 = vld [vmem:[#allocation6 + $0x1a8] sm:$0xff]  ;;  %v4061_v3 = vld [vmem:[#allocation6 + $0x1a0] sm:$0xff] }
 0x387   : > { %v3672_v18 = vmax.f32 %v3608_v50, %v3640_v22  ;;  %v4064_v50 = vld [vmem:[#allocation6 + $0x1b8] sm:$0xff]  ;;  %v4066_v8 = vld [vmem:[#allocation6 + $0x1c8] sm:$0xff]  ;;  %v4065_v22 = vld [vmem:[#allocation6 + $0x1c0] sm:$0xff] }
 0x388   : > { %11914 = vmatpush3.bf16.msra.mxu1 %v14288_v47  ;;  %v14374_v60 = vpack.c.bf16 %v3674_v39, %v3673_v58  ;;  %v4068_v58 = vld [vmem:[#allocation6 + $0x1d8] sm:$0xff]  ;;  %v4070_v39 = vld [vmem:[#allocation6 + $0x1e8] sm:$0xff] }
 0x389   : > { %v14376_v25 = vpack.c.bf16 %v3672_v18, %v3671_v34  ;;  %v4069_v34 = vld [vmem:[#allocation6 + $0x1e0] sm:$0xff]  ;;  %v4072_v18 = vld [vmem:[#allocation6 + $0x1f8] sm:$0xff] }
 0x38b   : > { %11916 = vmatprep.subr.bf16.mxu1 %v14376_v25 }
 0x38c   : > { %11918 = vmatpush3.bf16.msra.mxu1 %v14304_v23 }
 0x38d   : > { %11920 = vmatprep.subr.bf16.mxu1 %v14374_v60 }
 0x390   : > { %11922 = vmatpush3.bf16.msra.mxu1 %v14300_v1 }
 0x391   : > { %11924 = vmatprep.subr.bf16.mxu1 %v14326_v55 }
 0x393   : > { %3756 = vmatmul.mubr.f32.vlgmr.msra.gmra.mrb[16].mxu1 %v3675_v57  ;;  %v12749_v57 = vld [vmem:[%s15780_s2 + $0x48] sm:$0xff]  }
 0x394   : > { %11926 = vmatpush3.bf16.msra.mxu1 %v14268_v16  ;;  %3760 = vmatprep.mubr.f32.mxu1 %v3678_v42  ;;  %v12750_v42 = vld [vmem:[%s15780_s2 + $0x50] sm:$0xff]  }
 0x395   : > { %11928 = vmatprep.subr.bf16.mxu1 %v14322_v2 }
 0x397   : > { %3761 = vmatmul.mubr.f32.gmra.mrb[18].mxu1 %v3677_v4  ;;  %v12751_v4 = vld [vmem:[%s15780_s2 + $0x58] sm:$0xff]  }
 0x398   : > { %11930 = vmatpush3.bf16.msra.mxu1 %v14264_v24  ;;  %3765 = vmatprep.mubr.f32.mxu1 %v3680_v31  ;;  %v12752_v31 = vld [vmem:[%s15780_s2 + $0x60] sm:$0xff]  }
 0x399   : > { %11932 = vmatprep.subr.bf16.mxu1 %v14346_v10 }
 0x39b   : > { %3766 = vmatmul.mubr.f32.gmra.mrb[20].mxu1 %v3679_v21  ;;  %v12753_v21 = vld [vmem:[%s15780_s2 + $0x68] sm:$0xff]  }
 0x39c   : > { %11934 = vmatpush3.bf16.msra.mxu1 %v14280_v15  ;;  %3770 = vmatprep.mubr.f32.mxu1 %v3682_v33  ;;  %v12754_v33 = vld [vmem:[%s15780_s2 + $0x70] sm:$0xff]  }
 0x39d   : > { %11936 = vmatprep.subr.bf16.mxu1 %v14342_v0 }
 0x39f   : > { %3771 = vmatmul.mubr.f32.gmra.mrb[22].mxu1 %v3681_v46  ;;  %v12755_v46 = vld [vmem:[%s15780_s2 + $0x78] sm:$0xff]  }
 0x3a0   : > { %11938 = vmatpush3.bf16.msra.mxu1 %v14276_v40  ;;  %3775 = vmatprep.mubr.f32.mxu1 %v3684_v37  ;;  %v14457_v37 = vld [vmem:[%s15780_s2] sm:$0xff]  }
 0x3a1   : > { %11940 = vmatprep.subr.bf16.mxu1 %v14366_v56 }
 0x3a3   : > { %3776 = vmatmul.mubr.f32.gmra.mrb[24].mxu1 %v3683_v53 }
 0x3a4   : > { %11942 = vmatpush3.bf16.msra.mxu1 %v14292_v17  ;;  %3780 = vmatprep.mubr.f32.mxu1 %v3686_v54 }
 0x3a5   : > { %11944 = vmatprep.subr.bf16.mxu1 %v14362_v52 }
 0x3a7   : > { %3781 = vmatmul.mubr.f32.gmra.mrb[26].mxu1 %v3685_v26 }
 0x3a8   : > { %11946 = vmatpush3.bf16.msra.mxu1 %v14288_v47  ;;  %3785 = vmatprep.mubr.f32.mxu1 %v3688_v38 }
 0x3a9   : > { %11948 = vmatprep.subr.bf16.mxu1 %v14376_v25 }
 0x3ab   : > { %3786 = vmatmul.mubr.f32.gmra.mrb[28].mxu1 %v3687_v29 }
 0x3ac   : > { %11950 = vmatpush3.bf16.msra.mxu1 %v14304_v23  ;;  %3790 = vmatprep.mubr.f32.mxu1 %v3690_v14 }
 0x3ad   : > { %11952 = vmatprep.subr.bf16.mxu1 %v14374_v60 }
 0x3af   : > { %3791 = vmatmul.mubr.f32.gmra.mrb[30].mxu1 %v3689_v35 }
 0x3b0   : > { %11954 = vmatpush3.bf16.msra.mxu1 %v14300_v1  ;;  %3877 = vmatprep.mubr.f32.mxu1 %v3798_v9 }
 0x3b1   : > { %11956 = vmatprep.subr.bf16.mxu1 %v14326_v55 }
 0x3b3   : > { %3878 = vmatmul.mubr.f32.vlgmr.msra.gmra.mrb[32].mxu1 %v3797_v51 }
 0x3b4   : > { %11958 = vmatpush3.bf16.msra.mxu1 %v14268_v16  ;;  %3882 = vmatprep.mubr.f32.mxu1 %v3800_v11 }
 0x3b5   : > { %11960 = vmatprep.subr.bf16.mxu1 %v14322_v2 }
 0x3b7   : > { %3883 = vmatmul.mubr.f32.gmra.mrb[34].mxu1 %v3799_v48 }
 0x3b8   : > { %11962 = vmatpush3.bf16.msra.mxu1 %v14264_v24  ;;  %3887 = vmatprep.mubr.f32.mxu1 %v3802_v28 }
 0x3b9   : > { %11964 = vmatprep.subr.bf16.mxu1 %v14346_v10 }
 0x3bb   : > { %3888 = vmatmul.mubr.f32.gmra.mrb[36].mxu1 %v3801_v45 }
 0x3bc   : > { %11966 = vmatpush3.bf16.msra.mxu1 %v14280_v15  ;;  %3892 = vmatprep.mubr.f32.mxu1 %v3804_v62 }
 0x3bd   : > { %11968 = vmatprep.subr.bf16.mxu1 %v14342_v0 }
 0x3bf   : > { %3893 = vmatmul.mubr.f32.gmra.mrb[38].mxu1 %v3803_v5 }
 0x3c0   : > { %11970 = vmatpush3.bf16.msra.mxu1 %v14276_v40  ;;  %3897 = vmatprep.mubr.f32.mxu1 %v3806_v61 }
 0x3c1   : > { %11972 = vmatprep.subr.bf16.mxu1 %v14366_v56 }
 0x3c3   : > { %3898 = vmatmul.mubr.f32.gmra.mrb[40].mxu1 %v3805_v44 }
 0x3c4   : > { %11974 = vmatpush3.bf16.msra.mxu1 %v14292_v17  ;;  %3902 = vmatprep.mubr.f32.mxu1 %v3808_v32 }
 0x3c5   : > { %11976 = vmatprep.subr.bf16.mxu1 %v14362_v52 }
 0x3c7   : > { %3903 = vmatmul.mubr.f32.gmra.mrb[42].mxu1 %v3807_v63 }
 0x3c8   : > { %11978 = vmatpush3.bf16.msra.mxu1 %v14288_v47  ;;  %3907 = vmatprep.mubr.f32.mxu1 %v3810_v20 }
 0x3c9   : > { %11980 = vmatprep.subr.bf16.mxu1 %v14376_v25 }
 0x3cb   : > { %3908 = vmatmul.mubr.f32.gmra.mrb[44].mxu1 %v3809_v6 }
 0x3cc   : > { %11982 = vmatpush3.bf16.msra.mxu1 %v14304_v23  ;;  %3912 = vmatprep.mubr.f32.mxu1 %v3812_v19 }
 0x3cd   : > { %11984 = vmatprep.subr.bf16.mxu1 %v14374_v60 }
 0x3cf   : > { %3913 = vmatmul.mubr.f32.gmra.mrb[46].mxu1 %v3811_v13 }
 0x3d0   : > { %11986 = vmatpush3.bf16.msra.mxu1 %v14300_v1  ;;  %4007 = vmatprep.mubr.f32.mxu1 %v3928_v30 }
 0x3d1   : > { %11988 = vmatprep.subr.bf16.mxu1 %v14326_v55  ;;  %v3933_v55 = vld [vmem:[#allocation6 + $0x130] sm:$0xff] }
 0x3d3   : > { %4008 = vmatmul.mubr.f32.vlgmr.msra.gmra.mrb[48].mxu1 %v3927_v49 }
 0x3d4   : > { %11990 = vmatpush3.bf16.msra.mxu1 %v14268_v16  ;;  %4012 = vmatprep.mubr.f32.mxu1 %v3930_v43  ;;  %v3936_v16 = vld [vmem:[#allocation6 + $0x148] sm:$0xff] }
 0x3d5   : > { %11992 = vmatprep.subr.bf16.mxu1 %v14322_v2  ;;  %v3935_v2 = vld [vmem:[#allocation6 + $0x140] sm:$0xff] }
 0x3d7   : > { %4013 = vmatmul.mubr.f32.gmra.mrb[50].mxu1 %v3929_v7 }
 0x3d8   : > { %11994 = vmatpush3.bf16.msra.mxu1 %v14264_v24  ;;  %4017 = vmatprep.mubr.f32.mxu1 %v3932_v27  ;;  %v3938_v24 = vld [vmem:[#allocation6 + $0x158] sm:$0xff] }
 0x3d9   : > { %11996 = vmatprep.subr.bf16.mxu1 %v14346_v10  ;;  %v3937_v10 = vld [vmem:[#allocation6 + $0x150] sm:$0xff] }
 0x3db   : > { %4018 = vmatmul.mubr.f32.gmra.mrb[52].mxu1 %v3931_v59 }
 0x3dc   : > { %11998 = vmatpush3.bf16.msra.mxu1 %v14280_v15  ;;  %4022 = vmatprep.mubr.f32.mxu1 %v3934_v41  ;;  %v3940_v15 = vld [vmem:[#allocation6 + $0x168] sm:$0xff] }
 0x3dd   : > { %12000 = vmatprep.subr.bf16.mxu1 %v14342_v0  ;;  %v3939_v0 = vld [vmem:[#allocation6 + $0x160] sm:$0xff] }
 0x3df   : > { %4023 = vmatmul.mubr.f32.gmra.mrb[54].mxu1 %v3933_v55 }
 0x3e0   : > { %12002 = vmatpush3.bf16.msra.mxu1 %v14276_v40  ;;  %4027 = vmatprep.mubr.f32.mxu1 %v3936_v16  ;;  %v3942_v40 = vld [vmem:[#allocation6 + $0x178] sm:$0xff] }
 0x3e1   : > { %12004 = vmatprep.subr.bf16.mxu1 %v14366_v56  ;;  %v3941_v56 = vld [vmem:[#allocation6 + $0x170] sm:$0xff] }
 0x3e3   : > { %4028 = vmatmul.mubr.f32.gmra.mrb[56].mxu1 %v3935_v2 }
 0x3e4   : > { %12006 = vmatpush3.bf16.msra.mxu1 %v14292_v17  ;;  %4032 = vmatprep.mubr.f32.mxu1 %v3938_v24  ;;  %v4058_v17 = vld [vmem:[#allocation6 + $0x188] sm:$0xff] }
 0x3e5   : > { %12008 = vmatprep.subr.bf16.mxu1 %v14362_v52  ;;  %v4057_v52 = vld [vmem:[#allocation6 + $0x180] sm:$0xff] }
 0x3e7   : > { %4033 = vmatmul.mubr.f32.gmra.mrb[58].mxu1 %v3937_v10 }
 0x3e8   : > { %12010 = vmatpush3.bf16.msra.mxu1 %v14288_v47  ;;  %4037 = vmatprep.mubr.f32.mxu1 %v3940_v15  ;;  %v4059_v47 = vld [vmem:[#allocation6 + $0x190] sm:$0xff] }
 0x3e9   : > { %12012 = vmatprep.subr.bf16.mxu1 %v14376_v25  ;;  %v12748_v25 = vld [vmem:[%s15780_s2 + $0x40] sm:$0xff]  }
 0x3eb   : > { %4038 = vmatmul.mubr.f32.gmra.mrb[60].mxu1 %v3939_v0 }
 0x3ec   : > { %12014 = vmatpush3.bf16.msra.mxu1 %v14304_v23  ;;  %4042 = vmatprep.mubr.f32.mxu1 %v3942_v40  ;;  %v4063_v23 = vld [vmem:[#allocation6 + $0x1b0] sm:$0xff] }
 0x3ed   : > { %12016 = vmatprep.subr.bf16.mxu1 %v14374_v60  ;;  %v4071_v60 = vld [vmem:[#allocation6 + $0x1f0] sm:$0xff] }
 0x3ef   : > { %4043 = vmatmul.mubr.f32.gmra.mrb[62].mxu1 %v3941_v56 }
 0x3f0   : > { %12018 = vmatpush3.bf16.msra.mxu1 %v14300_v1  ;;  %4137 = vmatprep.mubr.f32.mxu1 %v4058_v17  ;;  %v4067_v1 = vld [vmem:[#allocation6 + $0x1d0] sm:$0xff] }
 0x3f1   : > { %11107 = vmatprep.subr.bf16.mxu1 %v12748_v25 }
 0x3f3   : > { %4138 = vmatmul.mubr.f32.vlgmr.msra.gmra.mrb[64].mxu1 %v4057_v52 }
 0x3f4   : > { %4142 = vmatprep.mubr.f32.mxu1 %v4060_v12  ;;  %11108 = vmatpush3.bf16.msra.mxu1 %v12748_v25 }
 0x3f5   : > { %11109 = vmatprep.subr.bf16.mxu1 %v12749_v57 }
 0x3f7   : > { %4143 = vmatmul.mubr.f32.gmra.mrb[66].mxu1 %v4059_v47 }
 0x3f8   : > { %4147 = vmatprep.mubr.f32.mxu1 %v4062_v36  ;;  %11110 = vmatpush3.bf16.msra.mxu1 %v12749_v57 }
 0x3f9   : > { %11111 = vmatprep.subr.bf16.mxu1 %v12750_v42 }
 0x3fb   : > { %4148 = vmatmul.mubr.f32.gmra.mrb[68].mxu1 %v4061_v3 }
 0x3fc   : > { %4152 = vmatprep.mubr.f32.mxu1 %v4064_v50  ;;  %11112 = vmatpush3.bf16.msra.mxu1 %v12750_v42 }
 0x3fd   : > { %11113 = vmatprep.subr.bf16.mxu1 %v12751_v4 }
 0x3ff   : > { %4153 = vmatmul.mubr.f32.gmra.mrb[70].mxu1 %v4063_v23 }
 0x400   : > { %4157 = vmatprep.mubr.f32.mxu1 %v4066_v8  ;;  %11114 = vmatpush3.bf16.msra.mxu1 %v12751_v4 }
 0x401   : > { %11115 = vmatprep.subr.bf16.mxu1 %v12752_v31 }
 0x403   : > { %4158 = vmatmul.mubr.f32.gmra.mrb[72].mxu1 %v4065_v22 }
 0x404   : > { %4162 = vmatprep.mubr.f32.mxu1 %v4068_v58  ;;  %11116 = vmatpush3.bf16.msra.mxu1 %v12752_v31 }
 0x405   : > { %11117 = vmatprep.subr.bf16.mxu1 %v12753_v21 }
 0x407   : > { %4163 = vmatmul.mubr.f32.gmra.mrb[74].mxu1 %v4067_v1 }
 0x408   : > { %4167 = vmatprep.mubr.f32.mxu1 %v4070_v39  ;;  %11118 = vmatpush3.bf16.msra.mxu1 %v12753_v21 }
 0x409   : > { %11119 = vmatprep.subr.bf16.mxu1 %v12754_v33 }
 0x40b   : > { %4168 = vmatmul.mubr.f32.gmra.mrb[76].mxu1 %v4069_v34 }
 0x40c   : > { %4172 = vmatprep.mubr.f32.mxu1 %v4072_v18  ;;  %11120 = vmatpush3.bf16.msra.mxu1 %v12754_v33 }
 0x40d   : > { %11121 = vmatprep.subr.bf16.mxu1 %v12755_v46 }
 0x40f   : > { %4173 = vmatmul.mubr.f32.gmra.mrb[78].mxu1 %v4071_v60 }
 0x410   : > { %11122 = vmatpush3.bf16.msra.mxu1 %v12755_v46 }
 0x411   : > { %11131 = vmatprep.subr.bf16.mxu1 %v14457_v37 }
 0x466   : > { %v10093_v53 = vpop.f32.mrb[16].mxu1 }
 0x467   : > { %v10094_v54 = vpop.f32.mrb[17].mxu1 }
 0x468   : > { %v10095_v26 = vadd.f32 %v10094_v54, %v10093_v53 }
 0x46a   : > { %v10096_v38 = vpop.f32.mrb[18].mxu1 }
 0x46b   : > { %v10097_v29 = vpop.f32.mrb[19].mxu1 }
 0x46c   : > { %v10098_v14 = vadd.f32 %v10097_v29, %v10096_v38 }
 0x46e   : > { %v10099_v35 = vpop.f32.mrb[20].mxu1 }
 0x46f   : > { %v10100_v9 = vpop.f32.mrb[21].mxu1 }
 0x470   : > { %v10101_v51 = vadd.f32 %v10100_v9, %v10099_v35 }
 0x472   : > { %v10102_v11 = vpop.f32.mrb[22].mxu1 }
 0x473   : > { %v10103_v48 = vpop.f32.mrb[23].mxu1 }
 0x474   : > { %v10104_v28 = vadd.f32 %v10103_v48, %v10102_v11 }
 0x476   : > { %v10105_v45 = vpop.f32.mrb[24].mxu1 }
 0x477   : > { %v10106_v62 = vpop.f32.mrb[25].mxu1 }
 0x478   : > { %v10107_v5 = vadd.f32 %v10106_v62, %v10105_v45 }
 0x47a   : > { %v10108_v61 = vpop.f32.mrb[26].mxu1 }
 0x47b   : > { %v10109_v44 = vpop.f32.mrb[27].mxu1 }
 0x47c   : > { %v14460_v32 = vadd.f32 %v10109_v44, %v10108_v61 }
 0x47e   : > { %v10111_v63 = vpop.f32.mrb[28].mxu1 }
 0x47f   : > { %v10112_v20 = vpop.f32.mrb[29].mxu1 }
 0x480   : > { %v14462_v6 = vadd.f32 %v10112_v20, %v10111_v63 }
 0x482   : > { %v10114_v19 = vpop.f32.mrb[30].mxu1 }
 0x483   : > { %v10115_v13 = vpop.f32.mrb[31].mxu1 }
 0x484   : > { %v14464_v30 = vadd.f32 %v10115_v13, %v10114_v19 }
 0x486   : > { %v10149_v49 = vpop.f32.mrb[32].mxu1 }
 0x487   : > { %v10150_v43 = vpop.f32.mrb[33].mxu1 }
 0x488   : > { %v10151_v7 = vadd.f32 %v10150_v43, %v10149_v49 }
 0x48a   : > { %v3918_v27 = vmax.f32 %v10095_v26, %v10151_v7  ;;  %v10152_v59 = vpop.f32.mrb[34].mxu1 }
 0x48b   : > { %v10153_v41 = vpop.f32.mrb[35].mxu1 }
 0x48c   : > { %v10154_v55 = vadd.f32 %v10153_v41, %v10152_v59  ;;  %v4250_v59 = vld [vmem:[#allocation2 + $0x1] sm:$0xff] }
 0x48e   : > { %v3919_v16 = vmax.f32 %v10098_v14, %v10154_v55  ;;  %v10155_v2 = vpop.f32.mrb[36].mxu1 }
 0x48f   : > { %v10156_v24 = vpop.f32.mrb[37].mxu1 }
 0x490   : > { %v10157_v10 = vadd.f32 %v10156_v24, %v10155_v2 }
 0x492   : > { %v3920_v15 = vmax.f32 %v10101_v51, %v10157_v10  ;;  %v10158_v0 = vpop.f32.mrb[38].mxu1 }
 0x493   : > { %v10159_v40 = vpop.f32.mrb[39].mxu1 }
 0x494   : > { %v10160_v56 = vadd.f32 %v10159_v40, %v10158_v0 }
 0x496   : > { %v3921_v17 = vmax.f32 %v10104_v28, %v10160_v56  ;;  %v10161_v52 = vpop.f32.mrb[40].mxu1 }
 0x497   : > { %v10162_v12 = vpop.f32.mrb[41].mxu1 }
 0x498   : > { %v10163_v47 = vadd.f32 %v10162_v12, %v10161_v52 }
 0x49a   : > { %v3922_v36 = vmax.f32 %v10107_v5, %v10163_v47  ;;  %v10164_v3 = vpop.f32.mrb[42].mxu1 }
 0x49b   : > { %v10165_v50 = vpop.f32.mrb[43].mxu1 }
 0x49c   : > { %v10166_v23 = vadd.f32 %v10165_v50, %v10164_v3  ;;  %v12757_v50 = vld [vmem:[%s15780_s2 + $0x8] sm:$0xff]  }
 0x49e   : > { %v3923_v8 = vmax.f32 %v14460_v32, %v10166_v23  ;;  %v10167_v22 = vpop.f32.mrb[44].mxu1  ;;  %v14494_v23 = vld [vmem:[#allocation2 + $0x111] sm:$0xff] }
 0x49f   : > { %v10168_v58 = vpop.f32.mrb[45].mxu1 }
 0x4a0   : > { %v10169_v1 = vadd.f32 %v10168_v58, %v10167_v22 }
 0x4a2   : > { %v3924_v39 = vmax.f32 %v14462_v6, %v10169_v1  ;;  %v10170_v34 = vpop.f32.mrb[46].mxu1 }
 0x4a3   : > { %v10171_v18 = vpop.f32.mrb[47].mxu1 }
 0x4a4   : > { %v10172_v60 = vadd.f32 %v10171_v18, %v10170_v34 }
 0x4a6   : > { %v3925_v25 = vmax.f32 %v14464_v30, %v10172_v60  ;;  %v10205_v57 = vpop.f32.mrb[48].mxu1 }
 0x4a7   : > { %v10206_v42 = vpop.f32.mrb[49].mxu1 }
 0x4a8   : > { %v10207_v4 = vadd.f32 %v10206_v42, %v10205_v57 }
 0x4aa   : > { %v4048_v31 = vmax.f32 %v3918_v27, %v10207_v4  ;;  %v10208_v21 = vpop.f32.mrb[50].mxu1 }
 0x4ab   : > { %v10209_v33 = vpop.f32.mrb[51].mxu1 }
 0x4ac   : > { %v10210_v46 = vadd.f32 %v10209_v33, %v10208_v21  ;;  %v12759_v21 = vld [vmem:[%s15780_s2 + $0x18] sm:$0xff]   ;;  %v16052_v33 = vld [vmem:[#allocation19_spill] sm:$0xff] }
 0x4ae   : > { %v4049_v53 = vmax.f32 %v3919_v16, %v10210_v46  ;;  %v10211_v54 = vpop.f32.mrb[52].mxu1  ;;  %v4198_v46 = vand.u32 7, %v16052_v33 }
 0x4af   : > { %v10212_v26 = vpop.f32.mrb[53].mxu1 }
 0x4b0   : > { %v10213_v38 = vadd.f32 %v10212_v26, %v10211_v54  ;;  %vm4214_vm14 = vcmp.gt.s32.totalorder %v4198_v46, 0  ;;  %vm4513_vm5 = vcmp.lt.s32.totalorder %v4198_v46, 7  ;;  %v12767_v46 = vld [vmem:[%s15780_s2 + $0x98] sm:$0xff]  }
 0x4b2   : > { %v4050_v29 = vmax.f32 %v3920_v15, %v10213_v38  ;;  %v10214_v14 = vpop.f32.mrb[54].mxu1 }
 0x4b3   : > { %v10215_v35 = vpop.f32.mrb[55].mxu1 }
 0x4b4   : > { %v10216_v9 = vadd.f32 %v10215_v35, %v10214_v14  ;;  %v12760_v35 = vld [vmem:[%s15780_s2 + $0x20] sm:$0xff]  }
 0x4b6   : > { %v4051_v51 = vmax.f32 %v3921_v17, %v10216_v9  ;;  %v10217_v11 = vpop.f32.mrb[56].mxu1 }
 0x4b7   : > { %v10218_v48 = vpop.f32.mrb[57].mxu1 }
 0x4b8   : > { %v10219_v28 = vadd.f32 %v10218_v48, %v10217_v11 }
 0x4ba   : > { %v4052_v45 = vmax.f32 %v3922_v36, %v10219_v28  ;;  %v10220_v62 = vpop.f32.mrb[58].mxu1 }
 0x4bb   : > { %v10221_v5 = vpop.f32.mrb[59].mxu1 }
 0x4bc   : > { %v10222_v61 = vadd.f32 %v10221_v5, %v10220_v62 }
 0x4be   : > { %v4053_v44 = vmax.f32 %v3923_v8, %v10222_v61  ;;  %v10223_v32 = vpop.f32.mrb[60].mxu1 }
 0x4bf   : > { %v10224_v63 = vpop.f32.mrb[61].mxu1 }
 0x4c0   : > { %v10225_v20 = vadd.f32 %v10224_v63, %v10223_v32  ;;  %v12761_v32 = vld [vmem:[%s15780_s2 + $0x28] sm:$0xff]  }
 0x4c2   : > { %v14469_v6 = vmax.f32 %v3924_v39, %v10225_v20  ;;  %v10226_v19 = vpop.f32.mrb[62].mxu1  ;;  %v12758_v39 = vld [vmem:[%s15780_s2 + $0x10] sm:$0xff]  }
 0x4c3   : > { %v10227_v13 = vpop.f32.mrb[63].mxu1 }
 0x4c4   : > { %v10228_v30 = vadd.f32 %v10227_v13, %v10226_v19  ;;  %v12762_v19 = vld [vmem:[%s15780_s2 + $0x30] sm:$0xff]  }
 0x4c6   : > { %v14471_v49 = vmax.f32 %v3925_v25, %v10228_v30  ;;  %v10261_v43 = vpop.f32.mrb[64].mxu1 }
 0x4c7   : > { %v10262_v7 = vpop.f32.mrb[65].mxu1 }
 0x4c8   : > { %v10263_v27 = vadd.f32 %v10262_v7, %v10261_v43  ;;  %v12763_v43 = vld [vmem:[%s15780_s2 + $0x38] sm:$0xff]   ;;  %v16056_v7 = vld [vmem:[#allocation20_spill] sm:$0xff] }
 0x4ca   : > { %v14473_v41 = vmax.f32 %v4048_v31, %v10263_v27  ;;  %v10264_v55 = vpop.f32.mrb[66].mxu1  ;;  %v4200_v27 = vand.u32 7, %v16056_v7 }
 0x4cb   : > { %v10265_v16 = vpop.f32.mrb[67].mxu1 }
 0x4cc   : > { %4190 = vst [vmem:[#allocation2 + $0x9] sm:$0xff] %v14473_v41  ;;  %v10266_v2 = vadd.f32 %v10265_v16, %v10264_v55  ;;  %v4258_v24 = vpack.c.bf16 %v14473_v41, %v4250_v59  ;;  %v16057_v59 = vld [vmem:[#allocation24_spill] sm:$0xff]  ;;  %vm4216_vm3 = vcmp.gt.s32.totalorder %v4200_v27, 0  ;;  %vm4515_vm1 = vcmp.lt.s32.totalorder %v4200_v27, 7  ;;  %v12773_v27 = vld [vmem:[%s15780_s2 + $0xc8] sm:$0xff]  }
 0x4cd   : > { %v4201_v55 = vand.u32 7, %v16057_v59  ;;  %v9441_v59 = vld [vmem:[%s15785_s7 + $0x1] ss:$0 sm:$0xff] }
 0x4ce   : > { %v14477_v10 = vmax.f32 %v4049_v53, %v10266_v2  ;;  %v10267_v15 = vpop.f32.mrb[68].mxu1  ;;  %11123 = vmatprep.mubr.bf16.mxu1 %v4258_v24  ;;  %v16053_v53 = vld [vmem:[#allocation23_spill] sm:$0xff]  ;;  %v16058_v2 = vld [vmem:[#allocation21_spill] sm:$0xff] }
 0x4cf   : > { %v10268_v0 = vpop.f32.mrb[69].mxu1  ;;  %v4199_v54 = vand.u32 7, %v16053_v53  ;;  %v4202_v24 = vand.u32 7, %v16058_v2  ;;  %vm4217_vm4 = vcmp.gt.s32.totalorder %v4201_v55, 0  ;;  %v12774_v2 = vld [vmem:[%s15780_s2 + $0xd0] sm:$0xff]  }
 0x4d0   : > { %4191 = vst [vmem:[#allocation2 + $0x11] sm:$0xff] %v14477_v10  ;;  %v10269_v40 = vadd.f32 %v10268_v0, %v10267_v15  ;;  %v4837_v56 = vpack.c.bf16 %v14477_v10, %v14473_v41  ;;  %v16059_v15 = vld [vmem:[#allocation25_spill] sm:$0xff]  ;;  %vm14594_vm7 = vmpackc.low %vm4217_vm4, %vm4216_vm3 }
 0x4d1   : > { %vm4215_vm12 = vcmp.gt.s32.totalorder %v4199_v54, 0  ;;  %v4203_v0 = vand.u32 7, %v16059_v15  ;;  %vm4218_vm8 = vcmp.gt.s32.totalorder %v4202_v24, 0  ;;  %vm4514_vm6 = vcmp.lt.s32.totalorder %v4199_v54, 7  ;;  %v12787_v41 = vld [vmem:[%s15780_s2 + $0x138] sm:$0xff]  }
 0x4d2   : > { %v14482_v17 = vmax.f32 %v4050_v29, %v10269_v40  ;;  %v10270_v52 = vpop.f32.mrb[70].mxu1  ;;  %vm14553_vm11 = vmpackc.low %vm4215_vm12, %vm4214_vm14  ;;  %v12764_v40 = vld [vmem:[%s15780_s2 + $0x80] sm:$0xff]   ;;  %vm4516_vm14 = vcmp.lt.s32.totalorder %v4201_v55, 7  ;;  %vm4517_vm12 = vcmp.lt.s32.totalorder %v4202_v24, 7 }
 0x4d3   : > { %v10271_v12 = vpop.f32.mrb[71].mxu1  ;;  %v14484_v47 = vld [vmem:[#allocation2 + $0x2] sm:$0xff]  ;;  %vm4219_vm10 = vcmp.gt.s32.totalorder %v4203_v0, 0  ;;  %vm14644_vm15 = vmpackc.low %vm4514_vm6, %vm4513_vm5  ;;  %vm4518_vm3 = vcmp.lt.s32.totalorder %v4203_v0, 7 }
 0x4d4   : > { %4192 = vst [vmem:[#allocation2 + $0x19] sm:$0xff] %v14482_v17  ;;  %v10272_v36 = vadd.f32 %v10271_v12, %v10270_v52  ;;  %v14489_v3 = vpack.c.bf16 %v14482_v17, %v14477_v10  ;;  %6761 = vst [vmem:[#allocation2] sm:$0x1f] %v14494_v23  ;;  %v14542_v48 = vld [vmem:[#allocation2 + $0x8] sm:$0xff]  ;;  %v12788_v10 = vld [vmem:[%s15780_s2 + $0x140] sm:$0xff]  }
 0x4d5   : > { %v9201_v20 = vpack.c.bf16 %v14542_v48, %v14494_v23  ;;  %vm14604_vm0 = vmpackc.low %vm4219_vm10, %vm4218_vm8  ;;  %v12807_v12 = vld [vmem:[%s15780_s2 + $0x1d8] sm:$0xff]  }
 0x4d6   : > { %v14497_v8 = vmax.f32 %v4051_v51, %v10272_v36  ;;  %v10273_v22 = vpop.f32.mrb[72].mxu1  ;;  %11124 = vmatmul.mubr.bf16.vlgmr.msra.gmra.mrb[80].mxu1 %v14489_v3  ;;  %vm14673_vm4 = vmpackc.low %vm4516_vm14, %vm4515_vm1 }
 0x4d7   : > { %v10274_v58 = vpop.f32.mrb[73].mxu1  ;;  %11132 = vmatpush3.bf16.msra.mxu1 %v14457_v37  ;;  %v14509_v57 = vld [vmem:[#allocation2 + $0x10] sm:$0xff]  ;;  %vm14681_vm8 = vmpackc.low %vm4518_vm3, %vm4517_vm12 }
 0x4d8   : > { %4193 = vst [vmem:[#allocation2 + $0x21] sm:$0xff] %v14497_v8  ;;  %v10275_v1 = vadd.f32 %v10274_v58, %v10273_v22  ;;  %11133 = vmatprep.subr.bf16.mxu1 %v12757_v50  ;;  %v4838_v34 = vpack.c.bf16 %v14497_v8, %v14482_v17  ;;  %v12765_v58 = vld [vmem:[%s15780_s2 + $0x88] sm:$0xff]   ;;  %v12808_v22 = vld [vmem:[%s15780_s2 + $0x1e0] sm:$0xff]  }
 0x4da   : > { %v14507_v18 = vmax.f32 %v4052_v45, %v10275_v1  ;;  %v10276_v60 = vpop.f32.mrb[74].mxu1  ;;  %v16064_v1 = vld [vmem:[#allocation22_spill] sm:$0xff] }
 0x4db   : > { %v10277_v25 = vpop.f32.mrb[75].mxu1  ;;  %11134 = vmatpush3.bf16.msra.mxu1 %v12757_v50  ;;  %v14511_v42 = vld [vmem:[#allocation2 + $0x18] sm:$0xff] }
 0x4dc   : > { %v14513_v37 = vld [vmem:[#allocation2 + $0x12] sm:$0xff]  ;;  %4194 = vst [vmem:[#allocation2 + $0x29] sm:$0xff] %v14507_v18  ;;  %v10278_v4 = vadd.f32 %v10277_v25, %v10276_v60  ;;  %11135 = vmatprep.subr.bf16.mxu1 %v12758_v39  ;;  %v14518_v31 = vpack.c.bf16 %v14507_v18, %v14497_v8  ;;  %v14600_v36 = vpack.c.bf16 %v14511_v42, %v14509_v57  ;;  %v16065_v60 = vld [vmem:[#allocation26_spill] sm:$0xff] }
 0x4dd   : > { %6762 = vst [vmem:[#allocation2 + $0x15] sm:$0x1f] %v14494_v23  ;;  %v4205_v25 = vand.u32 7, %v16065_v60  ;;  %v12780_v60 = vld [vmem:[%s15780_s2 + $0x100] sm:$0xff]  }
 0x4de   : > { %v14526_v26 = vmax.f32 %v4053_v44, %v10278_v4  ;;  %v10279_v38 = vpop.f32.mrb[76].mxu1  ;;  %11127 = vmatprep.mubr.bf16.mxu1 %v14518_v31  ;;  %v12792_v8 = vld [vmem:[%s15780_s2 + $0x160] sm:$0xff]   ;;  %v12803_v44 = vld [vmem:[%s15780_s2 + $0x1b8] sm:$0xff]  }
 0x4df   : > { %v10280_v29 = vpop.f32.mrb[77].mxu1  ;;  %11136 = vmatpush3.bf16.msra.mxu1 %v12758_v39  ;;  %v14544_v45 = vld [vmem:[#allocation2 + $0x1a] sm:$0xff]  ;;  %v4204_v39 = vand.u32 7, %v16064_v1  ;;  %vm4221_vm2 = vcmp.gt.s32.totalorder %v4205_v25, 0 }
 0x4e0   : > { %4195 = vst [vmem:[#allocation2 + $0x31] sm:$0xff] %v14526_v26  ;;  %v10281_v14 = vadd.f32 %v10280_v29, %v10279_v38  ;;  %11137 = vmatprep.subr.bf16.mxu1 %v12759_v21  ;;  %v4839_v9 = vpack.c.bf16 %v14526_v26, %v14507_v18  ;;  %v14602_v50 = vld [vmem:[#allocation2 + $0x20] sm:$0xff]  ;;  %v14632_v29 = vld [vmem:[#allocation2 + $0xa] sm:$0xff]  ;;  %v14679_v7 = vpack.c.bf16 %v14544_v45, %v14513_v37 }
 0x4e1   : > { %vm4220_vm13 = vcmp.gt.s32.totalorder %v4204_v39, 0  ;;  %v9237_v54 = vpack.c.bf16 %v14632_v29, %v14484_v47  ;;  %v12770_v47 = vld [vmem:[%s15780_s2 + $0xb0] sm:$0xff]   ;;  %vm4519_vm10 = vcmp.lt.s32.totalorder %v4204_v39, 7  ;;  %v12776_v1 = vld [vmem:[%s15780_s2 + $0xe0] sm:$0xff]   ;;  %v12777_v39 = vld [vmem:[%s15780_s2 + $0xe8] sm:$0xff]   ;;  %v9333_v17 = vpack.c.bf16 %v14513_v37, %v14632_v29 }
 0x4e2   : > { %v14540_v51 = vmax.f32 %v14469_v6, %v10281_v14  ;;  %v10282_v11 = vpop.f32.mrb[78].mxu1  ;;  %vm14636_vm9 = vmpackc.low %vm4221_vm2, %vm4220_vm13  ;;  %vm4520_vm13 = vcmp.lt.s32.totalorder %v4205_v25, 7  ;;  %v9276_v25 = vpack.c.bf16 %v14602_v50, %v14511_v42  ;;  %v12782_v42 = vld [vmem:[%s15780_s2 + $0x110] sm:$0xff]   ;;  %v12795_v37 = vld [vmem:[%s15780_s2 + $0x178] sm:$0xff]  }
 0x4e3   : > { %v10283_v28 = vpop.f32.mrb[79].mxu1  ;;  %11138 = vmatpush3.bf16.msra.mxu1 %v12759_v21  ;;  %v14546_v62 = vld [vmem:[#allocation2 + $0x22] sm:$0xff]  ;;  %v12766_v21 = vld [vmem:[%s15780_s2 + $0x90] sm:$0xff]   ;;  %vm14703_vm2 = vmpackc.low %vm4520_vm13, %vm4519_vm10 }
 0x4e4   : > { %4196 = vst [vmem:[#allocation2 + $0x39] sm:$0xff] %v14540_v51  ;;  %v10284_v5 = vadd.f32 %v10283_v28, %v10282_v11  ;;  %11139 = vmatprep.subr.bf16.mxu1 %v12760_v35  ;;  %v14551_v61 = vpack.c.bf16 %v14540_v51, %v14526_v26  ;;  %v9336_v63 = vpack.c.bf16 %v14546_v62, %v14544_v45  ;;  %v14592_v52 = vld [vmem:[#allocation2 + $0x28] sm:$0xff]  ;;  %v12794_v18 = vld [vmem:[%s15780_s2 + $0x170] sm:$0xff]   ;;  %v12796_v26 = vld [vmem:[%s15780_s2 + $0x180] sm:$0xff]  }
 0x4e5   : > { %v14615_v4 = vpack.c.bf16 %v14592_v52, %v14602_v50  ;;  %v12806_v29 = vld [vmem:[%s15780_s2 + $0x1d0] sm:$0xff]  }
 0x4e6   : > { %v14565_v6 = vmax.f32 %v14471_v49, %v10284_v5  ;;  %11128 = vmatmul.mubr.bf16.gmra.mrb[84].mxu1 %v14551_v61  ;;  %v12768_v5 = vld [vmem:[%s15780_s2 + $0xa0] sm:$0xff]   ;;  %v5452_v28 = vld [vmem:[#allocation2 + $0x4a] sm:$0xff] }
 0x4e7   : > { %11140 = vmatpush3.bf16.msra.mxu1 %v12760_v35  ;;  %11147 = vmatprep.mubr.msk.bf16.mxu1 %vm14553_vm11, %v9201_v20  ;;  %v14576_v30 = vld [vmem:[#allocation2 + $0x2a] sm:$0xff]  ;;  %v12771_v20 = vld [vmem:[%s15780_s2 + $0xb8] sm:$0xff]  }
 0x4e8   : > { %4197 = vst [vmem:[#allocation2 + $0x41] sm:$0xff] %v14565_v6  ;;  %11141 = vmatprep.subr.bf16.mxu1 %v12761_v32  ;;  %v4840_v13 = vpack.c.bf16 %v14565_v6, %v14540_v51  ;;  %v14634_v14 = vld [vmem:[#allocation2 + $0x30] sm:$0xff]  ;;  %v14690_v55 = vpack.c.bf16 %v14576_v30, %v14546_v62  ;;  %v12799_v62 = vld [vmem:[%s15780_s2 + $0x198] sm:$0xff]  }
 0x4e9   : > { %v12798_v51 = vld [vmem:[%s15780_s2 + $0x190] sm:$0xff]  }
 0x4ea   : > { %v12810_v35 = vld [vmem:[%s15780_s2 + $0x1f0] sm:$0xff]  }
 0x4eb   : > { %11142 = vmatpush3.bf16.msra.mxu1 %v12761_v32  ;;  %v14578_v49 = vld [vmem:[#allocation2 + $0x32] sm:$0xff]  ;;  %v12769_v32 = vld [vmem:[%s15780_s2 + $0xa8] sm:$0xff]  }
 0x4ec   : > { %11143 = vmatprep.subr.bf16.mxu1 %v12762_v19  ;;  %v9339_v16 = vpack.c.bf16 %v14578_v49, %v14576_v30  ;;  %v14626_v38 = vld [vmem:[#allocation2 + $0x38] sm:$0xff]  ;;  %v12801_v30 = vld [vmem:[%s15780_s2 + $0x1a8] sm:$0xff]  }
 0x4ed   : > { %v14642_v11 = vpack.c.bf16 %v14626_v38, %v14634_v14 }
 0x4ef   : > { %11144 = vmatpush3.bf16.msra.mxu1 %v12762_v19  ;;  %v12772_v19 = vld [vmem:[%s15780_s2 + $0xc0] sm:$0xff]  }
 0x4f0   : > { %11145 = vmatprep.subr.bf16.mxu1 %v12763_v43  ;;  %v14701_v24 = vld [vmem:[#allocation2 + $0x3a] sm:$0xff] }
 0x4f1   : > { %v14709_v0 = vpack.c.bf16 %v14701_v24, %v14578_v49  ;;  %v14750_v50 = vld [vmem:[#allocation2 + $0x40] sm:$0xff]  ;;  %v12802_v49 = vld [vmem:[%s15780_s2 + $0x1b0] sm:$0xff]  }
 0x4f3   : > { %11146 = vmatpush3.bf16.msra.mxu1 %v12763_v43 }
 0x4f4   : > { %11155 = vmatprep.subr.bf16.mxu1 %v12764_v40 }
 0x4f6   : > { %11148 = vmatmul.mubr.msk.bf16.vlgmr.msra.gmra.mrb[80].mxu1 %vm14594_vm7, %v14600_v36 }
 0x4f7   : > { %11151 = vmatprep.mubr.msk.bf16.mxu1 %vm14604_vm0, %v14615_v4  ;;  %11156 = vmatpush3.bf16.msra.mxu1 %v12764_v40  ;;  %v12775_v40 = vld [vmem:[%s15780_s2 + $0xd8] sm:$0xff]  }
 0x4f8   : > { %11157 = vmatprep.subr.bf16.mxu1 %v12765_v58 }
 0x4fb   : > { %11158 = vmatpush3.bf16.msra.mxu1 %v12765_v58  ;;  %v9273_v58 = vpack.c.bf16 %v14509_v57, %v14542_v48  ;;  %v12778_v57 = vld [vmem:[%s15780_s2 + $0xf0] sm:$0xff]   ;;  %v12779_v48 = vld [vmem:[%s15780_s2 + $0xf8] sm:$0xff]  }
 0x4fc   : > { %11159 = vmatprep.subr.bf16.mxu1 %v12766_v21 }
 0x4fe   : > { %11152 = vmatmul.mubr.msk.bf16.gmra.mrb[84].mxu1 %vm14636_vm9, %v14642_v11 }
 0x4ff   : > { %11160 = vmatpush3.bf16.msra.mxu1 %v12766_v21  ;;  %11171 = vmatprep.mubr.msk.bf16.mxu1 %vm14644_vm15, %v9237_v54  ;;  %v12781_v21 = vld [vmem:[%s15780_s2 + $0x108] sm:$0xff]   ;;  %v9282_v54 = vpack.c.bf16 %v14750_v50, %v14626_v38 }
 0x500   : > { %11161 = vmatprep.subr.bf16.mxu1 %v12767_v46  ;;  %v12785_v38 = vld [vmem:[%s15780_s2 + $0x128] sm:$0xff]  }
 0x503   : > { %11162 = vmatpush3.bf16.msra.mxu1 %v12767_v46  ;;  %v9279_v46 = vpack.c.bf16 %v14634_v14, %v14592_v52  ;;  %v12783_v52 = vld [vmem:[%s15780_s2 + $0x118] sm:$0xff]   ;;  %v12784_v14 = vld [vmem:[%s15780_s2 + $0x120] sm:$0xff]  }
 0x504   : > { %11163 = vmatprep.subr.bf16.mxu1 %v12768_v5 }
 0x507   : > { %11164 = vmatpush3.bf16.msra.mxu1 %v12768_v5  ;;  %v12786_v5 = vld [vmem:[%s15780_s2 + $0x130] sm:$0xff]  }
 0x508   : > { %11165 = vmatprep.subr.bf16.mxu1 %v12769_v32 }
 0x50b   : > { %11166 = vmatpush3.bf16.msra.mxu1 %v12769_v32  ;;  %v12790_v32 = vld [vmem:[%s15780_s2 + $0x150] sm:$0xff]  }
 0x50c   : > { %11167 = vmatprep.subr.bf16.mxu1 %v12770_v47 }
 0x50f   : > { %11168 = vmatpush3.bf16.msra.mxu1 %v12770_v47  ;;  %v12791_v47 = vld [vmem:[%s15780_s2 + $0x158] sm:$0xff]  }
 0x510   : > { %11169 = vmatprep.subr.bf16.mxu1 %v12771_v20 }
 0x513   : > { %11170 = vmatpush3.bf16.msra.mxu1 %v12771_v20  ;;  %v5144_v20 = vld [vmem:[#allocation2 + $0x48] sm:$0xff] }
 0x514   : > { %11179 = vmatprep.subr.bf16.mxu1 %v12772_v19 }
 0x516   : > { %11172 = vmatmul.mubr.msk.bf16.vlgmr.msra.gmra.mrb[80].mxu1 %vm14673_vm4, %v14679_v7 }
 0x517   : > { %11175 = vmatprep.mubr.msk.bf16.mxu1 %vm14681_vm8, %v14690_v55  ;;  %11180 = vmatpush3.bf16.msra.mxu1 %v12772_v19  ;;  %v9378_v19 = vpack.c.bf16 %v5144_v20, %v14750_v50 }
 0x518   : > { %11181 = vmatprep.subr.bf16.mxu1 %v12773_v27 }
 0x51b   : > { %11182 = vmatpush3.bf16.msra.mxu1 %v12773_v27  ;;  %v12813_v27 = vld [vmem:[%s15780_s2 + $0x208] sm:$0xff]  }
 0x51c   : > { %11183 = vmatprep.subr.bf16.mxu1 %v12774_v2 }
 0x51e   : > { %11176 = vmatmul.mubr.msk.bf16.gmra.mrb[84].mxu1 %vm14703_vm2, %v14709_v0 }
 0x51f   : > { %11184 = vmatpush3.bf16.msra.mxu1 %v12774_v2  ;;  %11195 = vmatprep.mubr.msk.bf16.mxu1 %vm14553_vm11, %v9273_v58  ;;  %v12814_v2 = vld [vmem:[%s15780_s2 + $0x210] sm:$0xff]   ;;  %v5645_v58 = vld [vmem:[#allocation8] sm:$0xff] }
 0x520   : > { %11185 = vmatprep.subr.bf16.mxu1 %v12775_v40 }
 0x523   : > { %11186 = vmatpush3.bf16.msra.mxu1 %v12775_v40  ;;  %v12815_v40 = vld [vmem:[%s15780_s2 + $0x218] sm:$0xff]  }
 0x524   : > { %11187 = vmatprep.subr.bf16.mxu1 %v12776_v1 }
 0x527   : > { %11188 = vmatpush3.bf16.msra.mxu1 %v12776_v1  ;;  %v9440_v1 = vld [vmem:[%s15784_s6 + $0x1] ss:$0 sm:$0xff] }
 0x528   : > { %11189 = vmatprep.subr.bf16.mxu1 %v12777_v39 }
 0x52b   : > { %11190 = vmatpush3.bf16.msra.mxu1 %v12777_v39 }
 0x52c   : > { %11191 = vmatprep.subr.bf16.mxu1 %v12778_v57 }
 0x52f   : > { %11192 = vmatpush3.bf16.msra.mxu1 %v12778_v57 }
 0x530   : > { %11193 = vmatprep.subr.bf16.mxu1 %v12779_v48 }
 0x533   : > { %11194 = vmatpush3.bf16.msra.mxu1 %v12779_v48 }
 0x534   : > { %11203 = vmatprep.subr.bf16.mxu1 %v12780_v60 }
 0x536   : > { %11196 = vmatmul.mubr.msk.bf16.vlgmr.msra.gmra.mrb[80].mxu1 %vm14594_vm7, %v9276_v25 }
 0x537   : > { %11199 = vmatprep.mubr.msk.bf16.mxu1 %vm14604_vm0, %v9279_v46  ;;  %11204 = vmatpush3.bf16.msra.mxu1 %v12780_v60 }
 0x538   : > { %11205 = vmatprep.subr.bf16.mxu1 %v12781_v21 }
 0x53b   : > { %11206 = vmatpush3.bf16.msra.mxu1 %v12781_v21 }
 0x53c   : > { %11207 = vmatprep.subr.bf16.mxu1 %v12782_v42 }
 0x53e   : > { %11200 = vmatmul.mubr.msk.bf16.gmra.mrb[84].mxu1 %vm14636_vm9, %v9282_v54 }
 0x53f   : > { %11208 = vmatpush3.bf16.msra.mxu1 %v12782_v42  ;;  %11219 = vmatprep.mubr.bf16.mxu1 %v4837_v56  ;;  %v12789_v56 = vld [vmem:[%s15780_s2 + $0x148] sm:$0xff]  }
 0x540   : > { %11209 = vmatprep.subr.bf16.mxu1 %v12783_v52 }
 0x543   : > { %11210 = vmatpush3.bf16.msra.mxu1 %v12783_v52 }
 0x544   : > { %11211 = vmatprep.subr.bf16.mxu1 %v12784_v14 }
 0x547   : > { %11212 = vmatpush3.bf16.msra.mxu1 %v12784_v14 }
 0x548   : > { %11213 = vmatprep.subr.bf16.mxu1 %v12785_v38 }
 0x54b   : > { %11214 = vmatpush3.bf16.msra.mxu1 %v12785_v38 }
 0x54c   : > { %11215 = vmatprep.subr.bf16.mxu1 %v12786_v5 }
 0x54f   : > { %11216 = vmatpush3.bf16.msra.mxu1 %v12786_v5 }
 0x550   : > { %11217 = vmatprep.subr.bf16.mxu1 %v12787_v41 }
 0x553   : > { %11218 = vmatpush3.bf16.msra.mxu1 %v12787_v41 }
 0x554   : > { %11227 = vmatprep.subr.bf16.mxu1 %v12788_v10 }
 0x556   : > { %11220 = vmatmul.mubr.bf16.vlgmr.msra.gmra.mrb[80].mxu1 %v4838_v34  ;;  %v12793_v34 = vld [vmem:[%s15780_s2 + $0x168] sm:$0xff]  }
 0x557   : > { %11223 = vmatprep.mubr.bf16.mxu1 %v4839_v9  ;;  %11228 = vmatpush3.bf16.msra.mxu1 %v12788_v10  ;;  %v12797_v9 = vld [vmem:[%s15780_s2 + $0x188] sm:$0xff]  }
 0x558   : > { %11229 = vmatprep.subr.bf16.mxu1 %v12789_v56 }
 0x55b   : > { %11230 = vmatpush3.bf16.msra.mxu1 %v12789_v56 }
 0x55c   : > { %11231 = vmatprep.subr.bf16.mxu1 %v12790_v32 }
 0x55e   : > { %11224 = vmatmul.mubr.bf16.gmra.mrb[84].mxu1 %v4840_v13  ;;  %v14830_v13 = vld [vmem:[#allocation2 + $0x42] sm:$0xff] }
 0x55f   : > { %11232 = vmatpush3.bf16.msra.mxu1 %v12790_v32  ;;  %11243 = vmatprep.mubr.msk.bf16.mxu1 %vm14644_vm15, %v9333_v17  ;;  %v9342_v45 = vpack.c.bf16 %v14830_v13, %v14701_v24  ;;  %v5306_v24 = vpack.c.bf16 %v14494_v23, %v14565_v6  ;;  %v12817_v23 = vld [vmem:[%s15780_s2 + $0x228] sm:$0xff]   ;;  %v12819_v6 = vld [vmem:[%s15780_s2 + $0x238] sm:$0xff]  }
 0x560   : > { %11233 = vmatprep.subr.bf16.mxu1 %v12791_v47 }
 0x563   : > { %11234 = vmatpush3.bf16.msra.mxu1 %v12791_v47 }
 0x564   : > { %11235 = vmatprep.subr.bf16.mxu1 %v12792_v8 }
 0x567   : > { %11236 = vmatpush3.bf16.msra.mxu1 %v12792_v8 }
 0x568   : > { %11237 = vmatprep.subr.bf16.mxu1 %v12793_v34 }
 0x56b   : > { %11238 = vmatpush3.bf16.msra.mxu1 %v12793_v34 }
 0x56c   : > { %11239 = vmatprep.subr.bf16.mxu1 %v12794_v18 }
 0x56f   : > { %11240 = vmatpush3.bf16.msra.mxu1 %v12794_v18 }
 0x570   : > { %11241 = vmatprep.subr.bf16.mxu1 %v12795_v37 }
 0x573   : > { %11242 = vmatpush3.bf16.msra.mxu1 %v12795_v37 }
 0x574   : > { %11251 = vmatprep.subr.bf16.mxu1 %v12796_v26 }
 0x576   : > { %11244 = vmatmul.mubr.msk.bf16.vlgmr.msra.gmra.mrb[80].mxu1 %vm14673_vm4, %v9336_v63  ;;  %v12800_v63 = vld [vmem:[%s15780_s2 + $0x1a0] sm:$0xff]  }
 0x577   : > { %11247 = vmatprep.mubr.msk.bf16.mxu1 %vm14681_vm8, %v9339_v16  ;;  %11252 = vmatpush3.bf16.msra.mxu1 %v12796_v26  ;;  %v12804_v16 = vld [vmem:[%s15780_s2 + $0x1c0] sm:$0xff]  }
 0x578   : > { %11253 = vmatprep.subr.bf16.mxu1 %v12797_v9 }
 0x57b   : > { %11254 = vmatpush3.bf16.msra.mxu1 %v12797_v9 }
 0x57c   : > { %11255 = vmatprep.subr.bf16.mxu1 %v12798_v51 }
 0x57e   : > { %11248 = vmatmul.mubr.msk.bf16.gmra.mrb[84].mxu1 %vm14703_vm2, %v9342_v45 }
 0x57f   : > { %11256 = vmatpush3.bf16.msra.mxu1 %v12798_v51  ;;  %11267 = vmatprep.mubr.msk.bf16.mxu1 %vm14553_vm11, %v14600_v36  ;;  %v12805_v36 = vld [vmem:[%s15780_s2 + $0x1c8] sm:$0xff]   ;;  %vm5653_vm11 = vcmask 523264  }
 0x580   : > { %11257 = vmatprep.subr.bf16.mxu1 %v12799_v62 }
 0x583   : > { %11258 = vmatpush3.bf16.msra.mxu1 %v12799_v62 }
 0x584   : > { %11259 = vmatprep.subr.bf16.mxu1 %v12800_v63 }
 0x587   : > { %11260 = vmatpush3.bf16.msra.mxu1 %v12800_v63 }
 0x588   : > { %11261 = vmatprep.subr.bf16.mxu1 %v12801_v30 }
 0x58b   : > { %11262 = vmatpush3.bf16.msra.mxu1 %v12801_v30 }
 0x58c   : > { %11263 = vmatprep.subr.bf16.mxu1 %v12802_v49 }
 0x58f   : > { %11264 = vmatpush3.bf16.msra.mxu1 %v12802_v49 }
 0x590   : > { %11265 = vmatprep.subr.bf16.mxu1 %v12803_v44 }
 0x593   : > { %11266 = vmatpush3.bf16.msra.mxu1 %v12803_v44 }
 0x594   : > { %11275 = vmatprep.subr.bf16.mxu1 %v12804_v16 }
 0x596   : > { %11268 = vmatmul.mubr.msk.bf16.vlgmr.msra.gmra.mrb[80].mxu1 %vm14594_vm7, %v14615_v4  ;;  %v12809_v4 = vld [vmem:[%s15780_s2 + $0x1e8] sm:$0xff]   ;;  %vm13130_vm7 = vmmov 0  }
 0x597   : > { %11271 = vmatprep.mubr.msk.bf16.mxu1 %vm14604_vm0, %v14642_v11  ;;  %11276 = vmatpush3.bf16.msra.mxu1 %v12804_v16  ;;  %v12812_v11 = vld [vmem:[%s15780_s2 + $0x200] sm:$0xff]  }
 0x598   : > { %11277 = vmatprep.subr.bf16.mxu1 %v12805_v36 }
 0x59b   : > { %11278 = vmatpush3.bf16.msra.mxu1 %v12805_v36 }
 0x59c   : > { %11279 = vmatprep.subr.bf16.mxu1 %v12806_v29 }
 0x59e   : > { %11272 = vmatmul.mubr.msk.bf16.gmra.mrb[84].mxu1 %vm14636_vm9, %v9378_v19 }
 0x59f   : > { %11280 = vmatpush3.bf16.msra.mxu1 %v12806_v29  ;;  %11291 = vmatprep.mubr.bf16.mxu1 %v14489_v3  ;;  %v12811_v3 = vld [vmem:[%s15780_s2 + $0x1f8] sm:$0xff]  }
 0x5a0   : > { %11281 = vmatprep.subr.bf16.mxu1 %v12807_v12 }
 0x5a3   : > { %11282 = vmatpush3.bf16.msra.mxu1 %v12807_v12 }
 0x5a4   : > { %11283 = vmatprep.subr.bf16.mxu1 %v12808_v22 }
 0x5a7   : > { %11284 = vmatpush3.bf16.msra.mxu1 %v12808_v22  ;;  %v5646_v22 = vld [vmem:[#allocation8 + $0x8] sm:$0xff] }
 0x5a8   : > { %11285 = vmatprep.subr.bf16.mxu1 %v12809_v4 }
 0x5ab   : > { %11286 = vmatpush3.bf16.msra.mxu1 %v12809_v4  ;;  %v5647_v4 = vld [vmem:[#allocation8 + $0x10] sm:$0xff] }
 0x5ac   : > { %11287 = vmatprep.subr.bf16.mxu1 %v12810_v35 }
 0x5af   : > { %11288 = vmatpush3.bf16.msra.mxu1 %v12810_v35  ;;  %v5648_v35 = vld [vmem:[#allocation8 + $0x18] sm:$0xff] }
 0x5b0   : > { %11289 = vmatprep.subr.bf16.mxu1 %v12811_v3 }
 0x5b3   : > { %11290 = vmatpush3.bf16.msra.mxu1 %v12811_v3  ;;  %v5649_v3 = vld [vmem:[#allocation8 + $0x20] sm:$0xff] }
 0x5b4   : > { %11299 = vmatprep.subr.bf16.mxu1 %v12812_v11 }
 0x5b6   : > { %11292 = vmatmul.mubr.bf16.vlgmr.msra.gmra.mrb[80].mxu1 %v14518_v31  ;;  %v12816_v31 = vld [vmem:[%s15780_s2 + $0x220] sm:$0xff]  }
 0x5b7   : > { %11295 = vmatprep.mubr.bf16.mxu1 %v14551_v61  ;;  %11300 = vmatpush3.bf16.msra.mxu1 %v12812_v11  ;;  %v12818_v61 = vld [vmem:[%s15780_s2 + $0x230] sm:$0xff]  }
 0x5b8   : > { %11301 = vmatprep.subr.bf16.mxu1 %v12813_v27  ;;  %v5650_v11 = vld [vmem:[#allocation8 + $0x28] sm:$0xff] }
 0x5bb   : > { %11302 = vmatpush3.bf16.msra.mxu1 %v12813_v27  ;;  %v5651_v27 = vld [vmem:[#allocation8 + $0x30] sm:$0xff] }
 0x5bc   : > { %11303 = vmatprep.subr.bf16.mxu1 %v12814_v2 }
 0x5be   : > { %11296 = vmatmul.mubr.bf16.gmra.mrb[84].mxu1 %v5306_v24  ;;  %v5784_v24 = vld [vmem:[#allocation8 + $0x40] sm:$0xff] }
 0x5bf   : > { %11304 = vmatpush3.bf16.msra.mxu1 %v12814_v2  ;;  %11315 = vmatprep.mubr.msk.bf16.mxu1 %vm14644_vm15, %v14679_v7  ;;  %v9438_v7 = vpack.c.bf16 %v5452_v28, %v14830_v13  ;;  %v5652_v2 = vld [vmem:[#allocation8 + $0x38] sm:$0xff]  ;;  %v5790_v28 = vld [vmem:[#allocation8 + $0x70] sm:$0xff] }
 0x5c0   : > { %11305 = vmatprep.subr.bf16.mxu1 %v12815_v40 }
 0x5c3   : > { %11306 = vmatpush3.bf16.msra.mxu1 %v12815_v40  ;;  %v5785_v40 = vld [vmem:[#allocation8 + $0x48] sm:$0xff] }
 0x5c4   : > { %11307 = vmatprep.subr.bf16.mxu1 %v12816_v31 }
 0x5c7   : > { %11308 = vmatpush3.bf16.msra.mxu1 %v12816_v31  ;;  %v5786_v31 = vld [vmem:[#allocation8 + $0x50] sm:$0xff] }
 0x5c8   : > { %11309 = vmatprep.subr.bf16.mxu1 %v12817_v23 }
 0x5cb   : > { %11310 = vmatpush3.bf16.msra.mxu1 %v12817_v23  ;;  %v5787_v23 = vld [vmem:[#allocation8 + $0x58] sm:$0xff] }
 0x5cc   : > { %11311 = vmatprep.subr.bf16.mxu1 %v12818_v61 }
 0x5cf   : > { %11312 = vmatpush3.bf16.msra.mxu1 %v12818_v61  ;;  %v5788_v61 = vld [vmem:[#allocation8 + $0x60] sm:$0xff] }
 0x5d0   : > { %11313 = vmatprep.subr.bf16.mxu1 %v12819_v6 }
 0x5d3   : > { %11314 = vmatpush3.bf16.msra.mxu1 %v12819_v6  ;;  %v5789_v6 = vld [vmem:[#allocation8 + $0x68] sm:$0xff] }
 0x5d6   : > { %11316 = vmatmul.mubr.msk.bf16.vlgmr.msra.gmra.mrb[80].mxu1 %vm14673_vm4, %v14690_v55 }
 0x5d7   : > { %11319 = vmatprep.mubr.msk.bf16.mxu1 %vm14681_vm8, %v14709_v0 }
 0x5de   : > { %11320 = vmatmul.mubr.msk.bf16.gmra.mrb[84].mxu1 %vm14703_vm2, %v9438_v7  ;;  %v5791_v7 = vld [vmem:[#allocation8 + $0x78] sm:$0xff] }
 0x5df   : > { %11339 = vmatprep.mubr.msk.f32.mxu1 %vm5653_vm11, %v5645_v58  ;;  %v5930_v58 = vld [vmem:[#allocation8 + $0x80] sm:$0xff] }
 0x6a9   : > { %v11317_v43 = vpop.f32.mrb[80].mxu1 }
 0x6aa   : > { %v5611_v55 = vmul.f32 %v11317_v43, %v9440_v1  ;;  %v5564_v0 = vpop.f32.mrb[81].mxu1  ;;  %v5932_v43 = vld [vmem:[#allocation8 + $0x90] sm:$0xff] }
 0x6ab   : > { %v5609_v39 = vmul.f32 %v9440_v1, %v5564_v0  ;;  %v11318_v57 = vpop.f32.mrb[82].mxu1  ;;  %v5935_v0 = vld [vmem:[#allocation8 + $0xa8] sm:$0xff] }
 0x6ac   : > { %v5623_v48 = vadd.f32 %v9441_v59, %v5611_v55  ;;  %v5612_v15 = vmul.f32 %v11318_v57, %v9440_v1  ;;  %v5567_v60 = vpop.f32.mrb[83].mxu1  ;;  %v5934_v55 = vld [vmem:[#allocation8 + $0xa0] sm:$0xff]  ;;  %v5937_v57 = vld [vmem:[#allocation8 + $0xb8] sm:$0xff] }
 0x6ad   : > { %v5621_v25 = vadd.f32 %v9441_v59, %v5609_v39  ;;  %v5610_v21 = vmul.f32 %v9440_v1, %v5567_v60  ;;  %v5936_v39 = vld [vmem:[#allocation8 + $0xb0] sm:$0xff] }
 0x6ae   : > { %v5631_v46 = vmul.f32 0.1, %v5623_v48  ;;  %v5624_v42 = vadd.f32 %v9441_v59, %v5612_v15  ;;  %v6077_v15 = vld [vmem:[#allocation8 + $0xc8] sm:$0xff]  ;;  %v6078_v60 = vld [vmem:[#allocation8 + $0xd0] sm:$0xff] }
 0x6af   : > { %v5629_v50 = vmul.f32 0.1, %v5621_v25  ;;  %v5622_v54 = vadd.f32 %v9441_v59, %v5610_v21  ;;  %v6080_v21 = vld [vmem:[#allocation8 + $0xe0] sm:$0xff] }
 0x6b0   : > { %v5632_v52 = vmul.f32 0.1, %v5624_v42  ;;  %v5639_v5 = vmax.f32 %v5623_v48, %v5631_v46  ;;  %v6076_v48 = vld [vmem:[#allocation8 + $0xc0] sm:$0xff]  ;;  %v6081_v46 = vld [vmem:[#allocation8 + $0xe8] sm:$0xff] }
 0x6b1   : > { %v5630_v14 = vmul.f32 0.1, %v5622_v54  ;;  %v11321_v38 = vpop.f32.mrb[84].mxu1  ;;  %v5637_v32 = vmax.f32 %v5621_v25, %v5629_v50  ;;  %v6079_v25 = vld [vmem:[#allocation8 + $0xd8] sm:$0xff] }
 0x6b2   : > { %v5640_v41 = vmax.f32 %v5624_v42, %v5632_v52  ;;  %v5615_v10 = vmul.f32 %v11321_v38, %v9440_v1  ;;  %v5580_v56 = vpop.f32.mrb[85].mxu1  ;;  %v6082_v42 = vld [vmem:[#allocation8 + $0xf0] sm:$0xff]  ;;  %v6083_v50 = vld [vmem:[#allocation8 + $0xf8] sm:$0xff]  ;;  %v12821_v52 = vld [vmem:[%s15781_s3 + $0x8] sm:$0xff]  }
 0x6b3   : > { %v5638_v47 = vmax.f32 %v5622_v54, %v5630_v14  ;;  %v5613_v17 = vmul.f32 %v9440_v1, %v5580_v56  ;;  %v11322_v8 = vpop.f32.mrb[86].mxu1  ;;  %v12820_v54 = vld [vmem:[%s15781_s3] sm:$0xff]   ;;  %v12822_v14 = vld [vmem:[%s15781_s3 + $0x10] sm:$0xff]   ;;  %v12823_v38 = vld [vmem:[%s15781_s3 + $0x18] sm:$0xff]  }
 0x6b4   : > { %v14935_v34 = vpack.c.bf16 %v5640_v41, %v5639_v5  ;;  %v5627_v18 = vadd.f32 %v9441_v59, %v5615_v10  ;;  %v5616_v37 = vmul.f32 %v11322_v8, %v9440_v1  ;;  %v5583_v26 = vpop.f32.mrb[87].mxu1  ;;  %v12824_v5 = vld [vmem:[%s15781_s3 + $0x20] sm:$0xff]   ;;  %v12825_v41 = vld [vmem:[%s15781_s3 + $0x28] sm:$0xff]   ;;  %v12826_v10 = vld [vmem:[%s15781_s3 + $0x30] sm:$0xff]  }
 0x6b5   : > { %v14937_v9 = vpack.c.bf16 %v5638_v47, %v5637_v32  ;;  %v5625_v51 = vadd.f32 %v9441_v59, %v5613_v17  ;;  %v5614_v13 = vmul.f32 %v9440_v1, %v5583_v26  ;;  %v5931_v1 = vld [vmem:[#allocation8 + $0x88] sm:$0xff]  ;;  %v12827_v56 = vld [vmem:[%s15781_s3 + $0x38] sm:$0xff]  }
 0x6b6   : > { %v5635_v45 = vmul.f32 0.1, %v5627_v18  ;;  %v5628_v62 = vadd.f32 %v9441_v59, %v5616_v37 }
 0x6b7   : > { %v5633_v63 = vmul.f32 0.1, %v5625_v51  ;;  %v5626_v30 = vadd.f32 %v9441_v59, %v5614_v13  ;;  %12020 = vmatprep.subr.bf16.mxu1 %v14937_v9  ;;  %v5933_v59 = vld [vmem:[#allocation8 + $0x98] sm:$0xff] }
 0x6b8   : > { %v5636_v49 = vmul.f32 0.1, %v5628_v62  ;;  %12022 = vmatpush3.bf16.msra.mxu1 %v14937_v9  ;;  %v5643_v16 = vmax.f32 %v5627_v18, %v5635_v45 }
 0x6b9   : > { %v5634_v44 = vmul.f32 0.1, %v5626_v30  ;;  %12024 = vmatprep.subr.bf16.mxu1 %v14935_v34  ;;  %v5641_v29 = vmax.f32 %v5625_v51, %v5633_v63 }
 0x6ba   : > { %v5644_v36 = vmax.f32 %v5628_v62, %v5636_v49 }
 0x6bb   : > { %v5642_v20 = vmax.f32 %v5626_v30, %v5634_v44 }
 0x6bc   : > { %v14942_v19 = vpack.c.bf16 %v5644_v36, %v5643_v16  ;;  %12026 = vmatpush3.bf16.msra.mxu1 %v14935_v34 }
 0x6bd   : > { %v14945_v12 = vpack.c.bf16 %v5642_v20, %v5641_v29 }
 0x6bf   : > { %12028 = vmatprep.subr.bf16.mxu1 %v14945_v12 }
 0x6c0   : > { %12030 = vmatpush3.bf16.msra.mxu1 %v14945_v12 }
 0x6c1   : > { %12032 = vmatprep.subr.bf16.mxu1 %v14942_v19 }
 0x6c4   : > { %12034 = vmatpush3.bf16.msra.mxu1 %v14942_v19 }
 0x6c5   : > { %12036 = vmatprep.subr.bf16.mxu1 %v14937_v9 }
 0x6c7   : > { %11340 = vmatmul.mubr.msk.f32.vlgmr.msra.gmra.mrb[88].mxu1 %vm5653_vm11, %v5646_v22 }
 0x6c8   : > { %12038 = vmatpush3.bf16.msra.mxu1 %v14937_v9  ;;  %11342 = vmatprep.mubr.msk.f32.mxu1 %vm5653_vm11, %v5647_v4 }
 0x6c9   : > { %12040 = vmatprep.subr.bf16.mxu1 %v14935_v34 }
 0x6cb   : > { %11343 = vmatmul.mubr.msk.f32.gmra.mrb[90].mxu1 %vm5653_vm11, %v5648_v35 }
 0x6cc   : > { %12042 = vmatpush3.bf16.msra.mxu1 %v14935_v34  ;;  %11345 = vmatprep.mubr.msk.f32.mxu1 %vm5653_vm11, %v5649_v3 }
 0x6cd   : > { %12044 = vmatprep.subr.bf16.mxu1 %v14945_v12 }
 0x6cf   : > { %11346 = vmatmul.mubr.msk.f32.gmra.mrb[92].mxu1 %vm5653_vm11, %v5650_v11 }
 0x6d0   : > { %12046 = vmatpush3.bf16.msra.mxu1 %v14945_v12  ;;  %11348 = vmatprep.mubr.msk.f32.mxu1 %vm5653_vm11, %v5651_v27 }
 0x6d1   : > { %12048 = vmatprep.subr.bf16.mxu1 %v14942_v19 }
 0x6d3   : > { %11349 = vmatmul.mubr.msk.f32.gmra.mrb[94].mxu1 %vm5653_vm11, %v5652_v2 }
 0x6d4   : > { %12050 = vmatpush3.bf16.msra.mxu1 %v14942_v19  ;;  %11367 = vmatprep.mubr.msk.f32.mxu1 %vm5653_vm11, %v5784_v24 }
 0x6d5   : > { %12052 = vmatprep.subr.bf16.mxu1 %v14937_v9 }
 0x6d7   : > { %11368 = vmatmul.mubr.msk.f32.vlgmr.msra.gmra.mrb[96].mxu1 %vm5653_vm11, %v5785_v40 }
 0x6d8   : > { %12054 = vmatpush3.bf16.msra.mxu1 %v14937_v9  ;;  %11370 = vmatprep.mubr.msk.f32.mxu1 %vm5653_vm11, %v5786_v31 }
 0x6d9   : > { %12056 = vmatprep.subr.bf16.mxu1 %v14935_v34 }
 0x6db   : > { %11371 = vmatmul.mubr.msk.f32.gmra.mrb[98].mxu1 %vm5653_vm11, %v5787_v23 }
 0x6dc   : > { %12058 = vmatpush3.bf16.msra.mxu1 %v14935_v34  ;;  %11373 = vmatprep.mubr.msk.f32.mxu1 %vm5653_vm11, %v5788_v61 }
 0x6dd   : > { %12060 = vmatprep.subr.bf16.mxu1 %v14945_v12 }
 0x6df   : > { %11374 = vmatmul.mubr.msk.f32.gmra.mrb[100].mxu1 %vm5653_vm11, %v5789_v6 }
 0x6e0   : > { %12062 = vmatpush3.bf16.msra.mxu1 %v14945_v12  ;;  %11376 = vmatprep.mubr.msk.f32.mxu1 %vm5653_vm11, %v5790_v28 }
 0x6e1   : > { %12064 = vmatprep.subr.bf16.mxu1 %v14942_v19 }
 0x6e3   : > { %11377 = vmatmul.mubr.msk.f32.gmra.mrb[102].mxu1 %vm5653_vm11, %v5791_v7 }
 0x6e4   : > { %12066 = vmatpush3.bf16.msra.mxu1 %v14942_v19  ;;  %11395 = vmatprep.mubr.msk.f32.mxu1 %vm5653_vm11, %v5930_v58 }
 0x6e5   : > { %12068 = vmatprep.subr.bf16.mxu1 %v14937_v9 }
 0x6e7   : > { %11396 = vmatmul.mubr.msk.f32.vlgmr.msra.gmra.mrb[104].mxu1 %vm5653_vm11, %v5931_v1 }
 0x6e8   : > { %12070 = vmatpush3.bf16.msra.mxu1 %v14937_v9  ;;  %11398 = vmatprep.mubr.msk.f32.mxu1 %vm5653_vm11, %v5932_v43 }
 0x6e9   : > { %12072 = vmatprep.subr.bf16.mxu1 %v14935_v34 }
 0x6eb   : > { %11399 = vmatmul.mubr.msk.f32.gmra.mrb[106].mxu1 %vm5653_vm11, %v5933_v59 }
 0x6ec   : > { %12074 = vmatpush3.bf16.msra.mxu1 %v14935_v34  ;;  %11401 = vmatprep.mubr.msk.f32.mxu1 %vm5653_vm11, %v5934_v55 }
 0x6ed   : > { %12076 = vmatprep.subr.bf16.mxu1 %v14945_v12 }
 0x6ef   : > { %11402 = vmatmul.mubr.msk.f32.gmra.mrb[108].mxu1 %vm5653_vm11, %v5935_v0 }
 0x6f0   : > { %12078 = vmatpush3.bf16.msra.mxu1 %v14945_v12  ;;  %11404 = vmatprep.mubr.msk.f32.mxu1 %vm5653_vm11, %v5936_v39 }
 0x6f1   : > { %12080 = vmatprep.subr.bf16.mxu1 %v14942_v19 }
 0x6f3   : > { %11405 = vmatmul.mubr.msk.f32.gmra.mrb[110].mxu1 %vm5653_vm11, %v5937_v57 }
 0x6f4   : > { %12082 = vmatpush3.bf16.msra.mxu1 %v14942_v19  ;;  %11423 = vmatprep.mubr.msk.f32.mxu1 %vm5653_vm11, %v6076_v48 }
 0x6f5   : > { %11435 = vmatprep.subr.bf16.mxu1 %v12820_v54 }
 0x6f7   : > { %11424 = vmatmul.mubr.msk.f32.vlgmr.msra.gmra.mrb[112].mxu1 %vm5653_vm11, %v6077_v15 }
 0x6f8   : > { %11426 = vmatprep.mubr.msk.f32.mxu1 %vm5653_vm11, %v6078_v60  ;;  %11436 = vmatpush3.bf16.msra.mxu1 %v12820_v54 }
 0x6f9   : > { %11437 = vmatprep.subr.bf16.mxu1 %v12821_v52 }
 0x6fb   : > { %11427 = vmatmul.mubr.msk.f32.gmra.mrb[114].mxu1 %vm5653_vm11, %v6079_v25 }
 0x6fc   : > { %11429 = vmatprep.mubr.msk.f32.mxu1 %vm5653_vm11, %v6080_v21  ;;  %11438 = vmatpush3.bf16.msra.mxu1 %v12821_v52 }
 0x6fd   : > { %11439 = vmatprep.subr.bf16.mxu1 %v12822_v14 }
 0x6ff   : > { %11430 = vmatmul.mubr.msk.f32.gmra.mrb[116].mxu1 %vm5653_vm11, %v6081_v46 }
 0x700   : > { %11432 = vmatprep.mubr.msk.f32.mxu1 %vm5653_vm11, %v6082_v42  ;;  %11440 = vmatpush3.bf16.msra.mxu1 %v12822_v14 }
 0x701   : > { %11441 = vmatprep.subr.bf16.mxu1 %v12823_v38 }
 0x703   : > { %11433 = vmatmul.mubr.msk.f32.gmra.mrb[118].mxu1 %vm5653_vm11, %v6083_v50 }
 0x704   : > { %11442 = vmatpush3.bf16.msra.mxu1 %v12823_v38 }
 0x705   : > { %11443 = vmatprep.subr.bf16.mxu1 %v12824_v5 }
 0x708   : > { %11444 = vmatpush3.bf16.msra.mxu1 %v12824_v5 }
 0x709   : > { %11445 = vmatprep.subr.bf16.mxu1 %v12825_v41 }
 0x70c   : > { %11446 = vmatpush3.bf16.msra.mxu1 %v12825_v41 }
 0x70d   : > { %11447 = vmatprep.subr.bf16.mxu1 %v12826_v10 }
 0x710   : > { %11448 = vmatpush3.bf16.msra.mxu1 %v12826_v10  ;;  %v6420_v10 = vld [vmem:[%s15788_s10] sm:$0xff] }
 0x711   : > { %11449 = vmatprep.subr.bf16.mxu1 %v12827_v56 }
 0x714   : > { %11450 = vmatpush3.bf16.msra.mxu1 %v12827_v56  ;;  %v12828_v56 = vld [vmem:[%s15782_s4 + $0x40] sm:$0xff]  }
 0x715   : > { %11536 = vmatpush3.bf16.msra.mxu0 %v12828_v56 }
 0x79a   : > { %v11341_v32 = vpop.f32.mrb[88].mxu1 }
 0x79b   : > { %v5744_v47 = vpop.f32.mrb[89].mxu1 }
 0x79e   : > { %v11344_v17 = vpop.f32.mrb[90].mxu1 }
 0x79f   : > { %v5754_v8 = vpop.f32.mrb[91].mxu1 }
 0x7a2   : > { %v11347_v34 = vpop.f32.mrb[92].mxu1 }
 0x7a3   : > { %v5764_v18 = vpop.f32.mrb[93].mxu1 }
 0x7a6   : > { %v11350_v37 = vpop.f32.mrb[94].mxu1 }
 0x7a7   : > { %v5774_v26 = vpop.f32.mrb[95].mxu1 }
 0x7aa   : > { %v11369_v9 = vpop.f32.mrb[96].mxu1 }
 0x7ab   : > { %v5922_v51 = vmax.f32 %v11341_v32, %v11369_v9  ;;  %v5882_v13 = vpop.f32.mrb[97].mxu1  ;;  %v15052_v32 = vld [vmem:[#allocation2 + $0x111] sm:$0xff] }
 0x7ac   : > { %v5921_v45 = vmax.f32 %v5744_v47, %v5882_v13  ;;  %11537 = vmatprep.subr.bf16.mxu0 %v15052_v32  ;;  %v9482_v47 = vld [vmem:[%s15784_s6 + $0x2] ss:$0 sm:$0xff]  ;;  %11551 = vmatprep.mubr.msk.bf16.mxu0 %vm13130_vm7, %v15052_v32 }
 0x7ae   : > { %v11372_v62 = vpop.f32.mrb[98].mxu1 }
 0x7af   : > { %v5924_v63 = vmax.f32 %v11344_v17, %v11372_v62  ;;  %v5892_v30 = vpop.f32.mrb[99].mxu1 }
 0x7b0   : > { %v5923_v49 = vmax.f32 %v5754_v8, %v5892_v30  ;;  %v9483_v8 = vld [vmem:[%s15785_s7 + $0x2] ss:$0 sm:$0xff] }
 0x7b2   : > { %v11375_v44 = vpop.f32.mrb[100].mxu1 }
 0x7b3   : > { %v5926_v16 = vmax.f32 %v11347_v34, %v11375_v44  ;;  %v5902_v36 = vpop.f32.mrb[101].mxu1 }
 0x7b4   : > { %v5925_v29 = vmax.f32 %v5764_v18, %v5902_v36 }
 0x7b6   : > { %v11378_v20 = vpop.f32.mrb[102].mxu1 }
 0x7b7   : > { %v5928_v19 = vmax.f32 %v11350_v37, %v11378_v20  ;;  %v5912_v12 = vpop.f32.mrb[103].mxu1 }
 0x7b8   : > { %v5927_v22 = vmax.f32 %v5774_v26, %v5912_v12 }
 0x7ba   : > { %v11397_v4 = vpop.f32.mrb[104].mxu1 }
 0x7bb   : > { %v6068_v35 = vmax.f32 %v5922_v51, %v11397_v4  ;;  %v6028_v3 = vpop.f32.mrb[105].mxu1 }
 0x7bc   : > { %v6067_v11 = vmax.f32 %v5921_v45, %v6028_v3 }
 0x7be   : > { %v11400_v27 = vpop.f32.mrb[106].mxu1 }
 0x7bf   : > { %v6070_v2 = vmax.f32 %v5924_v63, %v11400_v27  ;;  %v6038_v24 = vpop.f32.mrb[107].mxu1 }
 0x7c0   : > { %v6069_v40 = vmax.f32 %v5923_v49, %v6038_v24 }
 0x7c2   : > { %v11403_v31 = vpop.f32.mrb[108].mxu1 }
 0x7c3   : > { %v6072_v23 = vmax.f32 %v5926_v16, %v11403_v31  ;;  %v6048_v61 = vpop.f32.mrb[109].mxu1 }
 0x7c4   : > { %v6071_v6 = vmax.f32 %v5925_v29, %v6048_v61 }
 0x7c6   : > { %v11406_v28 = vpop.f32.mrb[110].mxu1 }
 0x7c7   : > { %v6074_v7 = vmax.f32 %v5928_v19, %v11406_v28  ;;  %v6058_v58 = vpop.f32.mrb[111].mxu1 }
 0x7c8   : > { %v6073_v1 = vmax.f32 %v5927_v22, %v6058_v58 }
 0x7ca   : > { %v11425_v43 = vpop.f32.mrb[112].mxu1 }
 0x7cb   : > { %v15030_v59 = vmax.f32 %v6068_v35, %v11425_v43  ;;  %v6174_v55 = vpop.f32.mrb[113].mxu1 }
 0x7cc   : > { %v6213_v0 = vmax.f32 %v6067_v11, %v6174_v55 }
 0x7ce   : > { %v6237_v39 = vpack.c.bf16 %v15030_v59, %v6213_v0  ;;  %v11428_v57 = vpop.f32.mrb[114].mxu1 }
 0x7cf   : > { %v6216_v48 = vmax.f32 %v6070_v2, %v11428_v57  ;;  %v6184_v15 = vpop.f32.mrb[115].mxu1 }
 0x7d0   : > { %v6215_v60 = vmax.f32 %v6069_v40, %v6184_v15  ;;  %11451 = vmatprep.mubr.bf16.mxu1 %v6237_v39 }
 0x7d2   : > { %v6238_v25 = vpack.c.bf16 %v6216_v48, %v6215_v60  ;;  %v11431_v21 = vpop.f32.mrb[116].mxu1 }
 0x7d3   : > { %v15033_v46 = vmax.f32 %v6072_v23, %v11431_v21  ;;  %v6194_v42 = vpop.f32.mrb[117].mxu1 }
 0x7d4   : > { %v15035_v50 = vmax.f32 %v6071_v6, %v6194_v42  ;;  %11452 = vmatmul.mubr.bf16.vlgmr.msra.gmra.mrb[120].mxu1 %v6238_v25 }
 0x7d6   : > { %v6239_v54 = vpack.c.bf16 %v15033_v46, %v15035_v50  ;;  %v11434_v52 = vpop.f32.mrb[118].mxu1 }
 0x7d7   : > { %v15039_v14 = vmax.f32 %v6074_v7, %v11434_v52  ;;  %v6204_v38 = vpop.f32.mrb[119].mxu1 }
 0x7d8   : > { %v15041_v5 = vmax.f32 %v6073_v1, %v6204_v38  ;;  %11455 = vmatprep.mubr.bf16.mxu1 %v6239_v54 }
 0x7da   : > { %v6240_v41 = vpack.c.bf16 %v15039_v14, %v15041_v5 }
 0x7dc   : > { %11456 = vmatmul.mubr.bf16.gmra.mrb[124].mxu1 %v6240_v41 }
 0x7dd   : > { %11475 = vmatprep.mubr.msk.f32.mxu1 %vm5653_vm11, %v6420_v10 }
 0x8a7   : > { %v11453_v17 = vpop.f32.mrb[120].mxu1 }
 0x8a8   : > { %v6362_v34 = vmul.f32 %v11453_v17, %v9482_v47  ;;  %v6323_v18 = vpop.f32.mrb[121].mxu1 }
 0x8a9   : > { %v6360_v37 = vmul.f32 %v9482_v47, %v6323_v18  ;;  %v11454_v26 = vpop.f32.mrb[122].mxu1 }
 0x8aa   : > { %v6374_v9 = vadd.f32 %v9483_v8, %v6362_v34  ;;  %v6363_v51 = vmul.f32 %v11454_v26, %v9482_v47  ;;  %v6326_v13 = vpop.f32.mrb[123].mxu1 }
 0x8ab   : > { %v6372_v45 = vadd.f32 %v9483_v8, %v6360_v37  ;;  %v6361_v62 = vmul.f32 %v9482_v47, %v6326_v13 }
 0x8ac   : > { %v6382_v63 = vmul.f32 0.1, %v6374_v9  ;;  %v6375_v30 = vadd.f32 %v9483_v8, %v6363_v51 }
 0x8ad   : > { %v6380_v49 = vmul.f32 0.1, %v6372_v45  ;;  %v6373_v44 = vadd.f32 %v9483_v8, %v6361_v62  ;;  %v9487_v62 = vld [vmem:[%s15788_s10 + $0x18] sm:$0xff] }
 0x8ae   : > { %v6390_v16 = vmax.f32 %v6374_v9, %v6382_v63  ;;  %v6383_v36 = vmul.f32 0.1, %v6375_v30  ;;  %v9490_v63 = vld [vmem:[%s15788_s10 + $0x20] sm:$0xff] }
 0x8af   : > { %v6388_v29 = vmax.f32 %v6372_v45, %v6380_v49  ;;  %v6381_v20 = vmul.f32 0.1, %v6373_v44  ;;  %v11457_v19 = vpop.f32.mrb[124].mxu1  ;;  %v9486_v45 = vld [vmem:[%s15788_s10 + $0x10] sm:$0xff] }
 0x8b0   : > { %v6398_v12 = vadd.f32 %v6390_v16, %v6215_v60  ;;  %v6391_v22 = vmax.f32 %v6375_v30, %v6383_v36  ;;  %v6366_v4 = vmul.f32 %v11457_v19, %v9482_v47  ;;  %v6339_v35 = vpop.f32.mrb[125].mxu1  ;;  %v9491_v30 = vld [vmem:[%s15788_s10 + $0x28] sm:$0xff]  ;;  %v9494_v49 = vld [vmem:[%s15788_s10 + $0x30] sm:$0xff]  ;;  %v7813_v16 = vld [vmem:[%s15789_s11] sm:$0xff] }
 0x8b1   : > { %v6396_v3 = vadd.f32 %v6388_v29, %v6213_v0  ;;  %v6389_v11 = vmax.f32 %v6373_v44, %v6381_v20  ;;  %v6364_v27 = vmul.f32 %v9482_v47, %v6339_v35  ;;  %v11458_v2 = vpop.f32.mrb[126].mxu1  ;;  %v9495_v44 = vld [vmem:[%s15788_s10 + $0x38] sm:$0xff]  ;;  %v7814_v36 = vld [vmem:[%s15789_s11 + $0x8] sm:$0xff]  ;;  %v12830_v20 = vld [vmem:[%s15782_s4 + $0x50] sm:$0xff]  }
 0x8b2   : > { %v6406_v24 = vmul.f32 0.1, %v6398_v12  ;;  %v6399_v40 = vadd.f32 %v6391_v22, %v6216_v48  ;;  %v6378_v31 = vadd.f32 %v9483_v8, %v6366_v4  ;;  %v6367_v23 = vmul.f32 %v11458_v2, %v9482_v47  ;;  %v6342_v61 = vpop.f32.mrb[127].mxu1  ;;  %v12829_v29 = vld [vmem:[%s15782_s4 + $0x48] sm:$0xff]   ;;  %v12831_v19 = vld [vmem:[%s15782_s4 + $0x58] sm:$0xff]   ;;  %v12833_v22 = vld [vmem:[%s15783_s5] sm:$0xff]  }
 0x8b3   : > { %v6404_v6 = vmul.f32 0.1, %v6396_v3  ;;  %v6397_v28 = vadd.f32 %v6389_v11, %v15030_v59  ;;  %v6376_v7 = vadd.f32 %v9483_v8, %v6364_v27  ;;  %v6365_v58 = vmul.f32 %v9482_v47, %v6342_v61  ;;  %11538 = vmatpush3.bf16.msra.mxu0 %v12829_v29  ;;  %v12834_v4 = vld [vmem:[%s15782_s4 + $0x68] sm:$0xff]   ;;  %v12836_v11 = vld [vmem:[%s15783_s5 + $0x10] sm:$0xff]   ;;  %v12838_v27 = vld [vmem:[%s15783_s5 + $0x18] sm:$0xff]  }
 0x8b4   : > { %v6407_v1 = vmul.f32 0.1, %v6399_v40  ;;  %v6386_v43 = vmul.f32 0.1, %v6378_v31  ;;  %v6379_v55 = vadd.f32 %v9483_v8, %v6367_v23  ;;  %v6414_v0 = vmax.f32 %v6398_v12, %v6406_v24  ;;  %11539 = vmatprep.subr.bf16.mxu0 %v15052_v32  ;;  %v12832_v12 = vld [vmem:[%s15782_s4 + $0x60] sm:$0xff]   ;;  %v12835_v35 = vld [vmem:[%s15783_s5 + $0x8] sm:$0xff]  }
 0x8b5   : > { %v6405_v39 = vmul.f32 0.1, %v6397_v28  ;;  %v6384_v57 = vmul.f32 0.1, %v6376_v7  ;;  %v6377_v15 = vadd.f32 %v9483_v8, %v6365_v58  ;;  %v6412_v42 = vmax.f32 %v6396_v3, %v6404_v6  ;;  %v12837_v3 = vld [vmem:[%s15782_s4 + $0x70] sm:$0xff]   ;;  %v12839_v2 = vld [vmem:[%s15783_s5 + $0x20] sm:$0xff]  }
 0x8b6   : > { %v6415_v60 = vmax.f32 %v6399_v40, %v6407_v1  ;;  %v6394_v25 = vmax.f32 %v6378_v31, %v6386_v43  ;;  %v6387_v21 = vmul.f32 0.1, %v6379_v55  ;;  %v12840_v24 = vld [vmem:[%s15782_s4 + $0x78] sm:$0xff]   ;;  %v12841_v40 = vld [vmem:[%s15783_s5 + $0x28] sm:$0xff]   ;;  %v12842_v31 = vld [vmem:[%s15783_s5 + $0x30] sm:$0xff]  }
 0x8b7   : > { %v6413_v48 = vmax.f32 %v6397_v28, %v6405_v39  ;;  %v6392_v54 = vmax.f32 %v6376_v7, %v6384_v57  ;;  %v6385_v52 = vmul.f32 0.1, %v6377_v15  ;;  %11540 = vmatpush3.bf16.msra.mxu0 %v12830_v20  ;;  %v12844_v23 = vld [vmem:[%s15783_s5 + $0x38] sm:$0xff]   ;;  %v12861_v29 = vld [vmem:[%s15782_s4 + $0x88] sm:$0xff]   ;;  %v12862_v20 = vld [vmem:[%s15782_s4 + $0x90] sm:$0xff]  }
 0x8b8   : > { %v15062_v38 = vpack.c.bf16 %v6415_v60, %v6414_v0  ;;  %v6402_v59 = vadd.f32 %v6394_v25, %v15041_v5  ;;  %v6395_v41 = vmax.f32 %v6379_v55, %v6387_v21  ;;  %11541 = vmatprep.subr.bf16.mxu0 %v15052_v32 }
 0x8b9   : > { %v15065_v10 = vpack.c.bf16 %v6413_v48, %v6412_v42  ;;  %v6400_v56 = vadd.f32 %v6392_v54, %v15035_v50  ;;  %v6393_v47 = vmax.f32 %v6377_v15, %v6385_v52  ;;  %v12843_v54 = vld [vmem:[%s15782_s4] sm:$0xff]  }
 0x8ba   : > { %v6410_v17 = vmul.f32 0.1, %v6402_v59  ;;  %v6403_v8 = vadd.f32 %v6395_v41, %v15039_v14 }
 0x8bb   : > { %v6408_v34 = vmul.f32 0.1, %v6400_v56  ;;  %v6401_v18 = vadd.f32 %v6393_v47, %v15033_v46  ;;  %12084 = vmatprep.subr.bf16.mxu1 %v15065_v10  ;;  %v6421_v46 = vld [vmem:[%s15788_s10 + $0x8] sm:$0xff]  ;;  %11542 = vmatpush3.bf16.msra.mxu0 %v12831_v19  ;;  %v12846_v47 = vld [vmem:[%s15783_s5 + $0x100] sm:$0xff]   ;;  %v12863_v19 = vld [vmem:[%s15782_s4 + $0x98] sm:$0xff]  }
 0x8bc   : > { %v6411_v37 = vmul.f32 0.1, %v6403_v8  ;;  %12086 = vmatpush3.bf16.msra.mxu1 %v15065_v10  ;;  %v6418_v5 = vmax.f32 %v6402_v59, %v6410_v17  ;;  %11543 = vmatprep.subr.bf16.mxu0 %v15052_v32  ;;  %v12845_v59 = vld [vmem:[%s15782_s4 + $0x8] sm:$0xff]  }
 0x8bd   : > { %v6409_v26 = vmul.f32 0.1, %v6401_v18  ;;  %12088 = vmatprep.subr.bf16.mxu1 %v15062_v38  ;;  %v6416_v51 = vmax.f32 %v6400_v56, %v6408_v34  ;;  %v12848_v34 = vld [vmem:[%s15783_s5 + $0x108] sm:$0xff]  }
 0x8be   : > { %v6419_v9 = vmax.f32 %v6403_v8, %v6411_v37  ;;  %v12847_v8 = vld [vmem:[%s15782_s4 + $0x10] sm:$0xff]  }
 0x8bf   : > { %v6417_v13 = vmax.f32 %v6401_v18, %v6409_v26  ;;  %11544 = vmatpush3.bf16.msra.mxu0 %v12832_v12  ;;  %v12849_v18 = vld [vmem:[%s15782_s4 + $0x18] sm:$0xff]   ;;  %v12850_v37 = vld [vmem:[%s15783_s5 + $0x110] sm:$0xff]   ;;  %v12851_v26 = vld [vmem:[%s15782_s4 + $0x20] sm:$0xff]  }
 0x8c0   : > { %v15073_v50 = vpack.c.bf16 %v6419_v9, %v6418_v5  ;;  %12090 = vmatpush3.bf16.msra.mxu1 %v15062_v38  ;;  %11545 = vmatprep.subr.bf16.mxu0 %v15052_v32  ;;  %v12852_v5 = vld [vmem:[%s15783_s5 + $0x118] sm:$0xff]   ;;  %v12853_v9 = vld [vmem:[%s15782_s4 + $0x28] sm:$0xff]   ;;  %v12864_v12 = vld [vmem:[%s15782_s4 + $0xa0] sm:$0xff]  }
 0x8c1   : > { %v15076_v14 = vpack.c.bf16 %v6417_v13, %v6416_v51  ;;  %v12854_v51 = vld [vmem:[%s15783_s5 + $0x120] sm:$0xff]   ;;  %v12855_v13 = vld [vmem:[%s15782_s4 + $0x30] sm:$0xff]  }
 0x8c3   : > { %12092 = vmatprep.subr.bf16.mxu1 %v15076_v14  ;;  %11546 = vmatpush3.bf16.msra.mxu0 %v12834_v4  ;;  %v12866_v4 = vld [vmem:[%s15782_s4 + $0xb0] sm:$0xff]  }
 0x8c4   : > { %12094 = vmatpush3.bf16.msra.mxu1 %v15076_v14  ;;  %11547 = vmatprep.subr.bf16.mxu0 %v15052_v32 }
 0x8c5   : > { %12096 = vmatprep.subr.bf16.mxu1 %v15073_v50 }
 0x8c7   : > { %11548 = vmatpush3.bf16.msra.mxu0 %v12837_v3 }
 0x8c8   : > { %12098 = vmatpush3.bf16.msra.mxu1 %v15073_v50  ;;  %11549 = vmatprep.subr.bf16.mxu0 %v15052_v32 }
 0x8c9   : > { %12100 = vmatprep.subr.bf16.mxu1 %v15065_v10 }
 0x8cb   : > { %11476 = vmatmul.mubr.msk.f32.vlgmr.msra.gmra.mrb[128].mxu1 %vm5653_vm11, %v6421_v46  ;;  %11550 = vmatpush3.bf16.msra.mxu0 %v12840_v24  ;;  %v6765_v46 = vand.u32 3, %v16052_v33  ;;  %v12858_v33 = vld [vmem:[%s15783_s5 + $0x130] sm:$0xff]  }
 0x8cc   : > { %12102 = vmatpush3.bf16.msra.mxu1 %v15065_v10  ;;  %11494 = vmatprep.mubr.msk.f32.mxu1 %vm5653_vm11, %v9486_v45  ;;  %v6766_v45 = vand.u32 3, %v16053_v53 }
 0x8cd   : > { %12104 = vmatprep.subr.bf16.mxu1 %v15062_v38  ;;  %11555 = vmatprep.subr.bf16.mxu0 %v15052_v32  ;;  %vm6769_vm0 = vcmp.gt.s32.totalorder %v6765_v46, 0  ;;  %vm6990_vm9 = vcmp.lt.s32.totalorder %v6765_v46, 3  ;;  %v12898_v46 = vld [vmem:[%s15782_s4 + $0x1b0] sm:$0xff]  }
 0x8ce   : > { %vm6770_vm5 = vcmp.gt.s32.totalorder %v6766_v45, 0  ;;  %vm6991_vm15 = vcmp.lt.s32.totalorder %v6766_v45, 3  ;;  %v12899_v45 = vld [vmem:[%s15782_s4 + $0x1b8] sm:$0xff]  }
 0x8cf   : > { %vm15292_vm6 = vmpackc.low %vm6770_vm5, %vm6769_vm0 }
 0x8d0   : > { %12106 = vmatpush3.bf16.msra.mxu1 %v15062_v38  ;;  %vm15340_vm1 = vmpackc.low %vm6991_vm15, %vm6990_vm9 }
 0x8d1   : > { %12108 = vmatprep.subr.bf16.mxu1 %v15076_v14 }
 0x8d4   : > { %12110 = vmatpush3.bf16.msra.mxu1 %v15076_v14 }
 0x8d5   : > { %12112 = vmatprep.subr.bf16.mxu1 %v15073_v50 }
 0x8d8   : > { %12114 = vmatpush3.bf16.msra.mxu1 %v15073_v50 }
 0x8d9   : > { %12116 = vmatprep.subr.bf16.mxu1 %v15065_v10 }
 0x8db   : > { %11495 = vmatmul.mubr.msk.f32.vlgmr.msra.gmra.mrb[130].mxu1 %vm5653_vm11, %v9487_v62  ;;  %v12856_v62 = vld [vmem:[%s15783_s5 + $0x128] sm:$0xff]  }
 0x8dc   : > { %12118 = vmatpush3.bf16.msra.mxu1 %v15065_v10  ;;  %11513 = vmatprep.mubr.msk.f32.mxu1 %vm5653_vm11, %v9490_v63  ;;  %v12857_v63 = vld [vmem:[%s15782_s4 + $0x38] sm:$0xff]  }
 0x8dd   : > { %12120 = vmatprep.subr.bf16.mxu1 %v15062_v38 }
 0x8e0   : > { %12122 = vmatpush3.bf16.msra.mxu1 %v15062_v38 }
 0x8e1   : > { %12124 = vmatprep.subr.bf16.mxu1 %v15076_v14 }
 0x8e4   : > { %12126 = vmatpush3.bf16.msra.mxu1 %v15076_v14 }
 0x8e5   : > { %12128 = vmatprep.subr.bf16.mxu1 %v15073_v50 }
 0x8e8   : > { %12130 = vmatpush3.bf16.msra.mxu1 %v15073_v50 }
 0x8e9   : > { %12132 = vmatprep.subr.bf16.mxu1 %v15065_v10 }
 0x8eb   : > { %11514 = vmatmul.mubr.msk.f32.vlgmr.msra.gmra.mrb[132].mxu1 %vm5653_vm11, %v9491_v30 }
 0x8ec   : > { %12134 = vmatpush3.bf16.msra.mxu1 %v15065_v10  ;;  %11532 = vmatprep.mubr.msk.f32.mxu1 %vm5653_vm11, %v9494_v49  ;;  %v12903_v49 = vld [vmem:[%s15782_s4 + $0x1d8] sm:$0xff]  }
 0x8ed   : > { %12136 = vmatprep.subr.bf16.mxu1 %v15062_v38 }
 0x8f0   : > { %12138 = vmatpush3.bf16.msra.mxu1 %v15062_v38 }
 0x8f1   : > { %12140 = vmatprep.subr.bf16.mxu1 %v15076_v14 }
 0x8f4   : > { %12142 = vmatpush3.bf16.msra.mxu1 %v15076_v14 }
 0x8f5   : > { %12144 = vmatprep.subr.bf16.mxu1 %v15073_v50 }
 0x8f8   : > { %12146 = vmatpush3.bf16.msra.mxu1 %v15073_v50 }
 0x8f9   : > { %12148 = vmatprep.subr.bf16.mxu1 %v15065_v10 }
 0x8fb   : > { %11533 = vmatmul.mubr.msk.f32.vlgmr.msra.gmra.mrb[134].mxu1 %vm5653_vm11, %v9495_v44  ;;  %v12859_v44 = vld [vmem:[%s15782_s4 + $0x80] sm:$0xff]  }
 0x8fc   : > { %12150 = vmatpush3.bf16.msra.mxu1 %v15065_v10  ;;  %11731 = vmatprep.mubr.msk.f32.mxu1 %vm5653_vm11, %v7813_v16 }
 0x8fd   : > { %12152 = vmatprep.subr.bf16.mxu1 %v15062_v38 }
 0x900   : > { %12154 = vmatpush3.bf16.msra.mxu1 %v15062_v38 }
 0x901   : > { %12156 = vmatprep.subr.bf16.mxu1 %v15076_v14 }
 0x904   : > { %12158 = vmatpush3.bf16.msra.mxu1 %v15076_v14 }
 0x905   : > { %12160 = vmatprep.subr.bf16.mxu1 %v15073_v50 }
 0x908   : > { %12162 = vmatpush3.bf16.msra.mxu1 %v15073_v50 }
 0x909   : > { %11734 = vmatprep.subr.bf16.mxu1 %v15052_v32 }
 0x90b   : > { %11732 = vmatmul.mubr.msk.f32.vlgmr.msra.gmra.mrb[136].mxu1 %vm5653_vm11, %v7814_v36  ;;  %v12860_v36 = vld [vmem:[%s15783_s5 + $0x138] sm:$0xff]  }
 0x90c   : > { %11735 = vmatpush3.bf16.msra.mxu1 %v12833_v22  ;;  %11750 = vmatprep.mubr.msk.bf16.mxu1 %vm13130_vm7, %v15052_v32  ;;  %v12865_v22 = vld [vmem:[%s15782_s4 + $0xa8] sm:$0xff]  }
 0x90d   : > { %11736 = vmatprep.subr.bf16.mxu1 %v15052_v32 }
 0x910   : > { %11737 = vmatpush3.bf16.msra.mxu1 %v12835_v35  ;;  %v12867_v35 = vld [vmem:[%s15782_s4 + $0xb8] sm:$0xff]  }
 0x911   : > { %11738 = vmatprep.subr.bf16.mxu1 %v15052_v32 }
 0x914   : > { %11739 = vmatpush3.bf16.msra.mxu1 %v12836_v11 }
 0x915   : > { %11740 = vmatprep.subr.bf16.mxu1 %v15052_v32 }
 0x918   : > { %11741 = vmatpush3.bf16.msra.mxu1 %v12838_v27 }
 0x919   : > { %11742 = vmatprep.subr.bf16.mxu1 %v15052_v32 }
 0x91c   : > { %11743 = vmatpush3.bf16.msra.mxu1 %v12839_v2  ;;  %v12868_v2 = vld [vmem:[%s15782_s4 + $0xc0] sm:$0xff]  }
 0x91d   : > { %11744 = vmatprep.subr.bf16.mxu1 %v15052_v32 }
 0x920   : > { %11745 = vmatpush3.bf16.msra.mxu1 %v12841_v40  ;;  %v12869_v40 = vld [vmem:[%s15782_s4 + $0xc8] sm:$0xff]  }
 0x921   : > { %11746 = vmatprep.subr.bf16.mxu1 %v15052_v32 }
 0x924   : > { %11747 = vmatpush3.bf16.msra.mxu1 %v12842_v31  ;;  %v12870_v31 = vld [vmem:[%s15782_s4 + $0xd0] sm:$0xff]  }
 0x925   : > { %11748 = vmatprep.subr.bf16.mxu1 %v15052_v32 }
 0x928   : > { %11749 = vmatpush3.bf16.msra.mxu1 %v12844_v23  ;;  %v12871_v23 = vld [vmem:[%s15782_s4 + $0xd8] sm:$0xff]  }
 0x929   : > { %11754 = vmatprep.subr.bf16.mxu1 %v15052_v32 }
 0x99e   : > { %v11477_v61 = vpop.f32.mrb[128].mxu1 }
 0x99f   : > { %v6494_v6 = vpop.f32.mrb[129].mxu1 }
 0x9ae   : > { %v11496_v28 = vpop.f32.mrb[130].mxu1 }
 0x9af   : > { %v6588_v7 = vmax.f32 %v11477_v61, %v11496_v28  ;;  %v6578_v58 = vpop.f32.mrb[131].mxu1  ;;  %v12872_v61 = vld [vmem:[%s15782_s4 + $0xe0] sm:$0xff]   ;;  %v12874_v28 = vld [vmem:[%s15782_s4 + $0xf0] sm:$0xff]  }
 0x9b0   : > { %v6587_v1 = vmax.f32 %v6494_v6, %v6578_v58  ;;  %v12873_v6 = vld [vmem:[%s15782_s4 + $0xe8] sm:$0xff]  }
 0x9be   : > { %v11515_v43 = vpop.f32.mrb[132].mxu1 }
 0x9bf   : > { %v6674_v55 = vmax.f32 %v6588_v7, %v11515_v43  ;;  %v6664_v39 = vpop.f32.mrb[133].mxu1  ;;  %v12875_v7 = vld [vmem:[%s15782_s4 + $0xf8] sm:$0xff]   ;;  %v12876_v43 = vld [vmem:[%s15782_s4 + $0x100] sm:$0xff]  }
 0x9c0   : > { %v6673_v57 = vmax.f32 %v6587_v1, %v6664_v39  ;;  %v12877_v39 = vld [vmem:[%s15782_s4 + $0x108] sm:$0xff]  }
 0x9ce   : > { %v11534_v15 = vpop.f32.mrb[134].mxu1 }
 0x9cf   : > { %v15215_v0 = vmax.f32 %v6674_v55, %v11534_v15  ;;  %v6750_v60 = vpop.f32.mrb[135].mxu1  ;;  %v12879_v15 = vld [vmem:[%s15782_s4 + $0x118] sm:$0xff]  }
 0x9d0   : > { %v15217_v25 = vmax.f32 %v6673_v57, %v6750_v60  ;;  %v12878_v57 = vld [vmem:[%s15782_s4 + $0x110] sm:$0xff]   ;;  %v12880_v60 = vld [vmem:[%s15782_s4 + $0x120] sm:$0xff]  }
 0x9d1   : > { %6764 = vst [vmem:[#allocation2 + $0xd] sm:$0xff] %v15215_v0 }
 0x9d2   : > { %6763 = vst [vmem:[#allocation2 + $0x5] sm:$0xff] %v15217_v25  ;;  %v7218_v21 = vpack.c.bf16 %v15215_v0, %v15217_v25  ;;  %v12887_v0 = vld [vmem:[%s15782_s4 + $0x158] sm:$0xff]   ;;  %v12888_v25 = vld [vmem:[%s15782_s4 + $0x160] sm:$0xff]  }
 0x9d9   : > { %v6790_v42 = vld [vmem:[#allocation2 + $0x1] sm:$0xff]  ;;  %v15223_v48 = vld [vmem:[#allocation2 + $0x9] sm:$0xff] }
 0x9da   : > { %v6792_v52 = vpack.c.bf16 %v15223_v48, %v6790_v42  ;;  %v6767_v53 = vld [vmem:[#allocation2] sm:$0xff]  ;;  %v15289_v30 = vld [vmem:[#allocation2 + $0x8] sm:$0xff] }
 0x9db   : > { %v9531_v16 = vpack.c.bf16 %v15289_v30, %v6767_v53  ;;  %v6988_v3 = vld [vmem:[#allocation2 + $0x2] sm:$0xff]  ;;  %v15338_v11 = vld [vmem:[#allocation2 + $0xa] sm:$0xff] }
 0x9dc   : > { %11552 = vmatmul.mubr.bf16.vlgmr.msra.gmra.mrb[32].mxu0 %v6792_v52  ;;  %v9558_v24 = vpack.c.bf16 %v15338_v11, %v6988_v3  ;;  %v7103_v58 = vld [vmem:[#allocation2 + $0x4] sm:$0xff]  ;;  %v7104_v1 = vld [vmem:[#allocation2 + $0xc] sm:$0xff]  ;;  %v12883_v52 = vld [vmem:[%s15782_s4 + $0x138] sm:$0xff]  }
 0x9dd   : > { %11556 = vmatpush3.bf16.msra.mxu0 %v12843_v54  ;;  %11571 = vmatprep.mubr.msk.bf16.mxu0 %vm13130_vm7, %v15052_v32  ;;  %v9585_v55 = vpack.c.bf16 %v7104_v1, %v7103_v58  ;;  %v12881_v42 = vld [vmem:[%s15782_s4 + $0x128] sm:$0xff]   ;;  %v12882_v54 = vld [vmem:[%s15782_s4 + $0x130] sm:$0xff]  }
 0x9de   : > { %v11733_v41 = vpop.f32.mrb[136].mxu1  ;;  %11557 = vmatprep.subr.bf16.mxu0 %v15052_v32  ;;  %v12901_v53 = vld [vmem:[%s15782_s4 + $0x1c8] sm:$0xff]  }
 0x9df   : > { %v7887_v56 = vpop.f32.mrb[137].mxu1  ;;  %v12913_v3 = vld [vmem:[%s15782_s4 + $0x228] sm:$0xff]  }
 0x9e0   : > { %v7896_v17 = vpack.c.bf16 %v11733_v41, %v7887_v56  ;;  %v12885_v41 = vld [vmem:[%s15782_s4 + $0x148] sm:$0xff]   ;;  %v12886_v56 = vld [vmem:[%s15782_s4 + $0x150] sm:$0xff]  }
 0x9e1   : > { %11558 = vmatpush3.bf16.msra.mxu0 %v12845_v59  ;;  %v12884_v59 = vld [vmem:[%s15782_s4 + $0x140] sm:$0xff]  }
 0x9e2   : > { %11751 = vmatmul.mubr.bf16.vlgmr.msra.gmra.mrb[140].mxu1 %v7896_v17  ;;  %11559 = vmatprep.subr.bf16.mxu0 %v15052_v32  ;;  %v12891_v17 = vld [vmem:[%s15782_s4 + $0x178] sm:$0xff]  }
 0x9e3   : > { %11755 = vmatpush3.bf16.msra.mxu1 %v12846_v47  ;;  %11770 = vmatprep.mubr.msk.bf16.mxu1 %vm13130_vm7, %v15052_v32  ;;  %v12890_v47 = vld [vmem:[%s15782_s4 + $0x170] sm:$0xff]  }
 0x9e4   : > { %11756 = vmatprep.subr.bf16.mxu1 %v15052_v32 }
 0x9e5   : > { %11560 = vmatpush3.bf16.msra.mxu0 %v12847_v8  ;;  %v7327_v8 = vld [vmem:[#allocation2 + $0x6] sm:$0xff] }
 0x9e6   : > { %11561 = vmatprep.subr.bf16.mxu0 %v15052_v32 }
 0x9e7   : > { %11757 = vmatpush3.bf16.msra.mxu1 %v12848_v34  ;;  %v7328_v34 = vld [vmem:[#allocation2 + $0xe] sm:$0xff] }
 0x9e8   : > { %11758 = vmatprep.subr.bf16.mxu1 %v15052_v32 }
 0x9e9   : > { %11562 = vmatpush3.bf16.msra.mxu0 %v12849_v18  ;;  %v12892_v18 = vld [vmem:[%s15782_s4 + $0x180] sm:$0xff]  }
 0x9ea   : > { %11563 = vmatprep.subr.bf16.mxu0 %v15052_v32 }
 0x9eb   : > { %11759 = vmatpush3.bf16.msra.mxu1 %v12850_v37  ;;  %v9636_v37 = vpack.c.bf16 %v7328_v34, %v7327_v8 }
 0x9ec   : > { %11760 = vmatprep.subr.bf16.mxu1 %v15052_v32 }
 0x9ed   : > { %11564 = vmatpush3.bf16.msra.mxu0 %v12851_v26  ;;  %v12893_v26 = vld [vmem:[%s15782_s4 + $0x188] sm:$0xff]  }
 0x9ee   : > { %11565 = vmatprep.subr.bf16.mxu0 %v15052_v32 }
 0x9ef   : > { %11761 = vmatpush3.bf16.msra.mxu1 %v12852_v5  ;;  %v12894_v5 = vld [vmem:[%s15782_s4 + $0x190] sm:$0xff]  }
 0x9f0   : > { %11762 = vmatprep.subr.bf16.mxu1 %v15052_v32 }
 0x9f1   : > { %11566 = vmatpush3.bf16.msra.mxu0 %v12853_v9  ;;  %v12895_v9 = vld [vmem:[%s15782_s4 + $0x198] sm:$0xff]  }
 0x9f2   : > { %11567 = vmatprep.subr.bf16.mxu0 %v15052_v32 }
 0x9f3   : > { %11763 = vmatpush3.bf16.msra.mxu1 %v12854_v51  ;;  %v12896_v51 = vld [vmem:[%s15782_s4 + $0x1a0] sm:$0xff]  }
 0x9f4   : > { %11764 = vmatprep.subr.bf16.mxu1 %v15052_v32 }
 0x9f5   : > { %11568 = vmatpush3.bf16.msra.mxu0 %v12855_v13  ;;  %v12897_v13 = vld [vmem:[%s15782_s4 + $0x1a8] sm:$0xff]  }
 0x9f6   : > { %11569 = vmatprep.subr.bf16.mxu0 %v15052_v32 }
 0x9f7   : > { %11765 = vmatpush3.bf16.msra.mxu1 %v12856_v62  ;;  %v7441_v62 = vld [vmem:[#allocation2 + $0x10] sm:$0xff] }
 0x9f8   : > { %11766 = vmatprep.subr.bf16.mxu1 %v15052_v32 }
 0x9f9   : > { %11570 = vmatpush3.bf16.msra.mxu0 %v12857_v63  ;;  %v12900_v63 = vld [vmem:[%s15782_s4 + $0x1c0] sm:$0xff]  }
 0x9fa   : > { %11575 = vmatprep.subr.bf16.mxu0 %v15052_v32 }
 0x9fb   : > { %11767 = vmatpush3.bf16.msra.mxu1 %v12858_v33  ;;  %v9663_v33 = vpack.c.bf16 %v7441_v62, %v15289_v30  ;;  %v12902_v30 = vld [vmem:[%s15782_s4 + $0x1d0] sm:$0xff]   ;;  %v12931_v62 = vld [vmem:[%s15783_s5 + $0xb8] sm:$0xff]  }
 0x9fc   : > { %11572 = vmatmul.mubr.msk.bf16.vlgmr.msra.gmra.mrb[32].mxu0 %vm15292_vm6, %v9531_v16  ;;  %11768 = vmatprep.subr.bf16.mxu1 %v15052_v32  ;;  %v12905_v16 = vld [vmem:[%s15782_s4 + $0x1e8] sm:$0xff]  }
 0x9fd   : > { %11576 = vmatpush3.bf16.msra.mxu0 %v12859_v44  ;;  %11591 = vmatprep.mubr.msk.bf16.mxu0 %vm13130_vm7, %v15052_v32  ;;  %v12904_v44 = vld [vmem:[%s15782_s4 + $0x1e0] sm:$0xff]  }
 0x9fe   : > { %11577 = vmatprep.subr.bf16.mxu0 %v15052_v32 }
 0x9ff   : > { %11769 = vmatpush3.bf16.msra.mxu1 %v12860_v36  ;;  %v12906_v36 = vld [vmem:[%s15782_s4 + $0x1f0] sm:$0xff]  }
 0xa00   : > { %12164 = vmatprep.subr.bf16.mxu1 %v15065_v10 }
 0xa01   : > { %11578 = vmatpush3.bf16.msra.mxu0 %v12861_v29  ;;  %v12907_v29 = vld [vmem:[%s15782_s4 + $0x1f8] sm:$0xff]  }
 0xa02   : > { %11579 = vmatprep.subr.bf16.mxu0 %v15052_v32 }
 0xa05   : > { %11580 = vmatpush3.bf16.msra.mxu0 %v12862_v20  ;;  %v7554_v20 = vld [vmem:[#allocation2 + $0x11] sm:$0xff] }
 0xa06   : > { %11581 = vmatprep.subr.bf16.mxu0 %v15052_v32 }
 0xa09   : > { %11582 = vmatpush3.bf16.msra.mxu0 %v12863_v19  ;;  %v12908_v19 = vld [vmem:[%s15782_s4 + $0x200] sm:$0xff]  }
 0xa0a   : > { %11583 = vmatprep.subr.bf16.mxu0 %v15052_v32 }
 0xa0d   : > { %11584 = vmatpush3.bf16.msra.mxu0 %v12864_v12  ;;  %v7555_v12 = vpack.c.bf16 %v7554_v20, %v15223_v48  ;;  %v12911_v48 = vld [vmem:[%s15782_s4 + $0x218] sm:$0xff]  }
 0xa0e   : > { %11585 = vmatprep.subr.bf16.mxu0 %v15052_v32 }
 0xa11   : > { %11586 = vmatpush3.bf16.msra.mxu0 %v12865_v22  ;;  %v12909_v22 = vld [vmem:[%s15782_s4 + $0x208] sm:$0xff]  }
 0xa12   : > { %11587 = vmatprep.subr.bf16.mxu0 %v15052_v32 }
 0xa15   : > { %11588 = vmatpush3.bf16.msra.mxu0 %v12866_v4  ;;  %v12910_v4 = vld [vmem:[%s15782_s4 + $0x210] sm:$0xff]  }
 0xa16   : > { %11589 = vmatprep.subr.bf16.mxu0 %v15052_v32 }
 0xa19   : > { %11590 = vmatpush3.bf16.msra.mxu0 %v12867_v35  ;;  %v12912_v35 = vld [vmem:[%s15782_s4 + $0x220] sm:$0xff]  }
 0xa1a   : > { %11595 = vmatprep.subr.bf16.mxu0 %v15052_v32 }
 0xa1c   : > { %11592 = vmatmul.mubr.msk.bf16.vlgmr.msra.gmra.mrb[32].mxu0 %vm15340_vm1, %v9558_v24  ;;  %v12915_v24 = vld [vmem:[%s15782_s4 + $0x238] sm:$0xff]  }
 0xa1d   : > { %11596 = vmatpush3.bf16.msra.mxu0 %v12868_v2  ;;  %11611 = vmatprep.mubr.msk.bf16.mxu0 %vm13130_vm7, %v15052_v32  ;;  %v12914_v2 = vld [vmem:[%s15782_s4 + $0x230] sm:$0xff]  }
 0xa1e   : > { %11597 = vmatprep.subr.bf16.mxu0 %v15052_v32 }
 0xa21   : > { %11598 = vmatpush3.bf16.msra.mxu0 %v12869_v40  ;;  %v7665_v40 = vld [vmem:[#allocation2 + $0x12] sm:$0xff] }
 0xa22   : > { %11599 = vmatprep.subr.bf16.mxu0 %v15052_v32 }
 0xa25   : > { %11600 = vmatpush3.bf16.msra.mxu0 %v12870_v31  ;;  %v9714_v31 = vpack.c.bf16 %v7665_v40, %v15338_v11 }
 0xa26   : > { %11601 = vmatprep.subr.bf16.mxu0 %v15052_v32 }
 0xa29   : > { %11602 = vmatpush3.bf16.msra.mxu0 %v12871_v23  ;;  %v9716_v23 = vld [vmem:[%s15784_s6 + $0x3] ss:$0 sm:$0xff] }
 0xa2a   : > { %11603 = vmatprep.subr.bf16.mxu0 %v15052_v32 }
 0xa2d   : > { %11604 = vmatpush3.bf16.msra.mxu0 %v12872_v61 }
 0xa2e   : > { %11605 = vmatprep.subr.bf16.mxu0 %v15052_v32 }
 0xa31   : > { %11606 = vmatpush3.bf16.msra.mxu0 %v12873_v6  ;;  %v9717_v6 = vld [vmem:[%s15785_s7 + $0x3] ss:$0 sm:$0xff] }
 0xa32   : > { %11607 = vmatprep.subr.bf16.mxu0 %v15052_v32 }
 0xa35   : > { %11608 = vmatpush3.bf16.msra.mxu0 %v12874_v28 }
 0xa36   : > { %11609 = vmatprep.subr.bf16.mxu0 %v15052_v32 }
 0xa39   : > { %11610 = vmatpush3.bf16.msra.mxu0 %v12875_v7 }
 0xa3a   : > { %11615 = vmatprep.subr.bf16.mxu0 %v15052_v32 }
 0xa3c   : > { %11612 = vmatmul.mubr.msk.bf16.vlgmr.msra.gmra.mrb[32].mxu0 %vm15292_vm6, %v9585_v55 }
 0xa3d   : > { %11616 = vmatpush3.bf16.msra.mxu0 %v12876_v43  ;;  %11631 = vmatprep.mubr.msk.bf16.mxu0 %vm13130_vm7, %v15052_v32 }
 0xa3e   : > { %11617 = vmatprep.subr.bf16.mxu0 %v15052_v32 }
 0xa41   : > { %11618 = vmatpush3.bf16.msra.mxu0 %v12877_v39 }
 0xa42   : > { %11619 = vmatprep.subr.bf16.mxu0 %v15052_v32 }
 0xa45   : > { %11620 = vmatpush3.bf16.msra.mxu0 %v12878_v57 }
 0xa46   : > { %11621 = vmatprep.subr.bf16.mxu0 %v15052_v32 }
 0xa49   : > { %11622 = vmatpush3.bf16.msra.mxu0 %v12879_v15 }
 0xa4a   : > { %11623 = vmatprep.subr.bf16.mxu0 %v15052_v32 }
 0xa4d   : > { %11624 = vmatpush3.bf16.msra.mxu0 %v12880_v60 }
 0xa4e   : > { %11625 = vmatprep.subr.bf16.mxu0 %v15052_v32 }
 0xa51   : > { %11626 = vmatpush3.bf16.msra.mxu0 %v12881_v42  ;;  %v9752_v42 = vld [vmem:[%s15789_s11 + $0x10] sm:$0xff] }
 0xa52   : > { %11627 = vmatprep.subr.bf16.mxu0 %v15052_v32 }
 0xa55   : > { %11628 = vmatpush3.bf16.msra.mxu0 %v12882_v54  ;;  %v9753_v54 = vld [vmem:[%s15789_s11 + $0x18] sm:$0xff] }
 0xa56   : > { %11629 = vmatprep.subr.bf16.mxu0 %v15052_v32 }
 0xa59   : > { %11630 = vmatpush3.bf16.msra.mxu0 %v12883_v52  ;;  %v12916_v52 = vld [vmem:[%s15783_s5 + $0x40] sm:$0xff]  }
 0xa5a   : > { %11635 = vmatprep.subr.bf16.mxu0 %v15052_v32 }
 0xa5c   : > { %11632 = vmatmul.mubr.bf16.vlgmr.msra.gmra.mrb[32].mxu0 %v7218_v21  ;;  %v12889_v21 = vld [vmem:[%s15782_s4 + $0x168] sm:$0xff]  }
 0xa5d   : > { %11636 = vmatpush3.bf16.msra.mxu0 %v12884_v59  ;;  %11651 = vmatprep.mubr.msk.bf16.mxu0 %vm13130_vm7, %v15052_v32  ;;  %v12917_v59 = vld [vmem:[%s15783_s5 + $0x48] sm:$0xff]  }
 0xa5e   : > { %11637 = vmatprep.subr.bf16.mxu0 %v15052_v32 }
 0xa61   : > { %11638 = vmatpush3.bf16.msra.mxu0 %v12885_v41  ;;  %v12918_v41 = vld [vmem:[%s15783_s5 + $0x50] sm:$0xff]  }
 0xa62   : > { %11639 = vmatprep.subr.bf16.mxu0 %v15052_v32 }
 0xa65   : > { %11640 = vmatpush3.bf16.msra.mxu0 %v12886_v56  ;;  %v12919_v56 = vld [vmem:[%s15783_s5 + $0x58] sm:$0xff]  }
 0xa66   : > { %11641 = vmatprep.subr.bf16.mxu0 %v15052_v32 }
 0xa69   : > { %11642 = vmatpush3.bf16.msra.mxu0 %v12887_v0  ;;  %v12920_v0 = vld [vmem:[%s15783_s5 + $0x60] sm:$0xff]  }
 0xa6a   : > { %11643 = vmatprep.subr.bf16.mxu0 %v15052_v32 }
 0xa6d   : > { %11644 = vmatpush3.bf16.msra.mxu0 %v12888_v25  ;;  %v12921_v25 = vld [vmem:[%s15783_s5 + $0x68] sm:$0xff]  }
 0xa6e   : > { %11645 = vmatprep.subr.bf16.mxu0 %v15052_v32 }
 0xa71   : > { %11646 = vmatpush3.bf16.msra.mxu0 %v12889_v21  ;;  %v12922_v21 = vld [vmem:[%s15783_s5 + $0x70] sm:$0xff]  }
 0xa72   : > { %11647 = vmatprep.subr.bf16.mxu0 %v15052_v32 }
 0xa75   : > { %11648 = vmatpush3.bf16.msra.mxu0 %v12890_v47  ;;  %v12923_v47 = vld [vmem:[%s15783_s5 + $0x78] sm:$0xff]  }
 0xa76   : > { %11649 = vmatprep.subr.bf16.mxu0 %v15052_v32 }
 0xa79   : > { %11650 = vmatpush3.bf16.msra.mxu0 %v12891_v17 }
 0xa7a   : > { %11655 = vmatprep.subr.bf16.mxu0 %v15052_v32 }
 0xa7c   : > { %11652 = vmatmul.mubr.msk.bf16.vlgmr.msra.gmra.mrb[32].mxu0 %vm15340_vm1, %v9636_v37  ;;  %v12924_v37 = vld [vmem:[%s15783_s5 + $0x80] sm:$0xff]  }
 0xa7d   : > { %11656 = vmatpush3.bf16.msra.mxu0 %v12892_v18  ;;  %11671 = vmatprep.mubr.msk.bf16.mxu0 %vm13130_vm7, %v15052_v32  ;;  %v9780_v18 = vld [vmem:[%s15789_s11 + $0x20] sm:$0xff] }
 0xa7e   : > { %11657 = vmatprep.subr.bf16.mxu0 %v15052_v32 }
 0xa81   : > { %11658 = vmatpush3.bf16.msra.mxu0 %v12893_v26  ;;  %v15638_v26 = vld [vmem:[#allocation2 + $0x111] sm:$0xff] }
 0xa82   : > { %11659 = vmatprep.subr.bf16.mxu0 %v15052_v32 }
 0xa85   : > { %11660 = vmatpush3.bf16.msra.mxu0 %v12894_v5  ;;  %v12925_v5 = vld [vmem:[%s15783_s5 + $0x88] sm:$0xff]  }
 0xa86   : > { %11661 = vmatprep.subr.bf16.mxu0 %v15052_v32 }
 0xa89   : > { %11662 = vmatpush3.bf16.msra.mxu0 %v12895_v9  ;;  %v12926_v9 = vld [vmem:[%s15783_s5 + $0x90] sm:$0xff]  }
 0xa8a   : > { %11663 = vmatprep.subr.bf16.mxu0 %v15052_v32 }
 0xa8d   : > { %11664 = vmatpush3.bf16.msra.mxu0 %v12896_v51  ;;  %v12927_v51 = vld [vmem:[%s15783_s5 + $0x98] sm:$0xff]  }
 0xa8e   : > { %11665 = vmatprep.subr.bf16.mxu0 %v15052_v32 }
 0xa91   : > { %11666 = vmatpush3.bf16.msra.mxu0 %v12897_v13  ;;  %v12928_v13 = vld [vmem:[%s15783_s5 + $0xa0] sm:$0xff]  }
 0xa92   : > { %11667 = vmatprep.subr.bf16.mxu0 %v15052_v32 }
 0xa95   : > { %11668 = vmatpush3.bf16.msra.mxu0 %v12898_v46  ;;  %v12929_v46 = vld [vmem:[%s15783_s5 + $0xa8] sm:$0xff]  }
 0xa96   : > { %11669 = vmatprep.subr.bf16.mxu0 %v15052_v32 }
 0xa99   : > { %11670 = vmatpush3.bf16.msra.mxu0 %v12899_v45  ;;  %v12930_v45 = vld [vmem:[%s15783_s5 + $0xb0] sm:$0xff]  }
 0xa9a   : > { %11675 = vmatprep.subr.bf16.mxu0 %v15052_v32 }
 0xa9c   : > { %11672 = vmatmul.mubr.msk.bf16.vlgmr.msra.gmra.mrb[32].mxu0 %vm15292_vm6, %v9663_v33 }
 0xa9d   : > { %11676 = vmatpush3.bf16.msra.mxu0 %v12900_v63  ;;  %11691 = vmatprep.mubr.msk.bf16.mxu0 %vm13130_vm7, %v15052_v32 }
 0xa9e   : > { %11677 = vmatprep.subr.bf16.mxu0 %v15052_v32 }
 0xaa1   : > { %11678 = vmatpush3.bf16.msra.mxu0 %v12901_v53 }
 0xaa2   : > { %11679 = vmatprep.subr.bf16.mxu0 %v15052_v32 }
 0xaa5   : > { %11680 = vmatpush3.bf16.msra.mxu0 %v12902_v30  ;;  %v9808_v30 = vld [vmem:[%s15789_s11 + $0x30] sm:$0xff] }
 0xaa6   : > { %11681 = vmatprep.subr.bf16.mxu0 %v15052_v32 }
 0xaa9   : > { %11682 = vmatpush3.bf16.msra.mxu0 %v12903_v49  ;;  %v9809_v49 = vld [vmem:[%s15789_s11 + $0x38] sm:$0xff] }
 0xaaa   : > { %11683 = vmatprep.subr.bf16.mxu0 %v15052_v32 }
 0xaad   : > { %11684 = vmatpush3.bf16.msra.mxu0 %v12904_v44  ;;  %v12936_v44 = vld [vmem:[%s15783_s5 + $0xe0] sm:$0xff]  }
 0xaae   : > { %11685 = vmatprep.subr.bf16.mxu0 %v15052_v32 }
 0xab1   : > { %11686 = vmatpush3.bf16.msra.mxu0 %v12905_v16  ;;  %v12937_v16 = vld [vmem:[%s15783_s5 + $0xe8] sm:$0xff]  }
 0xab2   : > { %11687 = vmatprep.subr.bf16.mxu0 %v15052_v32 }
 0xab5   : > { %11688 = vmatpush3.bf16.msra.mxu0 %v12906_v36  ;;  %v12938_v36 = vld [vmem:[%s15783_s5 + $0xf0] sm:$0xff]  }
 0xab6   : > { %11689 = vmatprep.subr.bf16.mxu0 %v15052_v32 }
 0xab9   : > { %11690 = vmatpush3.bf16.msra.mxu0 %v12907_v29  ;;  %v12939_v29 = vld [vmem:[%s15783_s5 + $0xf8] sm:$0xff]  }
 0xaba   : > { %11695 = vmatprep.subr.bf16.mxu0 %v15052_v32 }
 0xabc   : > { %11692 = vmatmul.mubr.bf16.vlgmr.msra.gmra.mrb[32].mxu0 %v7555_v12 }
 0xabd   : > { %11696 = vmatpush3.bf16.msra.mxu0 %v12908_v19  ;;  %11711 = vmatprep.mubr.msk.bf16.mxu0 %vm13130_vm7, %v15052_v32 }
 0xabe   : > { %11697 = vmatprep.subr.bf16.mxu0 %v15052_v32 }
 0xac1   : > { %11698 = vmatpush3.bf16.msra.mxu0 %v12909_v22  ;;  %v9836_v22 = vld [vmem:[%s15784_s6 + $0x4] ss:$0 sm:$0xff] }
 0xac2   : > { %11699 = vmatprep.subr.bf16.mxu0 %v15052_v32 }
 0xac5   : > { %11700 = vmatpush3.bf16.msra.mxu0 %v12910_v4 }
 0xac6   : > { %11701 = vmatprep.subr.bf16.mxu0 %v15052_v32 }
 0xac9   : > { %11702 = vmatpush3.bf16.msra.mxu0 %v12911_v48  ;;  %v9837_v48 = vld [vmem:[%s15785_s7 + $0x4] ss:$0 sm:$0xff] }
 0xaca   : > { %11703 = vmatprep.subr.bf16.mxu0 %v15052_v32 }
 0xacd   : > { %11704 = vmatpush3.bf16.msra.mxu0 %v12912_v35 }
 0xace   : > { %11705 = vmatprep.subr.bf16.mxu0 %v15052_v32 }
 0xad1   : > { %11706 = vmatpush3.bf16.msra.mxu0 %v12913_v3 }
 0xad2   : > { %11707 = vmatprep.subr.bf16.mxu0 %v15052_v32 }
 0xad5   : > { %11708 = vmatpush3.bf16.msra.mxu0 %v12914_v2 }
 0xad6   : > { %11709 = vmatprep.subr.bf16.mxu0 %v15052_v32 }
 0xad9   : > { %11710 = vmatpush3.bf16.msra.mxu0 %v12915_v24 }
 0xadc   : > { %11712 = vmatmul.mubr.msk.bf16.vlgmr.msra.gmra.mrb[32].mxu0 %vm15340_vm1, %v9714_v31 }
 0xbaf   : > { %v7768_v61 = vpop.f32.mrb[32].mxu0 }
 0xbb0   : > { %v7783_v28 = vmul.f32 %v9716_v23, %v7768_v61  ;;  %v11713_v7 = vpop.f32.mrb[33].mxu0 }
 0xbb1   : > { %v7771_v58 = vpop.f32.mrb[34].mxu0 }
 0xbb2   : > { %v7789_v1 = vadd.f32 %v9717_v6, %v7783_v28  ;;  %v7784_v43 = vmul.f32 %v9716_v23, %v7771_v58  ;;  %v11714_v55 = vpop.f32.mrb[35].mxu0 }
 0xbb4   : > { %v7791_v39 = vmul.f32 0.1, %v7789_v1  ;;  %v7790_v11 = vadd.f32 %v9717_v6, %v7784_v43 }
 0xbb6   : > { %v7792_v57 = vmul.f32 0.1, %v7790_v11  ;;  %v7793_v27 = vmax.f32 %v7789_v1, %v7791_v39 }
 0xbb8   : > { %v7794_v15 = vmax.f32 %v7790_v11, %v7792_v57 }
 0xbba   : > { %v7795_v60 = vpack.c.bf16 %v7794_v15, %v7793_v27 }
 0xbbc   : > { %11771 = vmatmul.mubr.bf16.vlgmr.msra.gmra.mrb[140].mxu1 %v7795_v60 }
 0xbbd   : > { %12166 = vmatpush3.bf16.msra.mxu1 %v15065_v10  ;;  %11790 = vmatprep.mubr.msk.f32.mxu1 %vm5653_vm11, %v9752_v42 }
 0xbbe   : > { %12168 = vmatprep.subr.bf16.mxu1 %v15062_v38 }
 0xbc1   : > { %12170 = vmatpush3.bf16.msra.mxu1 %v15062_v38 }
 0xbc2   : > { %12172 = vmatprep.subr.bf16.mxu1 %v15076_v14 }
 0xbc5   : > { %12174 = vmatpush3.bf16.msra.mxu1 %v15076_v14 }
 0xbc6   : > { %12176 = vmatprep.subr.bf16.mxu1 %v15073_v50 }
 0xbc9   : > { %12178 = vmatpush3.bf16.msra.mxu1 %v15073_v50 }
 0xbca   : > { %11793 = vmatprep.subr.bf16.mxu1 %v15052_v32 }
 0xbcc   : > { %11791 = vmatmul.mubr.msk.f32.vlgmr.msra.gmra.mrb[138].mxu1 %vm5653_vm11, %v9753_v54 }
 0xbcd   : > { %11794 = vmatpush3.bf16.msra.mxu1 %v12916_v52  ;;  %11809 = vmatprep.mubr.msk.bf16.mxu1 %vm13130_vm7, %v15052_v32 }
 0xbce   : > { %11795 = vmatprep.subr.bf16.mxu1 %v15052_v32 }
 0xbd1   : > { %11796 = vmatpush3.bf16.msra.mxu1 %v12917_v59 }
 0xbd2   : > { %11797 = vmatprep.subr.bf16.mxu1 %v15052_v32 }
 0xbd5   : > { %11798 = vmatpush3.bf16.msra.mxu1 %v12918_v41 }
 0xbd6   : > { %11799 = vmatprep.subr.bf16.mxu1 %v15052_v32 }
 0xbd9   : > { %11800 = vmatpush3.bf16.msra.mxu1 %v12919_v56 }
 0xbda   : > { %11801 = vmatprep.subr.bf16.mxu1 %v15052_v32 }
 0xbdd   : > { %11802 = vmatpush3.bf16.msra.mxu1 %v12920_v0 }
 0xbde   : > { %11803 = vmatprep.subr.bf16.mxu1 %v15052_v32 }
 0xbe1   : > { %11804 = vmatpush3.bf16.msra.mxu1 %v12921_v25 }
 0xbe2   : > { %11805 = vmatprep.subr.bf16.mxu1 %v15052_v32 }
 0xbe5   : > { %11806 = vmatpush3.bf16.msra.mxu1 %v12922_v21 }
 0xbe6   : > { %11807 = vmatprep.subr.bf16.mxu1 %v15052_v32  ;;  %v9781_v32 = vld [vmem:[%s15789_s11 + $0x28] sm:$0xff] }
 0xbe9   : > { %11808 = vmatpush3.bf16.msra.mxu1 %v12923_v47 }
 0xbea   : > { %12180 = vmatprep.subr.bf16.mxu1 %v15065_v10 }
 0xc9f   : > { %v11792_v17 = vpop.f32.mrb[138].mxu1 }
 0xca0   : > { %v8166_v8 = vpop.f32.mrb[139].mxu1 }
 0xca1   : > { %v8175_v34 = vpack.c.bf16 %v11792_v17, %v8166_v8 }
 0xca3   : > { %11810 = vmatmul.mubr.bf16.vlgmr.msra.gmra.mrb[140].mxu1 %v8175_v34 }
 0xca4   : > { %12182 = vmatpush3.bf16.msra.mxu1 %v15065_v10  ;;  %11829 = vmatprep.mubr.msk.f32.mxu1 %vm5653_vm11, %v9780_v18 }
 0xca5   : > { %12184 = vmatprep.subr.bf16.mxu1 %v15062_v38 }
 0xca8   : > { %12186 = vmatpush3.bf16.msra.mxu1 %v15062_v38 }
 0xca9   : > { %12188 = vmatprep.subr.bf16.mxu1 %v15076_v14 }
 0xcac   : > { %12190 = vmatpush3.bf16.msra.mxu1 %v15076_v14 }
 0xcad   : > { %12192 = vmatprep.subr.bf16.mxu1 %v15073_v50 }
 0xcb0   : > { %12194 = vmatpush3.bf16.msra.mxu1 %v15073_v50 }
 0xcb1   : > { %11832 = vmatprep.subr.bf16.mxu1 %v15638_v26 }
 0xcb3   : > { %11830 = vmatmul.mubr.msk.f32.vlgmr.msra.gmra.mrb[144].mxu1 %vm5653_vm11, %v9781_v32 }
 0xcb4   : > { %11833 = vmatpush3.bf16.msra.mxu1 %v12924_v37  ;;  %11848 = vmatprep.mubr.msk.bf16.mxu1 %vm13130_vm7, %v15638_v26 }
 0xcb5   : > { %11834 = vmatprep.subr.bf16.mxu1 %v15638_v26 }
 0xcb8   : > { %11835 = vmatpush3.bf16.msra.mxu1 %v12925_v5 }
 0xcb9   : > { %11836 = vmatprep.subr.bf16.mxu1 %v15638_v26 }
 0xcbc   : > { %11837 = vmatpush3.bf16.msra.mxu1 %v12926_v9 }
 0xcbd   : > { %11838 = vmatprep.subr.bf16.mxu1 %v15638_v26 }
 0xcc0   : > { %11839 = vmatpush3.bf16.msra.mxu1 %v12927_v51 }
 0xcc1   : > { %11840 = vmatprep.subr.bf16.mxu1 %v15638_v26 }
 0xcc4   : > { %11841 = vmatpush3.bf16.msra.mxu1 %v12928_v13 }
 0xcc5   : > { %11842 = vmatprep.subr.bf16.mxu1 %v15638_v26 }
 0xcc8   : > { %11843 = vmatpush3.bf16.msra.mxu1 %v12929_v46 }
 0xcc9   : > { %11844 = vmatprep.subr.bf16.mxu1 %v15638_v26 }
 0xccc   : > { %11845 = vmatpush3.bf16.msra.mxu1 %v12930_v45 }
 0xccd   : > { %11846 = vmatprep.subr.bf16.mxu1 %v15638_v26 }
 0xcd0   : > { %11847 = vmatpush3.bf16.msra.mxu1 %v12931_v62 }
 0xcd1   : > { %12196 = vmatprep.subr.bf16.mxu1 %v15065_v10 }
 0xd86   : > { %v11831_v63 = vpop.f32.mrb[144].mxu1 }
 0xd87   : > { %v8359_v33 = vpop.f32.mrb[145].mxu1 }
 0xd88   : > { %v8368_v53 = vpack.c.bf16 %v11831_v63, %v8359_v33 }
 0xd8a   : > { %11849 = vmatmul.mubr.bf16.vlgmr.msra.gmra.mrb[140].mxu1 %v8368_v53 }
 0xd8b   : > { %12198 = vmatpush3.bf16.msra.mxu1 %v15065_v10  ;;  %11868 = vmatprep.mubr.msk.f32.mxu1 %vm5653_vm11, %v9808_v30  ;;  %v12932_v10 = vld [vmem:[%s15783_s5 + $0xc0] sm:$0xff]  }
 0xd8c   : > { %12200 = vmatprep.subr.bf16.mxu1 %v15062_v38 }
 0xd8f   : > { %12202 = vmatpush3.bf16.msra.mxu1 %v15062_v38  ;;  %v12933_v38 = vld [vmem:[%s15783_s5 + $0xc8] sm:$0xff]  }
 0xd90   : > { %12204 = vmatprep.subr.bf16.mxu1 %v15076_v14 }
 0xd93   : > { %12206 = vmatpush3.bf16.msra.mxu1 %v15076_v14  ;;  %v12935_v14 = vld [vmem:[%s15783_s5 + $0xd8] sm:$0xff]  }
 0xd94   : > { %12208 = vmatprep.subr.bf16.mxu1 %v15073_v50 }
 0xd97   : > { %12210 = vmatpush3.bf16.msra.mxu1 %v15073_v50  ;;  %v12934_v50 = vld [vmem:[%s15783_s5 + $0xd0] sm:$0xff]  }
 0xd98   : > { %11871 = vmatprep.subr.bf16.mxu1 %v15638_v26 }
 0xd9a   : > { %11869 = vmatmul.mubr.msk.f32.vlgmr.msra.gmra.mrb[146].mxu1 %vm5653_vm11, %v9809_v49 }
 0xd9b   : > { %11872 = vmatpush3.bf16.msra.mxu1 %v12932_v10  ;;  %11887 = vmatprep.mubr.msk.bf16.mxu1 %vm13130_vm7, %v15638_v26 }
 0xd9c   : > { %11873 = vmatprep.subr.bf16.mxu1 %v15638_v26 }
 0xd9f   : > { %11874 = vmatpush3.bf16.msra.mxu1 %v12933_v38 }
 0xda0   : > { %11875 = vmatprep.subr.bf16.mxu1 %v15638_v26 }
 0xda3   : > { %11876 = vmatpush3.bf16.msra.mxu1 %v12934_v50 }
 0xda4   : > { %11877 = vmatprep.subr.bf16.mxu1 %v15638_v26 }
 0xda7   : > { %11878 = vmatpush3.bf16.msra.mxu1 %v12935_v14 }
 0xda8   : > { %11879 = vmatprep.subr.bf16.mxu1 %v15638_v26 }
 0xdab   : > { %11880 = vmatpush3.bf16.msra.mxu1 %v12936_v44 }
 0xdac   : > { %11881 = vmatprep.subr.bf16.mxu1 %v15638_v26 }
 0xdaf   : > { %11882 = vmatpush3.bf16.msra.mxu1 %v12937_v16 }
 0xdb0   : > { %11883 = vmatprep.subr.bf16.mxu1 %v15638_v26 }
 0xdb3   : > { %11884 = vmatpush3.bf16.msra.mxu1 %v12938_v36 }
 0xdb4   : > { %11885 = vmatprep.subr.bf16.mxu1 %v15638_v26 }
 0xdb7   : > { %11886 = vmatpush3.bf16.msra.mxu1 %v12939_v29 }
 0xe6d   : > { %v11870_v20 = vpop.f32.mrb[146].mxu1 }
 0xe6e   : > { %v8552_v19 = vpop.f32.mrb[147].mxu1 }
 0xe6f   : > { %v8561_v12 = vpack.c.bf16 %v11870_v20, %v8552_v19 }
 0xe71   : > { %11888 = vmatmul.mubr.bf16.vlgmr.msra.gmra.mrb[140].mxu1 %v8561_v12 }
 0xf44   : > { %v8661_v4 = vpop.f32.mrb[140].mxu1 }
 0xf45   : > { %v8676_v35 = vmul.f32 %v9836_v22, %v8661_v4  ;;  %v11889_v3 = vpop.f32.mrb[141].mxu1 }
 0xf46   : > { %v8664_v2 = vpop.f32.mrb[142].mxu1 }
 0xf47   : > { %v8682_v24 = vadd.f32 %v9837_v48, %v8676_v35  ;;  %v8677_v40 = vmul.f32 %v9836_v22, %v8664_v2  ;;  %v11890_v31 = vpop.f32.mrb[143].mxu1 }
 0xf49   : > { %8684 = vst [vmem:[%s450_s18] sm:$0xff] %v8682_v24  ;;  %v8683_v23 = vadd.f32 %v9837_v48, %v8677_v40 }
 0xf4b   : > { %8685 = vst [vmem:[%s450_s18 + $0x8] sm:$0xff] %v8683_v23 }
 0xf4c   : > { %13059 = shalt.err (!%p13056_p11)
}
 0xf4d   : > { %s13060_s20 = scalar_lea.hbm %s15735_s28, 256  ;;  %s13064_s24 = scalar_lea.hbm %s16080_s27, 512 }
 0xf4e   : > { %p13061_p13 = scmp.ne.s32.totalorder %s15735_s28, %s13060_s20  ;;  %p13065_p6 = scmp.lt.u32.totalorder %s15735_s28, %s16080_s27 }
 0xf4f   : > { %p13066_p9 = scmp.lt.u32.totalorder %s13064_s24, %s13060_s20  ;;  %p13068_p10 = scmp.lt.u32.totalorder %s13060_s20, %s15735_s28 }
 0xf50   : > { %p13062_p5 = pnand %p13061_p13, %p16081_p1 }
 0xf51   : > { %p13067_p12 = por %p13066_p9, %p13065_p6 }
 0xf52   : > { %p13063_p0 = pneg %p13062_p5 }
 0xf53   : > { %p13069_p2 = por %p13068_p10, %p13067_p12 }
 0xf55   : > { %p13070_p3 = pnand %p13069_p2, %p13063_p0 }
 0xf57   : > { %13073 = shalt.err (!%p13070_p3)
}
 0xf58   : > { %s13132_s18 = smov 128   ;;  %s13133_s14 = smov 8  }
 0xf59   : > { %12607 = dma.vmem_to_hbm [thread:$0]  (%p16081_p1), %s15730_s16, 256, %s15735_s28, %s15737_s29, %s13132_s18, %s13132_s18, %s13133_s14  }
 0xf5a PF: > { %s16082_s23 = sld [smem:[#allocation15_spill]]  ;;  %s16083_s30 = sld [smem:[#allocation13_spill]] }
 0xf5b   : > { %s16084_s25 = sld [smem:[#allocation18_spill]] }
 0xf60   : > { %p12629_p4 = scmp.ge.s32.totalorder %s16082_s23, 2  ;;  %s8715_s19 = sand.u32 1, %s16083_s30  }
 0xf61   : > { %p16085_p7 = scmp.ne.s32.totalorder %s16084_s25, 0  ;;  %s8716_s26 = scalar_lea.sflag [#allocation5], %s8715_s19 }
 0xf63   : > { %p12620_p8 = pnand %p12629_p4, %p16085_p7 }
 0xf65   : > { %13099 = dma.done.wait (!%p12620_p8), %s8716_s26, 256  }
 0xf66   : > { %13101 = vsyncadd (!%p12620_p8), %s8716_s26, 4294967040  ;;  %s16086_s24 = sld [smem:[#allocation16_spill]]  ;;  %s16087_s17 = sld [smem:[#allocation14_spill]] }
 0xf67   : > { %s16088_s23 = sld [smem:[#allocation17_spill]]  ;;  %s16089_s21 = smov %s13108_s22 }
 0xf6c   : > { %p24_p11 = scmp.ge.s32.totalorder %s16086_s24, 4   ;;  %s16090_s22 = smov %s16087_s17 }
 0xf6e   :  { %26 = sbr.rel (!%p24_p11) target bundleno = 8 (0x8), region = 156 }
 0xf75   :  { %8721 = vsyncpa [#allocation4], 1 }
 0xf76   :  { %8723 = vsyncpa [#allocation4 + $0x1], 1 }
 0xf77   :  { %8724 = vsyncpa [#allocation7], 1 }
 0xf78   :  { %8725 = vsyncpa [#allocation5], 1 }
 0xf79   :  { %8727 = vsyncpa [#allocation5 + $0x1], 1 }

</bundles_post_ra>
